<compile_context>
chip_gen: v7x
topology: tpu7x:2x2x1
jax: 0.10.0
libtpu: 0.0.40
codegen_flags: <defaults>
</compile_context>

<pallas_src>
import functools

import jax
import jax.numpy as jnp
from jax.experimental import pallas as pl
from jax.experimental.pallas import tpu as pltpu


def _affine_coupling_kernel(
    x_ref,                                  # (TB, da): in_a tile (pass 0) / in_b tile (pass 2)
    w1_ref, b1_ref, g1_ref, be1_ref,        # Linear1 + BN1 params (hidden padded to hp lanes)
    w2_ref, b2_ref, g2_ref, be2_ref,        # Linear2 + BN2 params
    w3_ref, b3_ref,                         # ZeroFC with exp(3*scale) pre-folded, rows padded
    out_ref,                                # (TB, db): transformed half only (aliased to x)
    logdet_ref,                             # (1, TB): lane-dense logdet tile
    h_scr,                                  # VMEM (B, hp): resident h1, then h2 (in place)
    s1_sum, s1_sq, s2_sum, s2_sq,           # VMEM (1, hp): BN1/BN2 sum and sum-of-squares
    bn_a, bn_c,                             # VMEM (1, hp): per-pass folded BN scale / shift
    *, n_total, tile_rows, db,
):
    p = pl.program_id(0)            # pass index: 0, 1, 2
    i = pl.program_id(1)            # batch-tile index
    row0 = pl.multiple_of(i * tile_rows, tile_rows)
    inv_n = 1.0 / float(n_total)    # BatchNorm uses biased (1/N) variance
    eps = 0.01
    slope = 0.01                    # LeakyReLU negative_slope

    @pl.when(p == 0)
    def _pass0():
        @pl.when(i == 0)
        def _init():
            s1_sum[...] = jnp.zeros_like(s1_sum)
            s1_sq[...] = jnp.zeros_like(s1_sq)
            s2_sum[...] = jnp.zeros_like(s2_sum)
            s2_sq[...] = jnp.zeros_like(s2_sq)

        in_a = x_ref[...].astype(jnp.float32)
        h = jnp.dot(in_a, w1_ref[...], preferred_element_type=jnp.float32) + b1_ref[...]
        h = jnp.where(h >= 0, h, slope * h)
        h_scr[pl.ds(row0, tile_rows), :] = h
        s1_sum[...] = s1_sum[...] + jnp.sum(h, axis=0, keepdims=True)
        s1_sq[...] = s1_sq[...] + jnp.sum(h * h, axis=0, keepdims=True)

    @pl.when(p == 1)
    def _pass1():
        @pl.when(i == 0)
        def _fold_bn1():
            mu = s1_sum[...] * inv_n
            var = s1_sq[...] * inv_n - mu * mu          # one-pass biased variance
            a = jax.lax.rsqrt(var + eps) * g1_ref[...]
            bn_a[...] = a
            bn_c[...] = be1_ref[...] - mu * a

        h1 = h_scr[pl.ds(row0, tile_rows), :]
        h1 = h1 * bn_a[...] + bn_c[...]                 # BN1 with pre-folded scale/shift
        h2 = jnp.dot(h1, w2_ref[...], preferred_element_type=jnp.float32) + b2_ref[...]
        h2 = jnp.where(h2 >= 0, h2, slope * h2)
        h_scr[pl.ds(row0, tile_rows), :] = h2           # overwrite h1 in place
        s2_sum[...] = s2_sum[...] + jnp.sum(h2, axis=0, keepdims=True)
        s2_sq[...] = s2_sq[...] + jnp.sum(h2 * h2, axis=0, keepdims=True)

    @pl.when(p == 2)
    def _pass2():
        @pl.when(i == 0)
        def _fold_bn2():
            mu = s2_sum[...] * inv_n
            var = s2_sq[...] * inv_n - mu * mu
            a = jax.lax.rsqrt(var + eps) * g2_ref[...]
            bn_a[...] = a
            bn_c[...] = be2_ref[...] - mu * a

        h2 = h_scr[pl.ds(row0, tile_rows), :]
        h2 = h2 * bn_a[...] + bn_c[...]                 # BN2 with pre-folded scale/shift
        z = jnp.dot(h2, w3_ref[...], preferred_element_type=jnp.float32) + b3_ref[...]
        log_s = jnp.tanh(z[:, :db])
        t = z[:, db:]
        in_b = x_ref[...].astype(jnp.float32)
        out_ref[...] = ((in_b + t) * jnp.exp(log_s)).astype(out_ref.dtype)
        # Lane-dense per-row sum: ones(1, db) contracted against the last dim of
        # log_s (trans_b matmul on the MXU) yields logdet already laid out as
        # (1, TB), avoiding a sublane reduce + 1-lane masked stores.
        ones_row = jnp.ones((1, db), jnp.float32)
        ld = jax.lax.dot_general(
            ones_row, log_s, (((1,), (1,)), ((), ())),
            preferred_element_type=jnp.float32)
        logdet_ref[...] = ld.astype(logdet_ref.dtype)


def affine_coupling_forward(x, params, block_rows=512):
    """x: (B, ndim) float32 (donated / overwritten in place via the alias).

    Returns (out, logdet): out[:, :da] == in_a, out[:, da:] == (in_b + t) * s,
    logdet has shape (B,).
    """
    B, ndim = x.shape
    da = ndim - ndim // 2
    db = ndim // 2
    if da != db or db % 128 != 0:
        raise ValueError("kernel assumes even ndim with ndim // 2 a multiple of 128")
    hidden = params["w1"].shape[1]
    hp = ((hidden + 127) // 128) * 128            # lane-dense padded hidden width
    tb = min(block_rows, B)
    if B % tb != 0 or tb % 8 != 0:
        raise ValueError("batch must be divisible by the (8-aligned) row tile")
    n_tiles = B // tb

    f32 = jnp.float32

    def pad_cols(a, width):
        a = a.astype(f32)
        return jnp.pad(a, ((0, 0), (0, width - a.shape[1])))

    # Fold the ZeroFC output scale exp(3*scale) into its weights/bias (paid once).
    zf_scale = jnp.exp(params["sc3"].astype(f32) * 3.0)            # (1, 2*db)
    w3f = params["w3"].astype(f32) * zf_scale                      # (hidden, 2*db)
    b3f = params["b3"].astype(f32) * zf_scale                      # (1, 2*db)

    # Zero-pad the hidden dimension to hp lanes.  Zero W1 columns / b1 / gamma
    # keep the padded lanes exactly 0 through LeakyReLU and both BN stages, and
    # the zero W2/W3 rows make those lanes inert in the following matmuls.
    w1p = pad_cols(params["w1"], hp)                               # (da, hp)
    b1p = pad_cols(params["b1"], hp)
    g1p = pad_cols(params["g1"], hp)
    be1p = pad_cols(params["be1"], hp)
    w2p = jnp.pad(params["w2"].astype(f32),
                  ((0, hp - hidden), (0, hp - hidden)))            # (hp, hp)
    b2p = pad_cols(params["b2"], hp)
    g2p = pad_cols(params["g2"], hp)
    be2p = pad_cols(params["be2"], hp)
    w3p = jnp.pad(w3f, ((0, hp - hidden), (0, 0)))                 # (hp, 2*db)

    # x column half per pass: in_a (col block 0) in pass 0, in_b (col block 1)
    # in pass 2; during pass 1 pin to block (0, 1) so it acts as a prefetch and
    # nothing is re-fetched at the start of pass 2.
    def x_index_map(p, i):
        return jnp.where(p == 1, 0, i), jnp.where(p == 0, 0, 1)

    # Outputs are written only in pass 2; pin the block index before that so the
    # uninitialized (x-aliased) buffers are never flushed early.
    def out_index_map(p, i):
        return jnp.where(p == 2, i, 0), 1

    def logdet_index_map(p, i):
        return 0, jnp.where(p == 2, i, 0)

    def const_spec(arr):
        # Small parameter: fetched once (constant block index), stays resident.
        return pl.BlockSpec(arr.shape, lambda p, i: (0, 0))

    kernel = functools.partial(
        _affine_coupling_kernel, n_total=B, tile_rows=tb, db=db)

    # Explicit VMEM budget: resident h scratch + stat/BN rows + double-buffered
    # x/out/logdet tiles + double-buffered params, 1.5x headroom, clamped to
    # [32 MiB, 64 MiB] so it is valid on v5e/v6e (128 MiB) and v7x (64 MiB).
    itm = 4
    est = itm * (
        B * hp                                    # h_scr
        + 6 * 8 * hp                              # stat / bn rows (sublane-padded)
        + 2 * (tb * da + tb * db + 8 * tb)        # double-buffered x / out / logdet tiles
        + 2 * (w1p.size + w2p.size + w3p.size)    # double-buffered weights
        + 2 * 8 * (6 * hp + 2 * db)               # double-buffered bias / BN row vectors
    )
    vmem_limit = int(min(max(est * 3 // 2, 32 << 20), 64 << 20))

    out, logdet = pl.pallas_call(
        kernel,
        grid=(3, n_tiles),
        in_specs=[
            pl.BlockSpec((tb, da), x_index_map),
            const_spec(w1p), const_spec(b1p), const_spec(g1p), const_spec(be1p),
            const_spec(w2p), const_spec(b2p), const_spec(g2p), const_spec(be2p),
            const_spec(w3p), const_spec(b3f),
        ],
        out_specs=(
            pl.BlockSpec((tb, db), out_index_map),
            pl.BlockSpec((1, tb), logdet_index_map),
        ),
        out_shape=(
            jax.ShapeDtypeStruct((B, ndim), x.dtype),
            jax.ShapeDtypeStruct((1, B), jnp.float32),
        ),
        scratch_shapes=[
            pltpu.VMEM((B, hp), jnp.float32),     # resident h1 / h2
            pltpu.VMEM((1, hp), jnp.float32),     # BN1 sum
            pltpu.VMEM((1, hp), jnp.float32),     # BN1 sumsq
            pltpu.VMEM((1, hp), jnp.float32),     # BN2 sum
            pltpu.VMEM((1, hp), jnp.float32),     # BN2 sumsq
            pltpu.VMEM((1, hp), jnp.float32),     # folded BN scale a
            pltpu.VMEM((1, hp), jnp.float32),     # folded BN shift c
        ],
        # in_a passthrough is free: out aliases x and only columns [da:) are written.
        input_output_aliases={0: 0},
        compiler_params=pltpu.CompilerParams(
            # BN statistics are whole-batch -> both axes must run sequentially
            # (a "parallel" tile axis would give per-core statistics).
            dimension_semantics=("arbitrary", "arbitrary"),
            vmem_limit_bytes=vmem_limit),
    )(x, w1p, b1p, g1p, be1p, w2p, b2p, g2p, be2p, w3p, b3f)
    return out, logdet[0]


def init_params(key, ndim, seqfrac=4):
    """Synthetic init matching the module's parameter shapes.

    Linear weights ~ N(0, 0.05) as in __init__.  ZeroFC params are zero in the
    real __init__; small nonzero values here so the coupling is exercised."""
    da = ndim - ndim // 2
    db = ndim // 2
    h = int(ndim / (2 * seqfrac))
    ks = jax.random.split(key, 6)
    return {
        # stored (in_dim, out_dim) so the kernel computes x @ W + b
        "w1": 0.05 * jax.random.normal(ks[0], (da, h), jnp.float32),
        "b1": jnp.zeros((1, h), jnp.float32),
        "g1": jnp.ones((1, h), jnp.float32),      # BatchNorm gamma
        "be1": jnp.zeros((1, h), jnp.float32),    # BatchNorm beta
        "w2": 0.05 * jax.random.normal(ks[1], (h, h), jnp.float32),
        "b2": jnp.zeros((1, h), jnp.float32),
        "g2": jnp.ones((1, h), jnp.float32),
        "be2": jnp.zeros((1, h), jnp.float32),
        # ZeroFC
        "w3": 0.02 * jax.random.normal(ks[2], (h, 2 * db), jnp.float32),
        "b3": 0.01 * jax.random.normal(ks[3], (1, 2 * db), jnp.float32),
        "sc3": 0.01 * jax.random.normal(ks[4], (1, 2 * db), jnp.float32),
    }


def reference_forward(x, p):
    """Pure-JAX reference mirroring the PyTorch forward in training mode."""
    ndim = x.shape[1]
    da = ndim - ndim // 2
    db = ndim // 2
    in_a, in_b = x[:, :da], x[:, da:]

    def bn(h, g, b):
        mu = jnp.mean(h, axis=0, keepdims=True)
        var = jnp.mean((h - mu) ** 2, axis=0, keepdims=True)
        return (h - mu) / jnp.sqrt(var + 0.01) * g + b

    h = in_a @ p["w1"] + p["b1"]
    h = jnp.where(h >= 0, h, 0.01 * h)
    h = bn(h, p["g1"], p["be1"])
    h = h @ p["w2"] + p["b2"]
    h = jnp.where(h >= 0, h, 0.01 * h)
    h = bn(h, p["g2"], p["be2"])
    z = (h @ p["w3"] + p["b3"]) * jnp.exp(p["sc3"] * 3.0)
    log_s = jnp.tanh(z[:, :db])
    t = z[:, db:]
    out_b = (in_b + t) * jnp.exp(log_s)
    return jnp.concatenate([in_a, out_b], axis=1), jnp.sum(log_s, axis=1)


if __name__ == "__main__":
    key = jax.random.PRNGKey(0)
    kx, kp = jax.random.split(key)

    # ndim=256, seqfrac=4 -> in_a dim 128, hidden 32 (padded to 128 lanes),
    # net out 256; B=1024 with 512-row tiles -> grid (3, 2).
    B, ndim, seqfrac = 1024, 256, 4
    x = jax.random.normal(kx, (B, ndim), jnp.float32)
    params = init_params(kp, ndim, seqfrac)

    # Compute the reference FIRST: the kernel call donates x and writes the
    # transformed half in place (input_output_aliases).
    out_expected, logdet_expected = reference_forward(x, params)
    out_expected = jax.block_until_ready(out_expected)
    logdet_expected = jax.block_until_ready(logdet_expected)

    fwd = jax.jit(affine_coupling_forward, donate_argnums=(0,))
    out, logdet = fwd(x, params)
    out = jax.block_until_ready(out)
    logdet = jax.block_until_ready(logdet)

    assert out.shape == (B, ndim) and logdet.shape == (B,)
    assert jnp.allclose(out, out_expected, atol=1e-4, rtol=1e-4), "output mismatch"
    assert jnp.allclose(logdet, logdet_expected, atol=1e-4, rtol=1e-4), "logdet mismatch"

    print("KERNEL_OK")
</pallas_src>

<mosaic_0001>
module attributes {stable_mosaic.version = 11 : i64} {
  func.func @_affine_coupling_kernel(%arg0: i32, %arg1: i32, %arg2: memref<512x128xf32, #tpu.memory_space<vmem>>, %arg3: memref<128x128xf32, #tpu.memory_space<vmem>>, %arg4: memref<1x128xf32, #tpu.memory_space<vmem>>, %arg5: memref<1x128xf32, #tpu.memory_space<vmem>>, %arg6: memref<1x128xf32, #tpu.memory_space<vmem>>, %arg7: memref<128x128xf32, #tpu.memory_space<vmem>>, %arg8: memref<1x128xf32, #tpu.memory_space<vmem>>, %arg9: memref<1x128xf32, #tpu.memory_space<vmem>>, %arg10: memref<1x128xf32, #tpu.memory_space<vmem>>, %arg11: memref<128x256xf32, #tpu.memory_space<vmem>>, %arg12: memref<1x256xf32, #tpu.memory_space<vmem>>, %arg13: memref<512x128xf32, #tpu.memory_space<vmem>>, %arg14: memref<1x512xf32, #tpu.memory_space<vmem>>, %arg15: memref<1024x128xf32, #tpu.memory_space<vmem>>, %arg16: memref<1x128xf32, #tpu.memory_space<vmem>>, %arg17: memref<1x128xf32, #tpu.memory_space<vmem>>, %arg18: memref<1x128xf32, #tpu.memory_space<vmem>>, %arg19: memref<1x128xf32, #tpu.memory_space<vmem>>, %arg20: memref<1x128xf32, #tpu.memory_space<vmem>>, %arg21: memref<1x128xf32, #tpu.memory_space<vmem>>) attributes {dimension_semantics = [#tpu.dimension_semantics<arbitrary>, #tpu.dimension_semantics<arbitrary>], iteration_bounds = array<i64: 3, 2>, scalar_prefetch = 0 : i64, scratch_operands = 7 : i64, tpu.core_type = #tpu.core_type<tc>, window_params = [{transform_indices = @transform_0, window_bounds = array<i64: 512, 128>}, {pipeline_mode = #tpu.pipeline_mode<synchronous>, transform_indices = @transform_1, window_bounds = array<i64: 128, 128>}, {pipeline_mode = #tpu.pipeline_mode<synchronous>, transform_indices = @transform_2, window_bounds = array<i64: 1, 128>}, {pipeline_mode = #tpu.pipeline_mode<synchronous>, transform_indices = @transform_3, window_bounds = array<i64: 1, 128>}, {pipeline_mode = #tpu.pipeline_mode<synchronous>, transform_indices = @transform_4, window_bounds = array<i64: 1, 128>}, {pipeline_mode = #tpu.pipeline_mode<synchronous>, transform_indices = @transform_5, window_bounds = array<i64: 128, 128>}, {pipeline_mode = #tpu.pipeline_mode<synchronous>, transform_indices = @transform_6, window_bounds = array<i64: 1, 128>}, {pipeline_mode = #tpu.pipeline_mode<synchronous>, transform_indices = @transform_7, window_bounds = array<i64: 1, 128>}, {pipeline_mode = #tpu.pipeline_mode<synchronous>, transform_indices = @transform_8, window_bounds = array<i64: 1, 128>}, {pipeline_mode = #tpu.pipeline_mode<synchronous>, transform_indices = @transform_9, window_bounds = array<i64: 128, 256>}, {pipeline_mode = #tpu.pipeline_mode<synchronous>, transform_indices = @transform_10, window_bounds = array<i64: 1, 256>}, {transform_indices = @transform_11, window_bounds = array<i64: 512, 128>}, {transform_indices = @transform_12, window_bounds = array<i64: 1, 512>}]} {
    %c512_i32 = arith.constant 512 : i32
    %0 = arith.muli %arg1, %c512_i32 : i32
    %1 = tpu.assume_multiple %0, 512 : i32
    %c0_i32 = arith.constant 0 : i32
    %2 = arith.cmpi eq, %arg0, %c0_i32 : i32
    %3 = arith.extui %2 : i1 to i32
    %c0_i32_0 = arith.constant 0 : i32
    %4 = arith.cmpi ne, %3, %c0_i32_0 : i32
    scf.if %4 {
      %c0_i32_3 = arith.constant 0 : i32
      %11 = arith.cmpi eq, %arg1, %c0_i32_3 : i32
      %12 = arith.extui %11 : i1 to i32
      %c0_i32_4 = arith.constant 0 : i32
      %13 = arith.cmpi ne, %12, %c0_i32_4 : i32
      scf.if %13 {
        %cst_23 = arith.constant 0.000000e+00 : f32
        %38 = vector.broadcast %cst_23 : f32 to vector<1x128xf32>
        %c0_24 = arith.constant 0 : index
        %c0_25 = arith.constant 0 : index
        %39 = vector.load %arg16[%c0_24, %c0_25] : memref<1x128xf32, #tpu.memory_space<vmem>>, vector<1x128xf32>
        tpu.vector_store %arg16[%c0_24, %c0_25], %38 {strides = array<i32>} : memref<1x128xf32, #tpu.memory_space<vmem>>, vector<1x128xf32>,
        %cst_26 = arith.constant 0.000000e+00 : f32
        %40 = vector.broadcast %cst_26 : f32 to vector<1x128xf32>
        %c0_27 = arith.constant 0 : index
        %c0_28 = arith.constant 0 : index
        %41 = vector.load %arg17[%c0_27, %c0_28] : memref<1x128xf32, #tpu.memory_space<vmem>>, vector<1x128xf32>
        tpu.vector_store %arg17[%c0_27, %c0_28], %40 {strides = array<i32>} : memref<1x128xf32, #tpu.memory_space<vmem>>, vector<1x128xf32>,
        %cst_29 = arith.constant 0.000000e+00 : f32
        %42 = vector.broadcast %cst_29 : f32 to vector<1x128xf32>
        %c0_30 = arith.constant 0 : index
        %c0_31 = arith.constant 0 : index
        %43 = vector.load %arg18[%c0_30, %c0_31] : memref<1x128xf32, #tpu.memory_space<vmem>>, vector<1x128xf32>
        tpu.vector_store %arg18[%c0_30, %c0_31], %42 {strides = array<i32>} : memref<1x128xf32, #tpu.memory_space<vmem>>, vector<1x128xf32>,
        %cst_32 = arith.constant 0.000000e+00 : f32
        %44 = vector.broadcast %cst_32 : f32 to vector<1x128xf32>
        %c0_33 = arith.constant 0 : index
        %c0_34 = arith.constant 0 : index
        %45 = vector.load %arg19[%c0_33, %c0_34] : memref<1x128xf32, #tpu.memory_space<vmem>>, vector<1x128xf32>
        tpu.vector_store %arg19[%c0_33, %c0_34], %44 {strides = array<i32>} : memref<1x128xf32, #tpu.memory_space<vmem>>, vector<1x128xf32>,
      } else {
      }
      %c0 = arith.constant 0 : index
      %c0_5 = arith.constant 0 : index
      %14 = vector.load %arg2[%c0, %c0_5] : memref<512x128xf32, #tpu.memory_space<vmem>>, vector<512x128xf32>
      %c0_6 = arith.constant 0 : index
      %c0_7 = arith.constant 0 : index
      %15 = vector.load %arg3[%c0_6, %c0_7] : memref<128x128xf32, #tpu.memory_space<vmem>>, vector<128x128xf32>
      %cst = arith.constant dense<0.000000e+00> : vector<512x128xf32>
      %16 = tpu.matmul %14, %15, %cst {dimension_numbers = #tpu.dot_dimension_numbers<[1], [0], [0], [1], [0, 0, 1, 1], [], []>} : vector<512x128xf32>, vector<128x128xf32>, vector<512x128xf32> -> vector<512x128xf32>
      %c0_8 = arith.constant 0 : index
      %c0_9 = arith.constant 0 : index
      %17 = vector.load %arg4[%c0_8, %c0_9] : memref<1x128xf32, #tpu.memory_space<vmem>>, vector<1x128xf32>
      %18 = vector.broadcast %17 : vector<1x128xf32> to vector<512x128xf32>
      %19 = arith.addf %16, %18 : vector<512x128xf32>
      %cst_10 = arith.constant 0.000000e+00 : f32
      %20 = vector.broadcast %cst_10 : f32 to vector<512x128xf32>
      %21 = arith.cmpf oge, %19, %20 : vector<512x128xf32>
      %cst_11 = arith.constant 0.00999999977 : f32
      %22 = vector.broadcast %cst_11 : f32 to vector<512x128xf32>
      %23 = arith.mulf %22, %19 : vector<512x128xf32>
      %24 = arith.select %21, %19, %23 : vector<512x128xi1>, vector<512x128xf32>
      %25 = arith.index_cast %1 : i32 to index
      %c0_12 = arith.constant 0 : index
      %26 = vector.load %arg15[%25, %c0_12] : memref<1024x128xf32, #tpu.memory_space<vmem>>, vector<512x128xf32>
      tpu.vector_store %arg15[%25, %c0_12], %24 {strides = array<i32>} : memref<1024x128xf32, #tpu.memory_space<vmem>>, vector<512x128xf32>,
      %c0_13 = arith.constant 0 : index
      %c0_14 = arith.constant 0 : index
      %27 = vector.load %arg16[%c0_13, %c0_14] : memref<1x128xf32, #tpu.memory_space<vmem>>, vector<1x128xf32>
      %cst_15 = arith.constant dense<0.000000e+00> : vector<128xf32>
      %28 = vector.multi_reduction <add>, %24, %cst_15 [0] : vector<512x128xf32> to vector<128xf32>
      %29 = vector.shape_cast %28 : vector<128xf32> to vector<1x128xf32>
      %30 = arith.addf %27, %29 : vector<1x128xf32>
      %c0_16 = arith.constant 0 : index
      %c0_17 = arith.constant 0 : index
      %31 = vector.load %arg16[%c0_16, %c0_17] : memref<1x128xf32, #tpu.memory_space<vmem>>, vector<1x128xf32>
      tpu.vector_store %arg16[%c0_16, %c0_17], %30 {strides = array<i32>} : memref<1x128xf32, #tpu.memory_space<vmem>>, vector<1x128xf32>,
      %c0_18 = arith.constant 0 : index
      %c0_19 = arith.constant 0 : index
      %32 = vector.load %arg17[%c0_18, %c0_19] : memref<1x128xf32, #tpu.memory_space<vmem>>, vector<1x128xf32>
      %33 = arith.mulf %24, %24 : vector<512x128xf32>
      %cst_20 = arith.constant dense<0.000000e+00> : vector<128xf32>
      %34 = vector.multi_reduction <add>, %33, %cst_20 [0] : vector<512x128xf32> to vector<128xf32>
      %35 = vector.shape_cast %34 : vector<128xf32> to vector<1x128xf32>
      %36 = arith.addf %32, %35 : vector<1x128xf32>
      %c0_21 = arith.constant 0 : index
      %c0_22 = arith.constant 0 : index
      %37 = vector.load %arg17[%c0_21, %c0_22] : memref<1x128xf32, #tpu.memory_space<vmem>>, vector<1x128xf32>
      tpu.vector_store %arg17[%c0_21, %c0_22], %36 {strides = array<i32>} : memref<1x128xf32, #tpu.memory_space<vmem>>, vector<1x128xf32>,
    } else {
    }
    %c1_i32 = arith.constant 1 : i32
    %5 = arith.cmpi eq, %arg0, %c1_i32 : i32
    %6 = arith.extui %5 : i1 to i32
    %c0_i32_1 = arith.constant 0 : i32
    %7 = arith.cmpi ne, %6, %c0_i32_1 : i32
    scf.if %7 {
      %c0_i32_3 = arith.constant 0 : i32
      %11 = arith.cmpi eq, %arg1, %c0_i32_3 : i32
      %12 = arith.extui %11 : i1 to i32
      %c0_i32_4 = arith.constant 0 : i32
      %13 = arith.cmpi ne, %12, %c0_i32_4 : i32
      scf.if %13 {
        %c0_26 = arith.constant 0 : index
        %c0_27 = arith.constant 0 : index
        %45 = vector.load %arg16[%c0_26, %c0_27] : memref<1x128xf32, #tpu.memory_space<vmem>>, vector<1x128xf32>
        %cst_28 = arith.constant 9.765625E-4 : f32
        %46 = vector.broadcast %cst_28 : f32 to vector<1x128xf32>
        %47 = arith.mulf %45, %46 : vector<1x128xf32>
        %c0_29 = arith.constant 0 : index
        %c0_30 = arith.constant 0 : index
        %48 = vector.load %arg17[%c0_29, %c0_30] : memref<1x128xf32, #tpu.memory_space<vmem>>, vector<1x128xf32>
        %cst_31 = arith.constant 9.765625E-4 : f32
        %49 = vector.broadcast %cst_31 : f32 to vector<1x128xf32>
        %50 = arith.mulf %48, %49 : vector<1x128xf32>
        %51 = arith.mulf %47, %47 : vector<1x128xf32>
        %52 = arith.subf %50, %51 : vector<1x128xf32>
        %cst_32 = arith.constant 0.00999999977 : f32
        %53 = vector.broadcast %cst_32 : f32 to vector<1x128xf32>
        %54 = arith.addf %52, %53 : vector<1x128xf32>
        %55 = math.rsqrt %54 : vector<1x128xf32>
        %c0_33 = arith.constant 0 : index
        %c0_34 = arith.constant 0 : index
        %56 = vector.load %arg5[%c0_33, %c0_34] : memref<1x128xf32, #tpu.memory_space<vmem>>, vector<1x128xf32>
        %57 = arith.mulf %55, %56 : vector<1x128xf32>
        %c0_35 = arith.constant 0 : index
        %c0_36 = arith.constant 0 : index
        %58 = vector.load %arg20[%c0_35, %c0_36] : memref<1x128xf32, #tpu.memory_space<vmem>>, vector<1x128xf32>
        tpu.vector_store %arg20[%c0_35, %c0_36], %57 {strides = array<i32>} : memref<1x128xf32, #tpu.memory_space<vmem>>, vector<1x128xf32>,
        %c0_37 = arith.constant 0 : index
        %c0_38 = arith.constant 0 : index
        %59 = vector.load %arg6[%c0_37, %c0_38] : memref<1x128xf32, #tpu.memory_space<vmem>>, vector<1x128xf32>
        %60 = arith.mulf %47, %57 : vector<1x128xf32>
        %61 = arith.subf %59, %60 : vector<1x128xf32>
        %c0_39 = arith.constant 0 : index
        %c0_40 = arith.constant 0 : index
        %62 = vector.load %arg21[%c0_39, %c0_40] : memref<1x128xf32, #tpu.memory_space<vmem>>, vector<1x128xf32>
        tpu.vector_store %arg21[%c0_39, %c0_40], %61 {strides = array<i32>} : memref<1x128xf32, #tpu.memory_space<vmem>>, vector<1x128xf32>,
      } else {
      }
      %14 = arith.index_cast %1 : i32 to index
      %c0 = arith.constant 0 : index
      %15 = vector.load %arg15[%14, %c0] : memref<1024x128xf32, #tpu.memory_space<vmem>>, vector<512x128xf32>
      %c0_5 = arith.constant 0 : index
      %c0_6 = arith.constant 0 : index
      %16 = vector.load %arg20[%c0_5, %c0_6] : memref<1x128xf32, #tpu.memory_space<vmem>>, vector<1x128xf32>
      %17 = vector.broadcast %16 : vector<1x128xf32> to vector<512x128xf32>
      %18 = arith.mulf %15, %17 : vector<512x128xf32>
      %c0_7 = arith.constant 0 : index
      %c0_8 = arith.constant 0 : index
      %19 = vector.load %arg21[%c0_7, %c0_8] : memref<1x128xf32, #tpu.memory_space<vmem>>, vector<1x128xf32>
      %20 = vector.broadcast %19 : vector<1x128xf32> to vector<512x128xf32>
      %21 = arith.addf %18, %20 : vector<512x128xf32>
      %c0_9 = arith.constant 0 : index
      %c0_10 = arith.constant 0 : index
      %22 = vector.load %arg7[%c0_9, %c0_10] : memref<128x128xf32, #tpu.memory_space<vmem>>, vector<128x128xf32>
      %cst = arith.constant dense<0.000000e+00> : vector<512x128xf32>
      %23 = tpu.matmul %21, %22, %cst {dimension_numbers = #tpu.dot_dimension_numbers<[1], [0], [0], [1], [0, 0, 1, 1], [], []>} : vector<512x128xf32>, vector<128x128xf32>, vector<512x128xf32> -> vector<512x128xf32>
      %c0_11 = arith.constant 0 : index
      %c0_12 = arith.constant 0 : index
      %24 = vector.load %arg8[%c0_11, %c0_12] : memref<1x128xf32, #tpu.memory_space<vmem>>, vector<1x128xf32>
      %25 = vector.broadcast %24 : vector<1x128xf32> to vector<512x128xf32>
      %26 = arith.addf %23, %25 : vector<512x128xf32>
      %cst_13 = arith.constant 0.000000e+00 : f32
      %27 = vector.broadcast %cst_13 : f32 to vector<512x128xf32>
      %28 = arith.cmpf oge, %26, %27 : vector<512x128xf32>
      %cst_14 = arith.constant 0.00999999977 : f32
      %29 = vector.broadcast %cst_14 : f32 to vector<512x128xf32>
      %30 = arith.mulf %29, %26 : vector<512x128xf32>
      %31 = arith.select %28, %26, %30 : vector<512x128xi1>, vector<512x128xf32>
      %32 = arith.index_cast %1 : i32 to index
      %c0_15 = arith.constant 0 : index
      %33 = vector.load %arg15[%32, %c0_15] : memref<1024x128xf32, #tpu.memory_space<vmem>>, vector<512x128xf32>
      tpu.vector_store %arg15[%32, %c0_15], %31 {strides = array<i32>} : memref<1024x128xf32, #tpu.memory_space<vmem>>, vector<512x128xf32>,
      %c0_16 = arith.constant 0 : index
      %c0_17 = arith.constant 0 : index
      %34 = vector.load %arg18[%c0_16, %c0_17] : memref<1x128xf32, #tpu.memory_space<vmem>>, vector<1x128xf32>
      %cst_18 = arith.constant dense<0.000000e+00> : vector<128xf32>
      %35 = vector.multi_reduction <add>, %31, %cst_18 [0] : vector<512x128xf32> to vector<128xf32>
      %36 = vector.shape_cast %35 : vector<128xf32> to vector<1x128xf32>
      %37 = arith.addf %34, %36 : vector<1x128xf32>
      %c0_19 = arith.constant 0 : index
      %c0_20 = arith.constant 0 : index
      %38 = vector.load %arg18[%c0_19, %c0_20] : memref<1x128xf32, #tpu.memory_space<vmem>>, vector<1x128xf32>
      tpu.vector_store %arg18[%c0_19, %c0_20], %37 {strides = array<i32>} : memref<1x128xf32, #tpu.memory_space<vmem>>, vector<1x128xf32>,
      %c0_21 = arith.constant 0 : index
      %c0_22 = arith.constant 0 : index
      %39 = vector.load %arg19[%c0_21, %c0_22] : memref<1x128xf32, #tpu.memory_space<vmem>>, vector<1x128xf32>
      %40 = arith.mulf %31, %31 : vector<512x128xf32>
      %cst_23 = arith.constant dense<0.000000e+00> : vector<128xf32>
      %41 = vector.multi_reduction <add>, %40, %cst_23 [0] : vector<512x128xf32> to vector<128xf32>
      %42 = vector.shape_cast %41 : vector<128xf32> to vector<1x128xf32>
      %43 = arith.addf %39, %42 : vector<1x128xf32>
      %c0_24 = arith.constant 0 : index
      %c0_25 = arith.constant 0 : index
      %44 = vector.load %arg19[%c0_24, %c0_25] : memref<1x128xf32, #tpu.memory_space<vmem>>, vector<1x128xf32>
      tpu.vector_store %arg19[%c0_24, %c0_25], %43 {strides = array<i32>} : memref<1x128xf32, #tpu.memory_space<vmem>>, vector<1x128xf32>,
    } else {
    }
    %c2_i32 = arith.constant 2 : i32
    %8 = arith.cmpi eq, %arg0, %c2_i32 : i32
    %9 = arith.extui %8 : i1 to i32
    %c0_i32_2 = arith.constant 0 : i32
    %10 = arith.cmpi ne, %9, %c0_i32_2 : i32
    scf.if %10 {
      %c0_i32_3 = arith.constant 0 : i32
      %11 = arith.cmpi eq, %arg1, %c0_i32_3 : i32
      %12 = arith.extui %11 : i1 to i32
      %c0_i32_4 = arith.constant 0 : i32
      %13 = arith.cmpi ne, %12, %c0_i32_4 : i32
      scf.if %13 {
        %c0_21 = arith.constant 0 : index
        %c0_22 = arith.constant 0 : index
        %38 = vector.load %arg18[%c0_21, %c0_22] : memref<1x128xf32, #tpu.memory_space<vmem>>, vector<1x128xf32>
        %cst_23 = arith.constant 9.765625E-4 : f32
        %39 = vector.broadcast %cst_23 : f32 to vector<1x128xf32>
        %40 = arith.mulf %38, %39 : vector<1x128xf32>
        %c0_24 = arith.constant 0 : index
        %c0_25 = arith.constant 0 : index
        %41 = vector.load %arg19[%c0_24, %c0_25] : memref<1x128xf32, #tpu.memory_space<vmem>>, vector<1x128xf32>
        %cst_26 = arith.constant 9.765625E-4 : f32
        %42 = vector.broadcast %cst_26 : f32 to vector<1x128xf32>
        %43 = arith.mulf %41, %42 : vector<1x128xf32>
        %44 = arith.mulf %40, %40 : vector<1x128xf32>
        %45 = arith.subf %43, %44 : vector<1x128xf32>
        %cst_27 = arith.constant 0.00999999977 : f32
        %46 = vector.broadcast %cst_27 : f32 to vector<1x128xf32>
        %47 = arith.addf %45, %46 : vector<1x128xf32>
        %48 = math.rsqrt %47 : vector<1x128xf32>
        %c0_28 = arith.constant 0 : index
        %c0_29 = arith.constant 0 : index
        %49 = vector.load %arg9[%c0_28, %c0_29] : memref<1x128xf32, #tpu.memory_space<vmem>>, vector<1x128xf32>
        %50 = arith.mulf %48, %49 : vector<1x128xf32>
        %c0_30 = arith.constant 0 : index
        %c0_31 = arith.constant 0 : index
        %51 = vector.load %arg20[%c0_30, %c0_31] : memref<1x128xf32, #tpu.memory_space<vmem>>, vector<1x128xf32>
        tpu.vector_store %arg20[%c0_30, %c0_31], %50 {strides = array<i32>} : memref<1x128xf32, #tpu.memory_space<vmem>>, vector<1x128xf32>,
        %c0_32 = arith.constant 0 : index
        %c0_33 = arith.constant 0 : index
        %52 = vector.load %arg10[%c0_32, %c0_33] : memref<1x128xf32, #tpu.memory_space<vmem>>, vector<1x128xf32>
        %53 = arith.mulf %40, %50 : vector<1x128xf32>
        %54 = arith.subf %52, %53 : vector<1x128xf32>
        %c0_34 = arith.constant 0 : index
        %c0_35 = arith.constant 0 : index
        %55 = vector.load %arg21[%c0_34, %c0_35] : memref<1x128xf32, #tpu.memory_space<vmem>>, vector<1x128xf32>
        tpu.vector_store %arg21[%c0_34, %c0_35], %54 {strides = array<i32>} : memref<1x128xf32, #tpu.memory_space<vmem>>, vector<1x128xf32>,
      } else {
      }
      %14 = arith.index_cast %1 : i32 to index
      %c0 = arith.constant 0 : index
      %15 = vector.load %arg15[%14, %c0] : memref<1024x128xf32, #tpu.memory_space<vmem>>, vector<512x128xf32>
      %c0_5 = arith.constant 0 : index
      %c0_6 = arith.constant 0 : index
      %16 = vector.load %arg20[%c0_5, %c0_6] : memref<1x128xf32, #tpu.memory_space<vmem>>, vector<1x128xf32>
      %17 = vector.broadcast %16 : vector<1x128xf32> to vector<512x128xf32>
      %18 = arith.mulf %15, %17 : vector<512x128xf32>
      %c0_7 = arith.constant 0 : index
      %c0_8 = arith.constant 0 : index
      %19 = vector.load %arg21[%c0_7, %c0_8] : memref<1x128xf32, #tpu.memory_space<vmem>>, vector<1x128xf32>
      %20 = vector.broadcast %19 : vector<1x128xf32> to vector<512x128xf32>
      %21 = arith.addf %18, %20 : vector<512x128xf32>
      %c0_9 = arith.constant 0 : index
      %c0_10 = arith.constant 0 : index
      %22 = vector.load %arg11[%c0_9, %c0_10] : memref<128x256xf32, #tpu.memory_space<vmem>>, vector<128x256xf32>
      %cst = arith.constant dense<0.000000e+00> : vector<512x256xf32>
      %23 = tpu.matmul %21, %22, %cst {dimension_numbers = #tpu.dot_dimension_numbers<[1], [0], [0], [1], [0, 0, 1, 1], [], []>} : vector<512x128xf32>, vector<128x256xf32>, vector<512x256xf32> -> vector<512x256xf32>
      %c0_11 = arith.constant 0 : index
      %c0_12 = arith.constant 0 : index
      %24 = vector.load %arg12[%c0_11, %c0_12] : memref<1x256xf32, #tpu.memory_space<vmem>>, vector<1x256xf32>
      %25 = vector.broadcast %24 : vector<1x256xf32> to vector<512x256xf32>
      %26 = arith.addf %23, %25 : vector<512x256xf32>
      %27 = vector.extract_strided_slice %26 {offsets = [0, 0], sizes = [512, 128], strides = [1, 1]} : vector<512x256xf32> to vector<512x128xf32>
      %28 = math.tanh %27 : vector<512x128xf32>
      %29 = vector.extract_strided_slice %26 {offsets = [0, 128], sizes = [512, 128], strides = [1, 1]} : vector<512x256xf32> to vector<512x128xf32>
      %c0_13 = arith.constant 0 : index
      %c0_14 = arith.constant 0 : index
      %30 = vector.load %arg2[%c0_13, %c0_14] : memref<512x128xf32, #tpu.memory_space<vmem>>, vector<512x128xf32>
      %31 = arith.addf %30, %29 : vector<512x128xf32>
      %32 = math.exp %28 : vector<512x128xf32>
      %33 = arith.mulf %31, %32 : vector<512x128xf32>
      %c0_15 = arith.constant 0 : index
      %c0_16 = arith.constant 0 : index
      %34 = vector.load %arg13[%c0_15, %c0_16] : memref<512x128xf32, #tpu.memory_space<vmem>>, vector<512x128xf32>
      tpu.vector_store %arg13[%c0_15, %c0_16], %33 {strides = array<i32>} : memref<512x128xf32, #tpu.memory_space<vmem>>, vector<512x128xf32>,
      %cst_17 = arith.constant 1.000000e+00 : f32
      %35 = vector.broadcast %cst_17 : f32 to vector<1x128xf32>
      %cst_18 = arith.constant dense<0.000000e+00> : vector<1x512xf32>
      %36 = tpu.matmul %35, %28, %cst_18 {dimension_numbers = #tpu.dot_dimension_numbers<[1], [1], [0], [0], [0, 0, 1, 0], [], []>} : vector<1x128xf32>, vector<512x128xf32>, vector<1x512xf32> -> vector<1x512xf32>
      %c0_19 = arith.constant 0 : index
      %c0_20 = arith.constant 0 : index
      %37 = vector.load %arg14[%c0_19, %c0_20] : memref<1x512xf32, #tpu.memory_space<vmem>>, vector<1x512xf32>
      tpu.vector_store %arg14[%c0_19, %c0_20], %36 {strides = array<i32>} : memref<1x512xf32, #tpu.memory_space<vmem>>, vector<1x512xf32>,
    } else {
    }
    return
  }
  func.func @transform_0(%arg0: i32, %arg1: i32) -> (i32, i32) {
    %c1_i32 = arith.constant 1 : i32
    %0 = arith.cmpi eq, %arg0, %c1_i32 : i32
    %c0_i32 = arith.constant 0 : i32
    %1 = arith.select %0, %c0_i32, %arg1 : i32
    %c0_i32_0 = arith.constant 0 : i32
    %2 = arith.cmpi eq, %arg0, %c0_i32_0 : i32
    %c0_i32_1 = arith.constant 0 : i32
    %c1_i32_2 = arith.constant 1 : i32
    %3 = arith.select %2, %c0_i32_1, %c1_i32_2 : i32
    %c0_i32_3 = arith.constant 0 : i32
    return %1, %3 : i32, i32
  }
  func.func @transform_1(%arg0: i32, %arg1: i32) -> (i32, i32) {
    %c0_i32 = arith.constant 0 : i32
    %c0_i32_0 = arith.constant 0 : i32
    %c0_i32_1 = arith.constant 0 : i32
    return %c0_i32, %c0_i32_0 : i32, i32
  }
  func.func @transform_2(%arg0: i32, %arg1: i32) -> (i32, i32) {
    %c0_i32 = arith.constant 0 : i32
    %c0_i32_0 = arith.constant 0 : i32
    %c0_i32_1 = arith.constant 0 : i32
    return %c0_i32, %c0_i32_0 : i32, i32
  }
  func.func @transform_3(%arg0: i32, %arg1: i32) -> (i32, i32) {
    %c0_i32 = arith.constant 0 : i32
    %c0_i32_0 = arith.constant 0 : i32
    %c0_i32_1 = arith.constant 0 : i32
    return %c0_i32, %c0_i32_0 : i32, i32
  }
  func.func @transform_4(%arg0: i32, %arg1: i32) -> (i32, i32) {
    %c0_i32 = arith.constant 0 : i32
    %c0_i32_0 = arith.constant 0 : i32
    %c0_i32_1 = arith.constant 0 : i32
    return %c0_i32, %c0_i32_0 : i32, i32
  }
  func.func @transform_5(%arg0: i32, %arg1: i32) -> (i32, i32) {
    %c0_i32 = arith.constant 0 : i32
    %c0_i32_0 = arith.constant 0 : i32
    %c0_i32_1 = arith.constant 0 : i32
    return %c0_i32, %c0_i32_0 : i32, i32
  }
  func.func @transform_6(%arg0: i32, %arg1: i32) -> (i32, i32) {
    %c0_i32 = arith.constant 0 : i32
    %c0_i32_0 = arith.constant 0 : i32
    %c0_i32_1 = arith.constant 0 : i32
    return %c0_i32, %c0_i32_0 : i32, i32
  }
  func.func @transform_7(%arg0: i32, %arg1: i32) -> (i32, i32) {
    %c0_i32 = arith.constant 0 : i32
    %c0_i32_0 = arith.constant 0 : i32
    %c0_i32_1 = arith.constant 0 : i32
    return %c0_i32, %c0_i32_0 : i32, i32
  }
  func.func @transform_8(%arg0: i32, %arg1: i32) -> (i32, i32) {
    %c0_i32 = arith.constant 0 : i32
    %c0_i32_0 = arith.constant 0 : i32
    %c0_i32_1 = arith.constant 0 : i32
    return %c0_i32, %c0_i32_0 : i32, i32
  }
  func.func @transform_9(%arg0: i32, %arg1: i32) -> (i32, i32) {
    %c0_i32 = arith.constant 0 : i32
    %c0_i32_0 = arith.constant 0 : i32
    %c0_i32_1 = arith.constant 0 : i32
    return %c0_i32, %c0_i32_0 : i32, i32
  }
  func.func @transform_10(%arg0: i32, %arg1: i32) -> (i32, i32) {
    %c0_i32 = arith.constant 0 : i32
    %c0_i32_0 = arith.constant 0 : i32
    %c0_i32_1 = arith.constant 0 : i32
    return %c0_i32, %c0_i32_0 : i32, i32
  }
  func.func @transform_11(%arg0: i32, %arg1: i32) -> (i32, i32) {
    %c2_i32 = arith.constant 2 : i32
    %0 = arith.cmpi eq, %arg0, %c2_i32 : i32
    %c0_i32 = arith.constant 0 : i32
    %1 = arith.select %0, %arg1, %c0_i32 : i32
    %c1_i32 = arith.constant 1 : i32
    %c0_i32_0 = arith.constant 0 : i32
    return %1, %c1_i32 : i32, i32
  }
  func.func @transform_12(%arg0: i32, %arg1: i32) -> (i32, i32) {
    %c2_i32 = arith.constant 2 : i32
    %0 = arith.cmpi eq, %arg0, %c2_i32 : i32
    %c0_i32 = arith.constant 0 : i32
    %1 = arith.select %0, %arg1, %c0_i32 : i32
    %c0_i32_0 = arith.constant 0 : i32
    %c0_i32_1 = arith.constant 0 : i32
    return %c0_i32_0, %1 : i32, i32
  }
}

</mosaic_0001>

<bundles_post_ra>
// kernel: affine_coupling_forward.1
= control target key start
LH: loop header
LB: loop body
LE: loop exit
PB: predicated region body
PF: predicated region fallthrough
CT: control target
= control target key end

     0   :  { %s8092_s0 = inlined_call_operand.hbm [shape: f32[1024,256], index: 0, kind: input, shape index: {}, may-alias: {0,11}]   ;;  %s8093_s1 = inlined_call_operand.vmem [shape: f32[128,128], index: 1, kind: input, shape index: {}]   ;;  %s8094_s2 = inlined_call_operand.vmem [shape: f32[1,128], index: 2, kind: input, shape index: {}]   ;;  %s8095_s3 = inlined_call_operand.vmem [shape: f32[1,128], index: 3, kind: input, shape index: {}]   ;;  %s8096_s4 = inlined_call_operand.vmem [shape: f32[1,128], index: 4, kind: input, shape index: {}]   ;;  %s8097_s5 = inlined_call_operand.vmem [shape: f32[128,128], index: 5, kind: input, shape index: {}]   ;;  %s8098_s6 = inlined_call_operand.vmem [shape: f32[1,128], index: 6, kind: input, shape index: {}]   ;;  %s8099_s7 = inlined_call_operand.vmem [shape: f32[1,128], index: 7, kind: input, shape index: {}]   ;;  %s8100_s8 = inlined_call_operand.vmem [shape: f32[1,128], index: 8, kind: input, shape index: {}]   ;;  %s8101_s9 = inlined_call_operand.vmem [shape: f32[128,256], index: 9, kind: input, shape index: {}]   ;;  %s8102_s10 = inlined_call_operand.vmem [shape: f32[1,256], index: 10, kind: input, shape index: {}]   ;;  %s8103_s11 = inlined_call_operand.hbm [shape: f32[1024,256], index: 11, kind: output, shape index: {0}, may-alias: {0,11}]   ;;  %s8104_s12 = inlined_call_operand.hbm [shape: f32[1,1024], index: 12, kind: output, shape index: {1}]  }
   0x1   :  { %8123 = sst [smem:[#allocation27_spill]] %s8092_s0 }
   0x2   :  { %8124 = sst [smem:[#allocation28_spill]] %s8093_s1 }
   0x3   :  { %8125 = sst [smem:[#allocation29_spill]] %s8094_s2 }
   0x4   :  { %8126 = sst [smem:[#allocation30_spill]] %s8095_s3 }
   0x5   :  { %8127 = sst [smem:[#allocation31_spill]] %s8096_s4 }
   0x6   :  { %8128 = sst [smem:[#allocation32_spill]] %s8097_s5 }
   0x7   :  { %8129 = sst [smem:[#allocation33_spill]] %s8098_s6 }
   0x8   :  { %8130 = sst [smem:[#allocation34_spill]] %s8099_s7 }
   0x9   :  { %8131 = sst [smem:[#allocation35_spill]] %s8100_s8 }
   0xa   :  { %8132 = sst [smem:[#allocation36_spill]] %s8101_s9 }
   0xb   :  { %8133 = sst [smem:[#allocation37_spill]] %s8102_s10 }
   0xc   :  { %8134 = sst [smem:[#allocation38_spill]] %s8103_s11 }
   0xd   :  { %8135 = sst [smem:[#allocation39_spill]] %s8104_s12 }
   0xe   :  { %18 = vsyncpa [#allocation10], 0 }
   0xf   :  { %20 = vsyncpa [#allocation10 + $0x1], 0 }
  0x10   :  { %21 = vsyncpa [#allocation11], 0 }
  0x11   :  { %23 = vsyncpa [#allocation11 + $0x1], 0 }
  0x12   :  { %24 = vsyncpa [#allocation14], 0 }
  0x13   :  { %26 = vsyncpa [#allocation14 + $0x1], 0  ;;  %s5425_s21 = smov 0   ;;  %s5427_s22 = smov 0  }
  0x14   :  { %s5429_s23 = smov 0   ;;  %s5431_s24 = smov 0  }
  0x15   :  { %s5433_s25 = smov 0   ;;  %s5435_s26 = smov 0  }
  0x16   :  { %s5437_s27 = smov 0   ;;  %s5439_s28 = smov 0  }
  0x17   :  { %s5441_s29 = smov 0   ;;  %s5443_s30 = smov 0  }
  0x18   :  { %s5445_s13 = smov 0  }
  0x19 LB: > { %8136 = sst [smem:[#allocation18_spill]] %s5337_s29  ;;  %s8108_s14 = sadd.s32 4294967295, %s5345_s13   ;;  %s5345_s13 = sphi %s5445_s13, %s32_s13   ;;  %s5341_s30 = sphi %s5443_s30, %s8196_s30   ;;  %s5337_s29 = sphi %s5441_s29, %s8195_s29   ;;  %s5333_s28 = sphi %s5439_s28, %s8194_s28   ;;  %s5329_s27 = sphi %s5437_s27, %s8193_s27   ;;  %s5325_s26 = sphi %s5435_s26, %s8202_s26   ;;  %s5321_s25 = sphi %s5433_s25, %s8201_s25   ;;  %s5317_s24 = sphi %s5431_s24, %s8200_s24   ;;  %s5313_s23 = sphi %s5429_s23, %s8199_s23   ;;  %s5309_s22 = sphi %s5427_s22, %s8198_s22   ;;  %s5305_s21 = sphi %s5425_s21, %s8197_s21  }
  0x1a   : > { %8137 = sst [smem:[#allocation19_spill]] %s5341_s30  ;;  %s41_s16 = sadd.s32 1, %s5337_s29 }
  0x1b   : > { %s44_s17 = sadd.s32 1, %s5341_s30  ;;  %p42_p0 = scmp.ge.s32.totalorder %s41_s16, 2 }
  0x1c   : > { %p48_p1 = scmp.eq.s32.totalorder %s5341_s30, 1  ;;  %p50_p2 = scmp.ne.s32.totalorder %s5341_s30, 0 }
  0x1d   : > { %s61_s18 = sadd.s32 1, %s5325_s26  ;;  %s8204_s16 = smov (%p42_p0, %s41_s16), 0 }
  0x1e   : > { %8138 = sst [smem:[#allocation20_spill]] %s8204_s16  ;;  %s8206_s17 = smov (!%p42_p0, %s44_s17), %s5341_s30 }
  0x1f   : > { %s5491_s19 = scalar_select %p48_p1, 0, %s5337_s29 }
  0x20   : > { %p46_p3 = scmp.ge.s32.totalorder %s8206_s17, 3  ;;  %p68_p4 = scmp.ne.s32.totalorder %s5325_s26, %s5321_s25 }
  0x21   : > { %s5495_s20 = scalar_select %p50_p2, 1, 0 }
  0x22   : > { %s8208_s17 = smov (%p46_p3, %s8206_s17), 0  ;;  %p69_p5 = scmp.eq.s32.totalorder %s5345_s13, 0 }
  0x23   : > { %8139 = sst [smem:[#allocation21_spill]] %s8208_s17  ;;  %p74_p6 = scmp.ne.s32.totalorder %s5321_s25, %s5317_s24 }
  0x24   : > { %p52_p7 = scmp.eq.s32.totalorder %s8208_s17, 1  ;;  %p54_p8 = scmp.ne.s32.totalorder %s8208_s17, 0 }
  0x25   : > { %p5504_p9 = por %p69_p5, %p68_p4  ;;  %p75_p10 = scmp.eq.s32.totalorder %s8108_s14, 0 }
  0x26   : > { %s53_s12 = scalar_select %p52_p7, 0, %s8204_s16 }
  0x27   : > { %s55_s11 = scalar_select %p54_p8, 1, 0 }
  0x28   : > { %s56_s10 = ssub.s32 %s5491_s19, %s53_s12  ;;  %p5512_p11 = por %p75_p10, %p74_p6 }
  0x29   : > { %s57_s9 = ssub.s32 %s5495_s20, %s55_s11  ;;  %p294_p12 = scmp.eq.s32.totalorder %s5341_s30, 2 }
  0x2a   : > { %s58_s8 = sor.u32 %s57_s9, %s56_s10  ;;  %p296_p13 = scmp.eq.s32.totalorder %s8208_s17, 2 }
  0x2b   : > { %p59_p0 = scmp.eq.s32.totalorder %s58_s8, 0  ;;  %s301_s14 = sadd.s32 1, %s5313_s23 }
  0x2c   : > { %s295_s7 = scalar_select %p294_p12, %s5337_s29, 0 }
  0x2d   : > { %s5522_s6 = scalar_select %p59_p0, %s5325_s26, %s61_s18  }
  0x2e   : > { %s297_s12 = scalar_select %p296_p13, %s8204_s16, 0 }
  0x2f   : > { %8142 = sst [smem:[#allocation22_spill]] %s5522_s6  ;;  %p311_p1 = scmp.ne.s32.totalorder %s5313_s23, %s5309_s22 }
  0x30   : > { %s8143_s5 = sadd.s32 4294967295, %s5345_s13   ;;  %s298_s4 = ssub.s32 %s295_s7, %s297_s12 }
  0x31   : > { %p312_p2 = scmp.eq.s32.totalorder %s8143_s5, 5  ;;  %p317_p3 = scmp.ne.s32.totalorder %s5309_s22, %s5305_s21 }
  0x32   : > { %p299_p4 = scmp.eq.s32.totalorder %s298_s4, 0  ;;  %s8145_s8 = sadd.s32 4294967294, %s5345_s13  }
  0x33   : > { %p5531_p5 = por %p312_p2, %p311_p1  ;;  %p318_p6 = scmp.eq.s32.totalorder %s8145_s8, 5 }
  0x34   : > { %s5538_s10 = scalar_select %p299_p4, %s5313_s23, %s301_s14  }
  0x35   : > { %s8144_s9 = scalar_select %p5531_p5, 1, 0 }
  0x36   : > { %p5540_p7 = por %p318_p6, %p317_p3  ;;  %p4799_p8 = scmp.lt.s32.totalorder %s5345_s13, 6 }
  0x37   : > { %s398_s18 = sand.u32 1, %s5325_s26   ;;  %s4087_s5 = sshll.u32 %s5491_s19, 7 }
  0x38   : > { %s8146_s11 = scalar_select %p5540_p7, 1, 0 }
  0x39   : > { %s4058_s7 = sshll.u32 %s398_s18, 9  ;;  %s412_s12 = sadd.s32 %s4087_s5, %s5495_s20 }
  0x3a   : > { %s4061_s17 = sshll.u32 %s412_s12, 7  ;;  %s402_s4 = scalar_lea.vmem [#allocation9], %s4058_s7 }
  0x3b   : > { %s415_s16 = sshll.u32 %s402_s4, 4  ;;  %s8147_s0 = sld [smem:[#allocation27_spill]]  ;;  %s5553_s16 = int_to_ptr.vmem [resolvable:$true] %s415_s16 }
  0x3c   : > { %p5557_p10 = pnand %p4799_p8, %p5504_p9  ;;  %s5562_s19 = scalar_lea.sflag [#allocation10], %s398_s18 }
  0x3e   : > { %p5162_p0 = pneg %p5557_p10 }
  0x41   : > { %s5551_s6 = scalar_lea.hbm %s8147_s0, %s4061_s17  ;;  %s5165_s15 = scalar_lea.hbm %s8147_s0, 32768 }
  0x42   : > { %s5160_s20 = scalar_lea.hbm %s5551_s6, 8192  ;;  %p5166_p9 = scmp.lt.u32.totalorder %s5551_s6, %s8147_s0 }
  0x43   : > { %p5161_p13 = scmp.ne.s32.totalorder %s5551_s6, %s5160_s20  ;;  %p5167_p3 = scmp.lt.u32.totalorder %s5165_s15, %s5160_s20 }
  0x44   : > { %p5169_p6 = scmp.lt.u32.totalorder %s5160_s20, %s5551_s6 }
  0x45   : > { %p5163_p1 = pnand %p5162_p0, %p5161_p13  ;;  %p5168_p4 = por %p5167_p3, %p5166_p9 }
  0x47   : > { %p5164_p2 = pneg %p5163_p1  ;;  %p5170_p8 = por %p5169_p6, %p5168_p4 }
  0x49   : > { %p5171_p12 = pnand %p5170_p8, %p5164_p2 }
  0x4b   : > { %5174 = shalt.err (!%p5171_p12)
}
  0x4c   : > { %s5175_s18 = scalar_lea.vmem %s5553_s16, 8192  ;;  %s5347_s5 = smov [#allocation9]  }
  0x4d   : > { %p5176_p13 = scmp.ne.s32.totalorder %s5553_s16, %s5175_s18  ;;  %s5180_s7 = sshll.u32 %s5347_s5, 4  ;;  %s5181_s7 = int_to_ptr.vmem [resolvable:$false] %s5180_s7 }
  0x4e   : > { %s5182_s12 = scalar_lea.vmem %s5181_s7, 16384  ;;  %p5183_p5 = scmp.lt.s32.totalorder %s5553_s16, %s5181_s7 }
  0x4f   : > { %p5178_p1 = pnand %p5176_p13, %p5162_p0  ;;  %p5184_p9 = scmp.lt.s32.totalorder %s5182_s12, %s5175_s18 }
  0x51   : > { %p5179_p7 = pneg %p5178_p1  ;;  %p5185_p3 = por %p5184_p9, %p5183_p5 }
  0x53   : > { %p5186_p4 = pnand %p5185_p3, %p5179_p7 }
  0x55   : > { %5189 = shalt.err (!%p5186_p4)
}
  0x56   : > { %s5348_s4 = smov 256   ;;  %s5349_s20 = smov 128  }
  0x57   : > { %s5350_s29 = smov 8   ;;  %p423_p12 = scmp.lt.s32.totalorder %s5345_s13, 7 }
  0x58   : > { %4791 = dma.hbm_to_vmem [thread:$0]  (!%p5557_p10), %s5551_s6, 8192, %s5553_s16, %s5562_s19, %s5348_s4, %s5349_s20, %s5350_s29  }
  0x59   : > { %p8149_p0 = scmp.ge.s32.totalorder %s5345_s13, 1 }
  0x5b   : > { %p424_p2 = pnand %p8149_p0, %p423_p12 }
  0x5c   : > { %s429_s30 = sand.u32 (!%p424_p2), 1, %s5321_s25  }
  0x5d   : > { %427 = sbr.rel (%p424_p2) target bundleno = 1746 (0x6d2), region = 64  ;;  %s4063_s15 = sshll.u32 (!%p424_p2), %s429_s30, 9 }
  0x5e   : > { %s430_s17 = scalar_lea.sflag (!%p424_p2), [#allocation10], %s429_s30  ;;  %s5594_s8 = scalar_lea.vmem (!%p424_p2), [#allocation9], %s4063_s15 }
  0x64   : > { %5292 = dma.done.wait (%p5512_p11), %s430_s17, 8192  }
  0x65   : > { %5294 = vsyncadd (%p5512_p11), %s430_s17, 4294959104  ;;  %s5601_s14 = sand.u32 1, %s5309_s22   ;;  %s5604_s6 = sshll.u32 %s5329_s27, 9 }
  0x66   : > { %s4064_s16 = sshll.u32 %s5601_s14, 9  ;;  %s4065_s19 = sshll.u32 %s5601_s14, 2 }
  0x67   : > { %s5608_s18 = scalar_lea.vmem [#allocation12], %s4064_s16  ;;  %s5610_s5 = scalar_lea.vmem [#allocation13], %s4065_s19 }
  0x68   : > { %p4067_p5 = scmp.ne.s32.totalorder %s5333_s28, 0 }
  0x69   : > { %p4068_p7 = scmp.ne.s32.totalorder (!%p4067_p5), %s5329_s27, 0 }
  0x6a   : > { %494 = sbr.rel (%p4067_p5) target bundleno = 526 (0x20e), region = 72 }
  0x71   : > { %498 = sbr.rel (%p4068_p7) target bundleno = 120 (0x78), region = 76  ;;  %v5351_v0 = vmov (!%p4068_p7), 0.0  }
  0x72   : > { %499 = vst [vmem:[#allocation3] sm:$0x1] (!%p4068_p7), %v5351_v0  ;;  %500 = vst [vmem:[#allocation4] sm:$0x1] (!%p4068_p7), %v5351_v0 }
  0x73   : > { %501 = vst [vmem:[#allocation5] sm:$0x1] (!%p4068_p7), %v5351_v0  ;;  %502 = vst [vmem:[#allocation6] sm:$0x1] (!%p4068_p7), %v5351_v0 }
  0x78 PF: > { %s8150_s1 = sld [smem:[#allocation28_spill]]  ;;  %v503_v10 = vld [vmem:[%s5594_s8] sm:$0xff]  ;;  %v504_v27 = vld [vmem:[%s5594_s8 + $0x8] sm:$0xff]  ;;  %v505_v29 = vld [vmem:[%s5594_s8 + $0x10] sm:$0xff]  ;;  %s8151_s2 = sld [smem:[#allocation29_spill]] }
  0x79   : > { %4350 = vmatprep.mubr.f32.mxu0 %v503_v10  ;;  %v535_v19 = vld [vmem:[%s5594_s8 + $0x100] sm:$0xff]  ;;  %v536_v28 = vld [vmem:[%s5594_s8 + $0x108] sm:$0xff]  ;;  %v537_v30 = vld [vmem:[%s5594_s8 + $0x110] sm:$0xff]  ;;  %s5739_s7 = scalar_lea.vmem [#allocation2], %s5604_s6 }
  0x7a   : > { %4398 = vmatprep.mubr.f32.mxu1 %v535_v19  ;;  %v506_v31 = vld [vmem:[%s5594_s8 + $0x18] sm:$0xff]  ;;  %v507_v33 = vld [vmem:[%s5594_s8 + $0x20] sm:$0xff]  ;;  %v508_v35 = vld [vmem:[%s5594_s8 + $0x28] sm:$0xff] }
  0x7b   : > { %v538_v32 = vld [vmem:[%s5594_s8 + $0x118] sm:$0xff]  ;;  %v539_v34 = vld [vmem:[%s5594_s8 + $0x120] sm:$0xff]  ;;  %v540_v36 = vld [vmem:[%s5594_s8 + $0x128] sm:$0xff] }
  0x7c   : > { %v509_v37 = vld [vmem:[%s5594_s8 + $0x30] sm:$0xff]  ;;  %v510_v39 = vld [vmem:[%s5594_s8 + $0x38] sm:$0xff]  ;;  %v511_v41 = vld [vmem:[%s5594_s8 + $0x40] sm:$0xff] }
  0x7d   : > { %v541_v38 = vld [vmem:[%s5594_s8 + $0x130] sm:$0xff]  ;;  %v542_v40 = vld [vmem:[%s5594_s8 + $0x138] sm:$0xff]  ;;  %v543_v42 = vld [vmem:[%s5594_s8 + $0x140] sm:$0xff] }
  0x7e   : > { %v567_v1 = vld [vmem:[%s8150_s1] sm:$0xff]  ;;  %v568_v2 = vld [vmem:[%s8150_s1 + $0x8] sm:$0xff]  ;;  %v569_v3 = vld [vmem:[%s8150_s1 + $0x10] sm:$0xff] }
  0x7f   : > { %v4574_v4 = vpack.c.bf16 %v568_v2, %v567_v1  ;;  %v570_v5 = vld [vmem:[%s8150_s1 + $0x18] sm:$0xff]  ;;  %v571_v7 = vld [vmem:[%s8150_s1 + $0x20] sm:$0xff]  ;;  %v572_v8 = vld [vmem:[%s8150_s1 + $0x28] sm:$0xff] }
  0x80   : > { %v4578_v6 = vpack.c.bf16 %v570_v5, %v569_v3  ;;  %v4582_v9 = vpack.c.bf16 %v572_v8, %v571_v7  ;;  %v573_v11 = vld [vmem:[%s8150_s1 + $0x30] sm:$0xff]  ;;  %v574_v12 = vld [vmem:[%s8150_s1 + $0x38] sm:$0xff]  ;;  %v575_v14 = vld [vmem:[%s8150_s1 + $0x40] sm:$0xff] }
  0x81   : > { %4575 = vmatprep.subr.bf16.mxu0 %v4574_v4  ;;  %4734 = vmatprep.subr.bf16.mxu1 %v4574_v4  ;;  %v4586_v13 = vpack.c.bf16 %v574_v12, %v573_v11  ;;  %v576_v15 = vld [vmem:[%s8150_s1 + $0x48] sm:$0xff]  ;;  %v577_v17 = vld [vmem:[%s8150_s1 + $0x50] sm:$0xff]  ;;  %v578_v18 = vld [vmem:[%s8150_s1 + $0x58] sm:$0xff] }
  0x82   : > { %4577 = vmatpush3.bf16.msra.mxu0 %v4574_v4  ;;  %4742 = vmatpush3.bf16.msra.mxu1 %v4574_v4  ;;  %v4590_v16 = vpack.c.bf16 %v576_v15, %v575_v14  ;;  %v4594_v20 = vpack.c.bf16 %v578_v18, %v577_v17  ;;  %v579_v21 = vld [vmem:[%s8150_s1 + $0x60] sm:$0xff]  ;;  %v580_v22 = vld [vmem:[%s8150_s1 + $0x68] sm:$0xff]  ;;  %v581_v24 = vld [vmem:[%s8150_s1 + $0x70] sm:$0xff] }
  0x83   : > { %4579 = vmatprep.subr.bf16.mxu0 %v4578_v6  ;;  %4735 = vmatprep.subr.bf16.mxu1 %v4578_v6  ;;  %v4598_v23 = vpack.c.bf16 %v580_v22, %v579_v21  ;;  %v582_v25 = vld [vmem:[%s8150_s1 + $0x78] sm:$0xff]  ;;  %v512_v43 = vld [vmem:[%s5594_s8 + $0x48] sm:$0xff]  ;;  %v515_v49 = vld [vmem:[%s5594_s8 + $0x60] sm:$0xff] }
  0x84   : > { %v4602_v26 = vpack.c.bf16 %v582_v25, %v581_v24  ;;  %v544_v44 = vld [vmem:[%s5594_s8 + $0x148] sm:$0xff]  ;;  %v513_v45 = vld [vmem:[%s5594_s8 + $0x50] sm:$0xff]  ;;  %v514_v47 = vld [vmem:[%s5594_s8 + $0x58] sm:$0xff] }
  0x85   : > { %v545_v46 = vld [vmem:[%s5594_s8 + $0x150] sm:$0xff]  ;;  %v546_v48 = vld [vmem:[%s5594_s8 + $0x158] sm:$0xff]  ;;  %v547_v50 = vld [vmem:[%s5594_s8 + $0x160] sm:$0xff] }
  0x86   : > { %4581 = vmatpush3.bf16.msra.mxu0 %v4578_v6  ;;  %4743 = vmatpush3.bf16.msra.mxu1 %v4578_v6  ;;  %v516_v51 = vld [vmem:[%s5594_s8 + $0x68] sm:$0xff]  ;;  %v517_v53 = vld [vmem:[%s5594_s8 + $0x70] sm:$0xff]  ;;  %v518_v55 = vld [vmem:[%s5594_s8 + $0x78] sm:$0xff] }
  0x87   : > { %4583 = vmatprep.subr.bf16.mxu0 %v4582_v9  ;;  %4736 = vmatprep.subr.bf16.mxu1 %v4582_v9  ;;  %v548_v52 = vld [vmem:[%s5594_s8 + $0x168] sm:$0xff]  ;;  %v549_v54 = vld [vmem:[%s5594_s8 + $0x170] sm:$0xff]  ;;  %v550_v56 = vld [vmem:[%s5594_s8 + $0x178] sm:$0xff] }
  0x88   : > { %v519_v57 = vld [vmem:[%s5594_s8 + $0x80] sm:$0xff]  ;;  %v520_v59 = vld [vmem:[%s5594_s8 + $0x88] sm:$0xff]  ;;  %v521_v61 = vld [vmem:[%s5594_s8 + $0x90] sm:$0xff] }
  0x89   : > { %v551_v58 = vld [vmem:[%s5594_s8 + $0x180] sm:$0xff]  ;;  %v552_v60 = vld [vmem:[%s5594_s8 + $0x188] sm:$0xff]  ;;  %v553_v62 = vld [vmem:[%s5594_s8 + $0x190] sm:$0xff] }
  0x8a   : > { %4585 = vmatpush3.bf16.msra.mxu0 %v4582_v9  ;;  %4744 = vmatpush3.bf16.msra.mxu1 %v4582_v9  ;;  %v522_v63 = vld [vmem:[%s5594_s8 + $0x98] sm:$0xff]  ;;  %v523_v1 = vld [vmem:[%s5594_s8 + $0xa0] sm:$0xff]  ;;  %v524_v3 = vld [vmem:[%s5594_s8 + $0xa8] sm:$0xff] }
  0x8b   : > { %4587 = vmatprep.subr.bf16.mxu0 %v4586_v13  ;;  %4737 = vmatprep.subr.bf16.mxu1 %v4586_v13  ;;  %v554_v0 = vld [vmem:[%s5594_s8 + $0x198] sm:$0xff]  ;;  %v555_v2 = vld [vmem:[%s5594_s8 + $0x1a0] sm:$0xff]  ;;  %v556_v4 = vld [vmem:[%s5594_s8 + $0x1a8] sm:$0xff] }
  0x8c   : > { %v525_v5 = vld [vmem:[%s5594_s8 + $0xb0] sm:$0xff]  ;;  %v526_v7 = vld [vmem:[%s5594_s8 + $0xb8] sm:$0xff]  ;;  %v527_v9 = vld [vmem:[%s5594_s8 + $0xc0] sm:$0xff] }
  0x8d   : > { %v557_v6 = vld [vmem:[%s5594_s8 + $0x1b0] sm:$0xff]  ;;  %v558_v8 = vld [vmem:[%s5594_s8 + $0x1b8] sm:$0xff]  ;;  %v559_v10 = vld [vmem:[%s5594_s8 + $0x1c0] sm:$0xff] }
  0x8e   : > { %4589 = vmatpush3.bf16.msra.mxu0 %v4586_v13  ;;  %4745 = vmatpush3.bf16.msra.mxu1 %v4586_v13  ;;  %v528_v11 = vld [vmem:[%s5594_s8 + $0xc8] sm:$0xff]  ;;  %v529_v13 = vld [vmem:[%s5594_s8 + $0xd0] sm:$0xff]  ;;  %v530_v15 = vld [vmem:[%s5594_s8 + $0xd8] sm:$0xff] }
  0x8f   : > { %4591 = vmatprep.subr.bf16.mxu0 %v4590_v16  ;;  %4738 = vmatprep.subr.bf16.mxu1 %v4590_v16  ;;  %v560_v12 = vld [vmem:[%s5594_s8 + $0x1c8] sm:$0xff]  ;;  %v561_v14 = vld [vmem:[%s5594_s8 + $0x1d0] sm:$0xff]  ;;  %v531_v17 = vld [vmem:[%s5594_s8 + $0xe0] sm:$0xff] }
  0x90   : > { %v563_v18 = vld [vmem:[%s5594_s8 + $0x1e0] sm:$0xff]  ;;  %v532_v19 = vld [vmem:[%s5594_s8 + $0xe8] sm:$0xff]  ;;  %v533_v21 = vld [vmem:[%s5594_s8 + $0xf0] sm:$0xff] }
  0x91   : > { %v565_v22 = vld [vmem:[%s5594_s8 + $0x1f0] sm:$0xff]  ;;  %v566_v24 = vld [vmem:[%s5594_s8 + $0x1f8] sm:$0xff] }
  0x92   : > { %4593 = vmatpush3.bf16.msra.mxu0 %v4590_v16  ;;  %4746 = vmatpush3.bf16.msra.mxu1 %v4590_v16  ;;  %v562_v16 = vld [vmem:[%s5594_s8 + $0x1d8] sm:$0xff] }
  0x93   : > { %4595 = vmatprep.subr.bf16.mxu0 %v4594_v20  ;;  %4739 = vmatprep.subr.bf16.mxu1 %v4594_v20  ;;  %v5729_v25 = vld [vmem:[%s8151_s2] ss:$0 sm:$0xff] }
  0x96   : > { %4597 = vmatpush3.bf16.msra.mxu0 %v4594_v20  ;;  %4747 = vmatpush3.bf16.msra.mxu1 %v4594_v20  ;;  %v564_v20 = vld [vmem:[%s5594_s8 + $0x1e8] sm:$0xff] }
  0x97   : > { %4599 = vmatprep.subr.bf16.mxu0 %v4598_v23  ;;  %4740 = vmatprep.subr.bf16.mxu1 %v4598_v23 }
  0x9a   : > { %4601 = vmatpush3.bf16.msra.mxu0 %v4598_v23  ;;  %4748 = vmatpush3.bf16.msra.mxu1 %v4598_v23  ;;  %v534_v23 = vld [vmem:[%s5594_s8 + $0xf8] sm:$0xff] }
  0x9b   : > { %4603 = vmatprep.subr.bf16.mxu0 %v4602_v26  ;;  %4741 = vmatprep.subr.bf16.mxu1 %v4602_v26 }
  0x9e   : > { %4605 = vmatpush3.bf16.msra.mxu0 %v4602_v26  ;;  %4749 = vmatpush3.bf16.msra.mxu1 %v4602_v26 }
  0xa1   : > { %4351 = vmatmul.mubr.f32.vlgmr.msra.gmra.mrb[0].mxu0 %v504_v27  ;;  %4399 = vmatmul.mubr.f32.vlgmr.msra.gmra.mrb[0].mxu1 %v536_v28 }
  0xa2   : > { %4353 = vmatprep.mubr.f32.mxu0 %v505_v29  ;;  %4401 = vmatprep.mubr.f32.mxu1 %v537_v30 }
  0xa5   : > { %4354 = vmatmul.mubr.f32.gmra.mrb[2].mxu0 %v506_v31  ;;  %4402 = vmatmul.mubr.f32.gmra.mrb[2].mxu1 %v538_v32 }
  0xa6   : > { %4356 = vmatprep.mubr.f32.mxu0 %v507_v33  ;;  %4404 = vmatprep.mubr.f32.mxu1 %v539_v34 }
  0xa9   : > { %4357 = vmatmul.mubr.f32.gmra.mrb[4].mxu0 %v508_v35  ;;  %4405 = vmatmul.mubr.f32.gmra.mrb[4].mxu1 %v540_v36 }
  0xaa   : > { %4359 = vmatprep.mubr.f32.mxu0 %v509_v37  ;;  %4407 = vmatprep.mubr.f32.mxu1 %v541_v38 }
  0xad   : > { %4360 = vmatmul.mubr.f32.gmra.mrb[6].mxu0 %v510_v39  ;;  %4408 = vmatmul.mubr.f32.gmra.mrb[6].mxu1 %v542_v40 }
  0xae   : > { %4362 = vmatprep.mubr.f32.mxu0 %v511_v41  ;;  %4410 = vmatprep.mubr.f32.mxu1 %v543_v42 }
  0xb1   : > { %4363 = vmatmul.mubr.f32.gmra.mrb[8].mxu0 %v512_v43  ;;  %4411 = vmatmul.mubr.f32.gmra.mrb[8].mxu1 %v544_v44 }
  0xb2   : > { %4365 = vmatprep.mubr.f32.mxu0 %v513_v45  ;;  %4413 = vmatprep.mubr.f32.mxu1 %v545_v46 }
  0xb5   : > { %4366 = vmatmul.mubr.f32.gmra.mrb[10].mxu0 %v514_v47  ;;  %4414 = vmatmul.mubr.f32.gmra.mrb[10].mxu1 %v546_v48 }
  0xb6   : > { %4368 = vmatprep.mubr.f32.mxu0 %v515_v49  ;;  %4416 = vmatprep.mubr.f32.mxu1 %v547_v50 }
  0xb9   : > { %4369 = vmatmul.mubr.f32.gmra.mrb[12].mxu0 %v516_v51  ;;  %4417 = vmatmul.mubr.f32.gmra.mrb[12].mxu1 %v548_v52 }
  0xba   : > { %4371 = vmatprep.mubr.f32.mxu0 %v517_v53  ;;  %4419 = vmatprep.mubr.f32.mxu1 %v549_v54 }
  0xbd   : > { %4372 = vmatmul.mubr.f32.gmra.mrb[14].mxu0 %v518_v55  ;;  %4420 = vmatmul.mubr.f32.gmra.mrb[14].mxu1 %v550_v56 }
  0xbe   : > { %4374 = vmatprep.mubr.f32.mxu0 %v519_v57  ;;  %4422 = vmatprep.mubr.f32.mxu1 %v551_v58 }
  0xc1   : > { %4375 = vmatmul.mubr.f32.gmra.mrb[16].mxu0 %v520_v59  ;;  %4423 = vmatmul.mubr.f32.gmra.mrb[16].mxu1 %v552_v60 }
  0xc2   : > { %4377 = vmatprep.mubr.f32.mxu0 %v521_v61  ;;  %4425 = vmatprep.mubr.f32.mxu1 %v553_v62 }
  0xc5   : > { %4378 = vmatmul.mubr.f32.gmra.mrb[18].mxu0 %v522_v63  ;;  %4426 = vmatmul.mubr.f32.gmra.mrb[18].mxu1 %v554_v0 }
  0xc6   : > { %4380 = vmatprep.mubr.f32.mxu0 %v523_v1  ;;  %4428 = vmatprep.mubr.f32.mxu1 %v555_v2 }
  0xc9   : > { %4381 = vmatmul.mubr.f32.gmra.mrb[20].mxu0 %v524_v3  ;;  %4429 = vmatmul.mubr.f32.gmra.mrb[20].mxu1 %v556_v4 }
  0xca   : > { %4383 = vmatprep.mubr.f32.mxu0 %v525_v5  ;;  %4431 = vmatprep.mubr.f32.mxu1 %v557_v6 }
  0xcd   : > { %4384 = vmatmul.mubr.f32.gmra.mrb[22].mxu0 %v526_v7  ;;  %4432 = vmatmul.mubr.f32.gmra.mrb[22].mxu1 %v558_v8 }
  0xce   : > { %4386 = vmatprep.mubr.f32.mxu0 %v527_v9  ;;  %4434 = vmatprep.mubr.f32.mxu1 %v559_v10 }
  0xd1   : > { %4387 = vmatmul.mubr.f32.gmra.mrb[24].mxu0 %v528_v11  ;;  %4435 = vmatmul.mubr.f32.gmra.mrb[24].mxu1 %v560_v12 }
  0xd2   : > { %4389 = vmatprep.mubr.f32.mxu0 %v529_v13  ;;  %4437 = vmatprep.mubr.f32.mxu1 %v561_v14 }
  0xd5   : > { %4390 = vmatmul.mubr.f32.gmra.mrb[26].mxu0 %v530_v15  ;;  %4438 = vmatmul.mubr.f32.gmra.mrb[26].mxu1 %v562_v16 }
  0xd6   : > { %4392 = vmatprep.mubr.f32.mxu0 %v531_v17  ;;  %4440 = vmatprep.mubr.f32.mxu1 %v563_v18 }
  0xd9   : > { %4393 = vmatmul.mubr.f32.gmra.mrb[28].mxu0 %v532_v19  ;;  %4441 = vmatmul.mubr.f32.gmra.mrb[28].mxu1 %v564_v20 }
  0xda   : > { %4395 = vmatprep.mubr.f32.mxu0 %v533_v21  ;;  %4443 = vmatprep.mubr.f32.mxu1 %v565_v22 }
  0xdd   : > { %4396 = vmatmul.mubr.f32.gmra.mrb[30].mxu0 %v534_v23  ;;  %4444 = vmatmul.mubr.f32.gmra.mrb[30].mxu1 %v566_v24 }
 0x174   : > { %v4352_v26 = vpop.f32.mrb[0].mxu0  ;;  %v4400_v27 = vpop.f32.mrb[0].mxu1 }
 0x175   : > { %v662_v28 = vadd.f32 %v4352_v26, %v5729_v25  ;;  %v656_v29 = vpop.f32.mrb[1].mxu0  ;;  %v822_v30 = vadd.f32 %v4400_v27, %v5729_v25  ;;  %v816_v31 = vpop.f32.mrb[1].mxu1 }
 0x176   : > { %v657_v32 = vadd.f32 %v5729_v25, %v656_v29  ;;  %v817_v33 = vadd.f32 %v5729_v25, %v816_v31 }
 0x177   : > { %vm976_vm0 = vcmp.ge.f32.partialorder %v662_v28, 0.0  ;;  %v1040_v34 = vmul.f32 0.01, %v662_v28  ;;  %vm1008_vm1 = vcmp.ge.f32.partialorder %v822_v30, 0.0  ;;  %v1072_v35 = vmul.f32 0.01, %v822_v30 }
 0x178   : > { %vm975_vm2 = vcmp.ge.f32.partialorder %v657_v32, 0.0  ;;  %v1039_v36 = vmul.f32 0.01, %v657_v32  ;;  %v4355_v37 = vpop.f32.mrb[2].mxu0  ;;  %vm1007_vm3 = vcmp.ge.f32.partialorder %v817_v33, 0.0  ;;  %v4403_v38 = vpop.f32.mrb[2].mxu1 }
 0x179   : > { %v1104_v39 = vsel %vm976_vm0, %v662_v28, %v1040_v34  ;;  %v672_v40 = vadd.f32 %v4355_v37, %v5729_v25  ;;  %v666_v41 = vpop.f32.mrb[3].mxu0  ;;  %v5736_v42 = vsel %vm1008_vm1, %v822_v30, %v1072_v35  ;;  %v1071_v43 = vmul.f32 0.01, %v817_v33  ;;  %v826_v44 = vpop.f32.mrb[3].mxu1 }
 0x17a   : > { %1169 = vst [vmem:[%s5739_s7 + $0x8] sm:$0xff] %v1104_v39  ;;  %v1306_v45 = vmul.f32 %v1104_v39, %v1104_v39  ;;  %v1103_v46 = vsel %vm975_vm2, %v657_v32, %v1039_v36  ;;  %v667_v47 = vadd.f32 %v5729_v25, %v666_v41  ;;  %1201 = vst [vmem:[%s5739_s7 + $0x108] sm:$0xff] %v5736_v42 }
 0x17b   : > { %1168 = vst [vmem:[%s5739_s7] sm:$0xff] %v1103_v46  ;;  %v1233_v48 = vadd.f32 %v1104_v39, %v1103_v46  ;;  %v1305_v49 = vmul.f32 %v1103_v46, %v1103_v46  ;;  %vm978_vm4 = vcmp.ge.f32.partialorder %v672_v40, 0.0  ;;  %v1042_v50 = vmul.f32 0.01, %v672_v40 }
 0x17c   : > { %vm977_vm5 = vcmp.ge.f32.partialorder %v667_v47, 0.0  ;;  %v1041_v51 = vmul.f32 0.01, %v667_v47  ;;  %v4358_v52 = vpop.f32.mrb[4].mxu0  ;;  %v5747_v53 = vsel %vm1007_vm3, %v817_v33, %v1071_v43  ;;  %v832_v54 = vadd.f32 %v4403_v38, %v5729_v25  ;;  %v5750_v55 = vpop.f32.mrb[4].mxu1 }
 0x17d   : > { %v1369_v56 = vadd.f32 %v1306_v45, %v1305_v49  ;;  %v1106_v57 = vsel %vm978_vm4, %v672_v40, %v1042_v50  ;;  %v682_v58 = vadd.f32 %v4358_v52, %v5729_v25  ;;  %v676_v59 = vpop.f32.mrb[5].mxu0  ;;  %1200 = vst [vmem:[%s5739_s7 + $0x100] sm:$0xff] %v5747_v53  ;;  %v5755_v60 = vpop.f32.mrb[5].mxu1  ;;  %v827_v6 = vadd.f32 %v5729_v25, %v826_v44 }
 0x17e   : > { %1171 = vst [vmem:[%s5739_s7 + $0x18] sm:$0xff] %v1106_v57  ;;  %v1308_v61 = vmul.f32 %v1106_v57, %v1106_v57  ;;  %v1105_v62 = vsel %vm977_vm5, %v667_v47, %v1041_v51  ;;  %v677_v63 = vadd.f32 %v5729_v25, %v676_v59  ;;  %vm1010_vm6 = vcmp.ge.f32.partialorder %v832_v54, 0.0 }
 0x17f   : > { %1170 = vst [vmem:[%s5739_s7 + $0x10] sm:$0xff] %v1105_v62  ;;  %v1234_v0 = vadd.f32 %v1233_v48, %v1105_v62  ;;  %v1307_v1 = vmul.f32 %v1105_v62, %v1105_v62  ;;  %vm980_vm7 = vcmp.ge.f32.partialorder %v682_v58, 0.0  ;;  %v1044_v2 = vmul.f32 0.01, %v682_v58 }
 0x180   : > { %vm979_vm8 = vcmp.ge.f32.partialorder %v677_v63, 0.0  ;;  %v1043_v3 = vmul.f32 0.01, %v677_v63  ;;  %v4361_v4 = vpop.f32.mrb[6].mxu0  ;;  %v1074_v5 = vmul.f32 0.01, %v832_v54  ;;  %v842_v46 = vadd.f32 %v5750_v55, %v5729_v25 }
 0x181   : > { %v1370_v7 = vadd.f32 %v1369_v56, %v1307_v1  ;;  %v1108_v8 = vsel %vm980_vm7, %v682_v58, %v1044_v2  ;;  %v1235_v9 = vadd.f32 %v1234_v0, %v1106_v57  ;;  %v692_v10 = vadd.f32 %v4361_v4, %v5729_v25  ;;  %v686_v11 = vpop.f32.mrb[7].mxu0  ;;  %v5762_v12 = vpop.f32.mrb[6].mxu1 }
 0x182   : > { %1173 = vst [vmem:[%s5739_s7 + $0x28] sm:$0xff] %v1108_v8  ;;  %v1107_v13 = vsel %vm979_vm8, %v677_v63, %v1043_v3  ;;  %v687_v14 = vadd.f32 %v5729_v25, %v686_v11  ;;  %v5767_v15 = vsel %vm1010_vm6, %v832_v54, %v1074_v5  ;;  %v5769_v16 = vpop.f32.mrb[7].mxu1  ;;  %v1310_v20 = vmul.f32 %v1108_v8, %v1108_v8 }
 0x183   : > { %1172 = vst [vmem:[%s5739_s7 + $0x20] sm:$0xff] %v1107_v13  ;;  %v1236_v17 = vadd.f32 %v1235_v9, %v1107_v13  ;;  %v1309_v18 = vmul.f32 %v1107_v13, %v1107_v13  ;;  %v1371_v19 = vadd.f32 %v1370_v7, %v1308_v61  ;;  %vm982_vm9 = vcmp.ge.f32.partialorder %v692_v10, 0.0  ;;  %1203 = vst [vmem:[%s5739_s7 + $0x118] sm:$0xff] %v5767_v15 }
 0x184   : > { %v1046_v21 = vmul.f32 0.01, %v692_v10  ;;  %vm981_vm10 = vcmp.ge.f32.partialorder %v687_v14, 0.0  ;;  %v1045_v22 = vmul.f32 0.01, %v687_v14  ;;  %v4364_v23 = vpop.f32.mrb[8].mxu0 }
 0x185   : > { %v1372_v24 = vadd.f32 %v1371_v19, %v1309_v18  ;;  %v1237_v26 = vadd.f32 %v1236_v17, %v1108_v8  ;;  %v702_v27 = vadd.f32 %v4364_v23, %v5729_v25  ;;  %v696_v28 = vpop.f32.mrb[9].mxu0  ;;  %vm1009_vm11 = vcmp.ge.f32.partialorder %v827_v6, 0.0  ;;  %v5775_v29 = vpop.f32.mrb[8].mxu1 }
 0x186   : > { %v1110_v30 = vsel %vm982_vm9, %v692_v10, %v1046_v21  ;;  %v1109_v31 = vsel %vm981_vm10, %v687_v14, %v1045_v22  ;;  %v697_v32 = vadd.f32 %v5729_v25, %v696_v28  ;;  %v1073_v33 = vmul.f32 0.01, %v827_v6  ;;  %v5778_v34 = vpop.f32.mrb[9].mxu1 }
 0x187   : > { %1175 = vst [vmem:[%s5739_s7 + $0x38] sm:$0xff] %v1110_v30  ;;  %v1312_v35 = vmul.f32 %v1110_v30, %v1110_v30  ;;  %1174 = vst [vmem:[%s5739_s7 + $0x30] sm:$0xff] %v1109_v31  ;;  %v1238_v36 = vadd.f32 %v1237_v26, %v1109_v31  ;;  %v1311_v37 = vmul.f32 %v1109_v31, %v1109_v31  ;;  %vm984_vm12 = vcmp.ge.f32.partialorder %v702_v27, 0.0 }
 0x188   : > { %v1373_v38 = vadd.f32 %v1372_v24, %v1310_v20  ;;  %v1048_v39 = vmul.f32 0.01, %v702_v27  ;;  %vm983_vm13 = vcmp.ge.f32.partialorder %v697_v32, 0.0  ;;  %v1047_v40 = vmul.f32 0.01, %v697_v32  ;;  %v4367_v44 = vpop.f32.mrb[10].mxu0 }
 0x189   : > { %v1239_v43 = vadd.f32 %v1238_v36, %v1110_v30  ;;  %v5783_v45 = vsel %vm1009_vm11, %v827_v6, %v1073_v33  ;;  %v5787_v47 = vpop.f32.mrb[10].mxu1  ;;  %v712_v50 = vadd.f32 %v4367_v44, %v5729_v25  ;;  %v706_v51 = vpop.f32.mrb[11].mxu0  ;;  %vm1012_vm15 = vcmp.ge.f32.partialorder %v842_v46, 0.0 }
 0x18a   : > { %v1374_v41 = vadd.f32 %v1373_v38, %v1311_v37  ;;  %v1112_v48 = vsel %vm984_vm12, %v702_v27, %v1048_v39  ;;  %v1111_v49 = vsel %vm983_vm13, %v697_v32, %v1047_v40  ;;  %1202 = vst [vmem:[%s5739_s7 + $0x110] sm:$0xff] %v5783_v45  ;;  %v5792_v52 = vpop.f32.mrb[11].mxu1  ;;  %v707_v59 = vadd.f32 %v5729_v25, %v706_v51 }
 0x18b   : > { %1177 = vst [vmem:[%s5739_s7 + $0x48] sm:$0xff] %v1112_v48  ;;  %v1314_v54 = vmul.f32 %v1112_v48, %v1112_v48  ;;  %1176 = vst [vmem:[%s5739_s7 + $0x40] sm:$0xff] %v1111_v49  ;;  %v1240_v56 = vadd.f32 %v1239_v43, %v1111_v49  ;;  %v1313_v57 = vmul.f32 %v1111_v49, %v1111_v49  ;;  %vm986_vm14 = vcmp.ge.f32.partialorder %v712_v50, 0.0 }
 0x18c   : > { %v1375_v58 = vadd.f32 %v1374_v41, %v1312_v35  ;;  %v1050_v55 = vmul.f32 0.01, %v712_v50  ;;  %v4370_v61 = vpop.f32.mrb[12].mxu0  ;;  %v5797_v62 = vpop.f32.mrb[12].mxu1  ;;  %v1076_v3 = vmul.f32 0.01, %v842_v46  ;;  %v837_v40 = vadd.f32 %v5729_v25, %v5755_v60 }
 0x18d   : > { %v1241_v0 = vadd.f32 %v1240_v56, %v1112_v48  ;;  %v722_v1 = vadd.f32 %v4370_v61, %v5729_v25  ;;  %v716_v2 = vpop.f32.mrb[13].mxu0  ;;  %v5800_v4 = vpop.f32.mrb[13].mxu1  ;;  %vm985_vm0 = vcmp.ge.f32.partialorder %v707_v59, 0.0  ;;  %v1049_v6 = vmul.f32 0.01, %v707_v59 }
 0x18e   : > { %v1376_v63 = vadd.f32 %v1375_v58, %v1313_v57  ;;  %v1114_v5 = vsel %vm986_vm14, %v712_v50, %v1050_v55  ;;  %v717_v7 = vadd.f32 %v5729_v25, %v716_v2  ;;  %v5805_v14 = vsel %vm1012_vm15, %v842_v46, %v1076_v3 }
 0x18f   : > { %1179 = vst [vmem:[%s5739_s7 + $0x58] sm:$0xff] %v1114_v5  ;;  %vm988_vm1 = vcmp.ge.f32.partialorder %v722_v1, 0.0  ;;  %v1052_v9 = vmul.f32 0.01, %v722_v1  ;;  %v1113_v10 = vsel %vm985_vm0, %v707_v59, %v1049_v6  ;;  %1205 = vst [vmem:[%s5739_s7 + $0x128] sm:$0xff] %v5805_v14  ;;  %v1316_v24 = vmul.f32 %v1114_v5, %v1114_v5 }
 0x190   : > { %v1377_v8 = vadd.f32 %v1376_v63, %v1314_v54  ;;  %vm987_vm2 = vcmp.ge.f32.partialorder %v717_v7, 0.0  ;;  %v1051_v11 = vmul.f32 0.01, %v717_v7  ;;  %v4373_v13 = vpop.f32.mrb[14].mxu0  ;;  %v5807_v17 = vpop.f32.mrb[14].mxu1  ;;  %1178 = vst [vmem:[%s5739_s7 + $0x50] sm:$0xff] %v1113_v10  ;;  %v1242_v18 = vadd.f32 %v1241_v0, %v1113_v10 }
 0x191   : > { %v1315_v19 = vmul.f32 %v1113_v10, %v1113_v10  ;;  %v1116_v20 = vsel %vm988_vm1, %v722_v1, %v1052_v9  ;;  %v732_v21 = vadd.f32 %v4373_v13, %v5729_v25  ;;  %v726_v22 = vpop.f32.mrb[15].mxu0  ;;  %v5813_v23 = vpop.f32.mrb[15].mxu1  ;;  %v852_v56 = vadd.f32 %v5762_v12, %v5729_v25 }
 0x192   : > { %1181 = vst [vmem:[%s5739_s7 + $0x68] sm:$0xff] %v1116_v20  ;;  %v1115_v26 = vsel %vm987_vm2, %v717_v7, %v1051_v11  ;;  %v727_v27 = vadd.f32 %v5729_v25, %v726_v22  ;;  %v1243_v30 = vadd.f32 %v1242_v18, %v1114_v5  ;;  %v1318_v43 = vmul.f32 %v1116_v20, %v1116_v20 }
 0x193   : > { %v1378_v28 = vadd.f32 %v1377_v8, %v1315_v19  ;;  %1180 = vst [vmem:[%s5739_s7 + $0x60] sm:$0xff] %v1115_v26  ;;  %v1317_v31 = vmul.f32 %v1115_v26, %v1115_v26  ;;  %vm990_vm3 = vcmp.ge.f32.partialorder %v732_v21, 0.0  ;;  %v1054_v32 = vmul.f32 0.01, %v732_v21 }
 0x194   : > { %vm989_vm4 = vcmp.ge.f32.partialorder %v727_v27, 0.0  ;;  %v1053_v33 = vmul.f32 0.01, %v727_v27  ;;  %v4376_v35 = vpop.f32.mrb[16].mxu0  ;;  %v1244_v36 = vadd.f32 %v1243_v30, %v1115_v26  ;;  %v5821_v41 = vpop.f32.mrb[16].mxu1  ;;  %vm1011_vm7 = vcmp.ge.f32.partialorder %v837_v40, 0.0 }
 0x195   : > { %v1379_v37 = vadd.f32 %v1378_v28, %v1316_v24  ;;  %v742_v38 = vadd.f32 %v4376_v35, %v5729_v25  ;;  %v736_v39 = vpop.f32.mrb[17].mxu0  ;;  %v1118_v44 = vsel %vm990_vm3, %v732_v21, %v1054_v32  ;;  %v5824_v49 = vpop.f32.mrb[17].mxu1  ;;  %v1075_v61 = vmul.f32 0.01, %v837_v40 }
 0x196   : > { %v1117_v46 = vsel %vm989_vm4, %v727_v27, %v1053_v33  ;;  %v737_v48 = vadd.f32 %v5729_v25, %v736_v39  ;;  %1183 = vst [vmem:[%s5739_s7 + $0x78] sm:$0xff] %v1118_v44  ;;  %v1245_v51 = vadd.f32 %v1244_v36, %v1116_v20  ;;  %v1320_v0 = vmul.f32 %v1118_v44, %v1118_v44 }
 0x197   : > { %v1380_v50 = vadd.f32 %v1379_v37, %v1317_v31  ;;  %1182 = vst [vmem:[%s5739_s7 + $0x70] sm:$0xff] %v1117_v46  ;;  %v1319_v54 = vmul.f32 %v1117_v46, %v1117_v46  ;;  %vm992_vm5 = vcmp.ge.f32.partialorder %v742_v38, 0.0  ;;  %v1056_v57 = vmul.f32 0.01, %v742_v38 }
 0x198   : > { %vm991_vm6 = vcmp.ge.f32.partialorder %v737_v48, 0.0  ;;  %v1055_v60 = vmul.f32 0.01, %v737_v48  ;;  %v1246_v58 = vadd.f32 %v1245_v51, %v1117_v46  ;;  %v4379_v59 = vpop.f32.mrb[18].mxu0  ;;  %v5830_v63 = vpop.f32.mrb[18].mxu1  ;;  %vm1014_vm8 = vcmp.ge.f32.partialorder %v852_v56, 0.0 }
 0x199   : > { %v1381_v55 = vadd.f32 %v1380_v50, %v1318_v43  ;;  %v1120_v1 = vsel %vm992_vm5, %v742_v38, %v1056_v57  ;;  %v752_v3 = vadd.f32 %v4379_v59, %v5729_v25  ;;  %v746_v5 = vpop.f32.mrb[19].mxu0  ;;  %v5833_v12 = vpop.f32.mrb[19].mxu1  ;;  %v5839_v13 = vsel %vm1011_vm7, %v837_v40, %v1075_v61 }
 0x19a   : > { %v1119_v2 = vsel %vm991_vm6, %v737_v48, %v1055_v60  ;;  %1185 = vst [vmem:[%s5739_s7 + $0x88] sm:$0xff] %v1120_v1  ;;  %v1247_v7 = vadd.f32 %v1246_v58, %v1118_v44  ;;  %v747_v10 = vadd.f32 %v5729_v25, %v746_v5  ;;  %1204 = vst [vmem:[%s5739_s7 + $0x120] sm:$0xff] %v5839_v13  ;;  %v1078_v24 = vmul.f32 0.01, %v852_v56 }
 0x19b   : > { %v1382_v6 = vadd.f32 %v1381_v55, %v1319_v54  ;;  %1184 = vst [vmem:[%s5739_s7 + $0x80] sm:$0xff] %v1119_v2  ;;  %v1321_v8 = vmul.f32 %v1119_v2, %v1119_v2  ;;  %vm994_vm9 = vcmp.ge.f32.partialorder %v752_v3, 0.0  ;;  %v1058_v9 = vmul.f32 0.01, %v752_v3 }
 0x19c   : > { %v4382_v11 = vpop.f32.mrb[20].mxu0  ;;  %v5841_v18 = vpop.f32.mrb[20].mxu1  ;;  %v1248_v19 = vadd.f32 %v1247_v7, %v1119_v2  ;;  %vm993_vm10 = vcmp.ge.f32.partialorder %v747_v10, 0.0  ;;  %v1057_v28 = vmul.f32 0.01, %v747_v10  ;;  %v1322_v31 = vmul.f32 %v1120_v1, %v1120_v1 }
 0x19d   : > { %v1383_v20 = vadd.f32 %v1382_v6, %v1320_v0  ;;  %v762_v21 = vadd.f32 %v4382_v11, %v5729_v25  ;;  %v756_v22 = vpop.f32.mrb[21].mxu0  ;;  %v5846_v26 = vpop.f32.mrb[21].mxu1  ;;  %v1122_v27 = vsel %vm994_vm9, %v752_v3, %v1058_v9  ;;  %v5856_v57 = vsel %vm1014_vm8, %v852_v56, %v1078_v24 }
 0x19e   : > { %v757_v30 = vadd.f32 %v5729_v25, %v756_v22  ;;  %1187 = vst [vmem:[%s5739_s7 + $0x98] sm:$0xff] %v1122_v27  ;;  %v1249_v33 = vadd.f32 %v1248_v19, %v1120_v1  ;;  %v1121_v35 = vsel %vm993_vm10, %v747_v10, %v1057_v28  ;;  %v1324_v58 = vmul.f32 %v1122_v27, %v1122_v27 }
 0x19f   : > { %v1384_v32 = vadd.f32 %v1383_v20, %v1321_v8  ;;  %vm996_vm11 = vcmp.ge.f32.partialorder %v762_v21, 0.0  ;;  %v1060_v36 = vmul.f32 0.01, %v762_v21  ;;  %1186 = vst [vmem:[%s5739_s7 + $0x90] sm:$0xff] %v1121_v35  ;;  %v1323_v40 = vmul.f32 %v1121_v35, %v1121_v35  ;;  %1207 = vst [vmem:[%s5739_s7 + $0x138] sm:$0xff] %v5856_v57 }
 0x1a0   : > { %vm995_vm12 = vcmp.ge.f32.partialorder %v757_v30, 0.0  ;;  %v1059_v37 = vmul.f32 0.01, %v757_v30  ;;  %v4385_v38 = vpop.f32.mrb[22].mxu0  ;;  %v1250_v39 = vadd.f32 %v1249_v33, %v1121_v35  ;;  %v5852_v48 = vpop.f32.mrb[22].mxu1  ;;  %v847_v5 = vadd.f32 %v5729_v25, %v5769_v16 }
 0x1a1   : > { %v1385_v43 = vadd.f32 %v1384_v32, %v1322_v31  ;;  %v772_v44 = vadd.f32 %v4385_v38, %v5729_v25  ;;  %v766_v46 = vpop.f32.mrb[23].mxu0  ;;  %v1124_v50 = vsel %vm996_vm11, %v762_v21, %v1060_v36  ;;  %v5858_v60 = vpop.f32.mrb[23].mxu1  ;;  %v5875_v24 = vadd.f32 %v5775_v29, %v5729_v25 }
 0x1a2   : > { %v1123_v51 = vsel %vm995_vm12, %v757_v30, %v1059_v37  ;;  %v767_v54 = vadd.f32 %v5729_v25, %v766_v46  ;;  %1189 = vst [vmem:[%s5739_s7 + $0xa8] sm:$0xff] %v1124_v50  ;;  %v1251_v59 = vadd.f32 %v1250_v39, %v1122_v27  ;;  %v1326_v7 = vmul.f32 %v1124_v50, %v1124_v50 }
 0x1a3   : > { %v1386_v55 = vadd.f32 %v1385_v43, %v1323_v40  ;;  %1188 = vst [vmem:[%s5739_s7 + $0xa0] sm:$0xff] %v1123_v51  ;;  %v1325_v61 = vmul.f32 %v1123_v51, %v1123_v51  ;;  %vm998_vm13 = vcmp.ge.f32.partialorder %v772_v44, 0.0  ;;  %v1062_v0 = vmul.f32 0.01, %v772_v44 }
 0x1a4   : > { %vm997_vm14 = vcmp.ge.f32.partialorder %v767_v54, 0.0  ;;  %v1061_v1 = vmul.f32 0.01, %v767_v54  ;;  %v1252_v2 = vadd.f32 %v1251_v59, %v1123_v51  ;;  %v4388_v56 = vpop.f32.mrb[24].mxu0  ;;  %v5866_v6 = vpop.f32.mrb[24].mxu1  ;;  %vm1013_vm2 = vcmp.ge.f32.partialorder %v847_v5, 0.0 }
 0x1a5   : > { %v1387_v3 = vadd.f32 %v1386_v55, %v1324_v58  ;;  %v1126_v8 = vsel %vm998_vm13, %v772_v44, %v1062_v0  ;;  %v782_v10 = vadd.f32 %v4388_v56, %v5729_v25  ;;  %v776_v11 = vpop.f32.mrb[25].mxu0  ;;  %v5869_v19 = vpop.f32.mrb[25].mxu1  ;;  %v1077_v37 = vmul.f32 0.01, %v847_v5 }
 0x1a6   : > { %v1125_v9 = vsel %vm997_vm14, %v767_v54, %v1061_v1  ;;  %1191 = vst [vmem:[%s5739_s7 + $0xb8] sm:$0xff] %v1126_v8  ;;  %v1253_v21 = vadd.f32 %v1252_v2, %v1124_v50  ;;  %v1328_v16 = vmul.f32 %v1126_v8, %v1126_v8  ;;  %v777_v28 = vadd.f32 %v5729_v25, %v776_v11 }
 0x1a7   : > { %v1388_v20 = vadd.f32 %v1387_v3, %v1325_v61  ;;  %1190 = vst [vmem:[%s5739_s7 + $0xb0] sm:$0xff] %v1125_v9  ;;  %v1327_v22 = vmul.f32 %v1125_v9, %v1125_v9  ;;  %vm1000_vm15 = vcmp.ge.f32.partialorder %v782_v10, 0.0  ;;  %v1064_v27 = vmul.f32 0.01, %v782_v10 }
 0x1a8   : > { %v4391_v30 = vpop.f32.mrb[26].mxu0  ;;  %v5878_v31 = vpop.f32.mrb[26].mxu1  ;;  %v1254_v32 = vadd.f32 %v1253_v21, %v1125_v9  ;;  %vm999_vm0 = vcmp.ge.f32.partialorder %v777_v28, 0.0  ;;  %v1063_v39 = vmul.f32 0.01, %v777_v28  ;;  %vm1016_vm6 = vcmp.ge.f32.partialorder %v5875_v24, 0.0 }
 0x1a9   : > { %v1389_v33 = vadd.f32 %v1388_v20, %v1326_v7  ;;  %v792_v35 = vadd.f32 %v4391_v30, %v5729_v25  ;;  %v786_v36 = vpop.f32.mrb[27].mxu0  ;;  %v5881_v38 = vpop.f32.mrb[27].mxu1  ;;  %v1128_v29 = vsel %vm1000_vm15, %v782_v10, %v1064_v27  ;;  %v5891_v7 = vsel %vm1013_vm2, %v847_v5, %v1077_v37 }
 0x1aa   : > { %v787_v40 = vadd.f32 %v5729_v25, %v786_v36  ;;  %1193 = vst [vmem:[%s5739_s7 + $0xc8] sm:$0xff] %v1128_v29  ;;  %v1255_v44 = vadd.f32 %v1254_v32, %v1126_v8  ;;  %v1127_v46 = vsel %vm999_vm0, %v777_v28, %v1063_v39  ;;  %v1330_v9 = vmul.f32 %v1128_v29, %v1128_v29 }
 0x1ab   : > { %v1390_v43 = vadd.f32 %v1389_v33, %v1327_v22  ;;  %vm1002_vm1 = vcmp.ge.f32.partialorder %v792_v35, 0.0  ;;  %v1066_v50 = vmul.f32 0.01, %v792_v35  ;;  %1192 = vst [vmem:[%s5739_s7 + $0xc0] sm:$0xff] %v1127_v46  ;;  %v1329_v55 = vmul.f32 %v1127_v46, %v1127_v46  ;;  %1206 = vst [vmem:[%s5739_s7 + $0x130] sm:$0xff] %v5891_v7 }
 0x1ac   : > { %vm1001_vm3 = vcmp.ge.f32.partialorder %v787_v40, 0.0  ;;  %v1065_v51 = vmul.f32 0.01, %v787_v40  ;;  %v4394_v54 = vpop.f32.mrb[28].mxu0  ;;  %v1256_v58 = vadd.f32 %v1255_v44, %v1127_v46  ;;  %v5887_v1 = vpop.f32.mrb[28].mxu1 }
 0x1ad   : > { %v1391_v59 = vadd.f32 %v1390_v43, %v1328_v16  ;;  %v802_v61 = vadd.f32 %v4394_v54, %v5729_v25  ;;  %v796_v0 = vpop.f32.mrb[29].mxu0  ;;  %v1130_v2 = vsel %vm1002_vm1, %v792_v35, %v1066_v50  ;;  %v5893_v8 = vpop.f32.mrb[29].mxu1  ;;  %v1080_v36 = vmul.f32 0.01, %v5875_v24 }
 0x1ae   : > { %v1129_v3 = vsel %vm1001_vm3, %v787_v40, %v1065_v51  ;;  %v797_v56 = vadd.f32 %v5729_v25, %v796_v0  ;;  %1195 = vst [vmem:[%s5739_s7 + $0xd8] sm:$0xff] %v1130_v2  ;;  %v1257_v11 = vadd.f32 %v1256_v58, %v1128_v29  ;;  %v1332_v29 = vmul.f32 %v1130_v2, %v1130_v2 }
 0x1af   : > { %v1392_v10 = vadd.f32 %v1391_v59, %v1329_v55  ;;  %1194 = vst [vmem:[%s5739_s7 + $0xd0] sm:$0xff] %v1129_v3  ;;  %v1331_v20 = vmul.f32 %v1129_v3, %v1129_v3  ;;  %vm1004_vm4 = vcmp.ge.f32.partialorder %v802_v61, 0.0  ;;  %v1068_v21 = vmul.f32 0.01, %v802_v61 }
 0x1b0   : > { %vm1003_vm5 = vcmp.ge.f32.partialorder %v797_v56, 0.0  ;;  %v1067_v22 = vmul.f32 0.01, %v797_v56  ;;  %v1258_v16 = vadd.f32 %v1257_v11, %v1129_v3  ;;  %v4397_v5 = vpop.f32.mrb[30].mxu0  ;;  %v5900_v28 = vpop.f32.mrb[30].mxu1  ;;  %v5912_v50 = vsel %vm1016_vm6, %v5875_v24, %v1080_v36 }
 0x1b1   : > { %v1393_v27 = vadd.f32 %v1392_v10, %v1330_v9  ;;  %v1132_v30 = vsel %vm1004_vm4, %v802_v61, %v1068_v21  ;;  %v812_v33 = vadd.f32 %v4397_v5, %v5729_v25  ;;  %v806_v35 = vpop.f32.mrb[31].mxu0  ;;  %v5904_v37 = vpop.f32.mrb[31].mxu1  ;;  %1209 = vst [vmem:[%s5739_s7 + $0x148] sm:$0xff] %v5912_v50  ;;  %v857_v58 = vadd.f32 %v5729_v25, %v5778_v34 }
 0x1b2   : > { %v1131_v32 = vsel %vm1003_vm5, %v797_v56, %v1067_v22  ;;  %1197 = vst [vmem:[%s5739_s7 + $0xe8] sm:$0xff] %v1132_v30  ;;  %v1259_v40 = vadd.f32 %v1258_v16, %v1130_v2  ;;  %v807_v46 = vadd.f32 %v5729_v25, %v806_v35  ;;  %v872_v61 = vadd.f32 %v5787_v47, %v5729_v25 }
 0x1b3   : > { %v1394_v39 = vadd.f32 %v1393_v27, %v1331_v20  ;;  %1196 = vst [vmem:[%s5739_s7 + $0xe0] sm:$0xff] %v1131_v32  ;;  %v1333_v43 = vmul.f32 %v1131_v32, %v1131_v32  ;;  %vm1006_vm7 = vcmp.ge.f32.partialorder %v812_v33, 0.0  ;;  %v1070_v44 = vmul.f32 0.01, %v812_v33 }
 0x1b4   : > { %v1260_v51 = vadd.f32 %v1259_v40, %v1131_v32  ;;  %vm1005_vm8 = vcmp.ge.f32.partialorder %v807_v46, 0.0  ;;  %v1069_v59 = vmul.f32 0.01, %v807_v46  ;;  %v1334_v0 = vmul.f32 %v1132_v30, %v1132_v30 }
 0x1b5   : > { %v1395_v54 = vadd.f32 %v1394_v39, %v1332_v29  ;;  %v1134_v55 = vsel %vm1006_vm7, %v812_v33, %v1070_v44  ;;  %vm1015_vm9 = vcmp.ge.f32.partialorder %v857_v58, 0.0  ;;  %v1079_v56 = vmul.f32 0.01, %v857_v58 }
 0x1b6   : > { %1199 = vst [vmem:[%s5739_s7 + $0xf8] sm:$0xff] %v1134_v55  ;;  %v1261_v3 = vadd.f32 %v1260_v51, %v1132_v30  ;;  %v1133_v24 = vsel %vm1005_vm8, %v807_v46, %v1069_v59  ;;  %vm1018_vm10 = vcmp.ge.f32.partialorder %v872_v61, 0.0  ;;  %v1082_v9 = vmul.f32 0.01, %v872_v61 }
 0x1b7   : > { %v1396_v2 = vadd.f32 %v1395_v54, %v1333_v43  ;;  %1198 = vst [vmem:[%s5739_s7 + $0xf0] sm:$0xff] %v1133_v24  ;;  %v1335_v34 = vmul.f32 %v1133_v24, %v1133_v24  ;;  %v867_v20 = vadd.f32 %v5729_v25, %v5792_v52  ;;  %v5924_v21 = vsel %vm1015_vm9, %v857_v58, %v1079_v56 }
 0x1b8   : > { %v1262_v10 = vadd.f32 %v1261_v3, %v1133_v24  ;;  %v5926_v47 = vsel %vm1018_vm10, %v872_v61, %v1082_v9  ;;  %v882_v22 = vadd.f32 %v5797_v62, %v5729_v25  ;;  %v877_v16 = vadd.f32 %v5729_v25, %v5800_v4  ;;  %1208 = vst [vmem:[%s5739_s7 + $0x140] sm:$0xff] %v5924_v21 }
 0x1b9   : > { %v1397_v11 = vadd.f32 %v1396_v2, %v1334_v0  ;;  %v1336_v27 = vmul.f32 %v1134_v55, %v1134_v55  ;;  %v1337_v32 = vmul.f32 %v5747_v53, %v5747_v53  ;;  %1211 = vst [vmem:[%s5739_s7 + $0x158] sm:$0xff] %v5926_v47  ;;  %vm1017_vm11 = vcmp.ge.f32.partialorder %v867_v20, 0.0 }
 0x1ba   : > { %v1263_v30 = vadd.f32 %v1262_v10, %v1134_v55  ;;  %v1081_v52 = vmul.f32 0.01, %v867_v20  ;;  %vm1020_vm12 = vcmp.ge.f32.partialorder %v882_v22, 0.0  ;;  %v1084_v33 = vmul.f32 0.01, %v882_v22 }
 0x1bb   : > { %v1398_v5 = vadd.f32 %v1397_v11, %v1335_v34  ;;  %vm1019_vm13 = vcmp.ge.f32.partialorder %v877_v16, 0.0  ;;  %v1083_v4 = vmul.f32 0.01, %v877_v16  ;;  %v892_v39 = vadd.f32 %v5807_v17, %v5729_v25 }
 0x1bc   : > { %v1264_v62 = vadd.f32 %v1263_v30, %v5747_v53  ;;  %v5939_v36 = vsel %vm1017_vm11, %v867_v20, %v1081_v52  ;;  %v5941_v29 = vsel %vm1020_vm12, %v882_v22, %v1084_v33  ;;  %v887_v40 = vadd.f32 %v5729_v25, %v5813_v23 }
 0x1bd   : > { %v1399_v35 = vadd.f32 %v1398_v5, %v1336_v27  ;;  %v1338_v43 = vmul.f32 %v5736_v42, %v5736_v42  ;;  %1210 = vst [vmem:[%s5739_s7 + $0x150] sm:$0xff] %v5939_v36  ;;  %1213 = vst [vmem:[%s5739_s7 + $0x168] sm:$0xff] %v5941_v29  ;;  %v5954_v46 = vsel %vm1019_vm13, %v877_v16, %v1083_v4  ;;  %vm1022_vm14 = vcmp.ge.f32.partialorder %v892_v39, 0.0 }
 0x1be   : > { %v1265_v53 = vadd.f32 %v1264_v62, %v5736_v42  ;;  %v1086_v51 = vmul.f32 0.01, %v892_v39  ;;  %vm1021_vm15 = vcmp.ge.f32.partialorder %v887_v40, 0.0  ;;  %v1339_v23 = vmul.f32 %v5783_v45, %v5783_v45  ;;  %1212 = vst [vmem:[%s5739_s7 + $0x160] sm:$0xff] %v5954_v46 }
 0x1bf   : > { %v1400_v44 = vadd.f32 %v1399_v35, %v1337_v32  ;;  %v1085_v42 = vmul.f32 0.01, %v887_v40  ;;  %v902_v55 = vadd.f32 %v5821_v41, %v5729_v25  ;;  %v897_v59 = vadd.f32 %v5729_v25, %v5824_v49 }
 0x1c0   : > { %v1266_v17 = vadd.f32 %v1265_v53, %v5783_v45  ;;  %v5961_v58 = vsel %vm1022_vm14, %v892_v39, %v1086_v51  ;;  %v912_v61 = vadd.f32 %v5830_v63, %v5729_v25  ;;  %v1340_v0 = vmul.f32 %v5767_v15, %v5767_v15 }
 0x1c1   : > { %v1401_v54 = vadd.f32 %v1400_v44, %v1338_v43  ;;  %1215 = vst [vmem:[%s5739_s7 + $0x178] sm:$0xff] %v5961_v58  ;;  %v5974_v3 = vsel %vm1021_vm15, %v887_v40, %v1085_v42  ;;  %v1341_v24 = vmul.f32 %v5839_v13, %v5839_v13  ;;  %vm1024_vm0 = vcmp.ge.f32.partialorder %v902_v55, 0.0 }
 0x1c2   : > { %v1267_v45 = vadd.f32 %v1266_v17, %v5767_v15  ;;  %1214 = vst [vmem:[%s5739_s7 + $0x170] sm:$0xff] %v5974_v3  ;;  %v1088_v41 = vmul.f32 0.01, %v902_v55  ;;  %vm1023_vm1 = vcmp.ge.f32.partialorder %v897_v59, 0.0  ;;  %v1087_v56 = vmul.f32 0.01, %v897_v59 }
 0x1c3   : > { %v1402_v2 = vadd.f32 %v1401_v54, %v1339_v23  ;;  %vm1026_vm2 = vcmp.ge.f32.partialorder %v912_v61, 0.0  ;;  %v1090_v9 = vmul.f32 0.01, %v912_v61  ;;  %v907_v10 = vadd.f32 %v5729_v25, %v5833_v12 }
 0x1c4   : > { %v1268_v49 = vadd.f32 %v1267_v45, %v5839_v13  ;;  %v5981_v15 = vsel %vm1024_vm0, %v902_v55, %v1088_v41  ;;  %v922_v34 = vadd.f32 %v5841_v18, %v5729_v25  ;;  %v1342_v11 = vmul.f32 %v5805_v14, %v5805_v14 }
 0x1c5   : > { %v1403_v63 = vadd.f32 %v1402_v2, %v1340_v0  ;;  %1217 = vst [vmem:[%s5739_s7 + $0x188] sm:$0xff] %v5981_v15  ;;  %v5992_v13 = vsel %vm1023_vm1, %v897_v59, %v1087_v56  ;;  %v5996_v16 = vsel %vm1026_vm2, %v912_v61, %v1090_v9  ;;  %vm1025_vm3 = vcmp.ge.f32.partialorder %v907_v10, 0.0 }
 0x1c6   : > { %v1269_v22 = vadd.f32 %v1268_v49, %v5805_v14  ;;  %1216 = vst [vmem:[%s5739_s7 + $0x180] sm:$0xff] %v5992_v13  ;;  %v1089_v12 = vmul.f32 0.01, %v907_v10  ;;  %v1343_v18 = vmul.f32 %v5891_v7, %v5891_v7  ;;  %1219 = vst [vmem:[%s5739_s7 + $0x198] sm:$0xff] %v5996_v16  ;;  %vm1028_vm4 = vcmp.ge.f32.partialorder %v922_v34, 0.0 }
 0x1c7   : > { %v1404_v20 = vadd.f32 %v1403_v63, %v1341_v24  ;;  %v1092_v30 = vmul.f32 0.01, %v922_v34  ;;  %v917_v32 = vadd.f32 %v5729_v25, %v5846_v26  ;;  %v932_v52 = vadd.f32 %v5852_v48, %v5729_v25 }
 0x1c8   : > { %v1270_v27 = vadd.f32 %v1269_v22, %v5891_v7  ;;  %v6003_v14 = vsel %vm1025_vm3, %v907_v10, %v1089_v12  ;;  %v1344_v33 = vmul.f32 %v5856_v57, %v5856_v57  ;;  %v927_v35 = vadd.f32 %v5729_v25, %v5858_v60 }
 0x1c9   : > { %v1405_v5 = vadd.f32 %v1404_v20, %v1342_v11  ;;  %1218 = vst [vmem:[%s5739_s7 + $0x190] sm:$0xff] %v6003_v14  ;;  %v6016_v4 = vsel %vm1028_vm4, %v922_v34, %v1092_v30  ;;  %vm1027_vm5 = vcmp.ge.f32.partialorder %v917_v32, 0.0  ;;  %v1091_v39 = vmul.f32 0.01, %v917_v32 }
 0x1ca   : > { %v1271_v7 = vadd.f32 %v1270_v27, %v5856_v57  ;;  %vm1030_vm6 = vcmp.ge.f32.partialorder %v932_v52, 0.0  ;;  %v1345_v48 = vmul.f32 %v5924_v21, %v5924_v21  ;;  %1221 = vst [vmem:[%s5739_s7 + $0x1a8] sm:$0xff] %v6016_v4  ;;  %v1094_v57 = vmul.f32 0.01, %v932_v52 }
 0x1cb   : > { %v1406_v62 = vadd.f32 %v1405_v5, %v1343_v18  ;;  %v6023_v43 = vsel %vm1027_vm5, %v917_v32, %v1091_v39  ;;  %vm1029_vm7 = vcmp.ge.f32.partialorder %v927_v35, 0.0  ;;  %v1093_v60 = vmul.f32 0.01, %v927_v35 }
 0x1cc   : > { %v1272_v26 = vadd.f32 %v1271_v7, %v5924_v21  ;;  %v942_v44 = vadd.f32 %v5866_v6, %v5729_v25  ;;  %v1346_v53 = vmul.f32 %v5912_v50, %v5912_v50  ;;  %1220 = vst [vmem:[%s5739_s7 + $0x1a0] sm:$0xff] %v6023_v43  ;;  %v6032_v21 = vsel %vm1030_vm6, %v932_v52, %v1094_v57 }
 0x1cd   : > { %v1407_v40 = vadd.f32 %v1406_v62, %v1344_v33  ;;  %v1348_v23 = vmul.f32 %v5926_v47, %v5926_v47  ;;  %1223 = vst [vmem:[%s5739_s7 + $0x1b8] sm:$0xff] %v6032_v21  ;;  %v6038_v54 = vsel %vm1029_vm7, %v927_v35, %v1093_v60  ;;  %v1347_v55 = vmul.f32 %v5939_v36, %v5939_v36 }
 0x1ce   : > { %v1273_v17 = vadd.f32 %v1272_v26, %v5912_v50  ;;  %vm1032_vm8 = vcmp.ge.f32.partialorder %v942_v44, 0.0  ;;  %v1096_v6 = vmul.f32 0.01, %v942_v44  ;;  %1222 = vst [vmem:[%s5739_s7 + $0x1b0] sm:$0xff] %v6038_v54  ;;  %v937_v59 = vadd.f32 %v5729_v25, %v5869_v19 }
 0x1cf   : > { %v1408_v51 = vadd.f32 %v1407_v40, %v1345_v48  ;;  %v952_v0 = vadd.f32 %v5878_v31, %v5729_v25  ;;  %v947_v2 = vadd.f32 %v5729_v25, %v5881_v38  ;;  %v962_v45 = vadd.f32 %v5887_v1, %v5729_v25 }
 0x1d0   : > { %v1274_v42 = vadd.f32 %v1273_v17, %v5939_v36  ;;  %v6047_v61 = vsel %vm1032_vm8, %v942_v44, %v1096_v6  ;;  %v1349_v41 = vmul.f32 %v5954_v46, %v5954_v46  ;;  %vm1031_vm9 = vcmp.ge.f32.partialorder %v937_v59, 0.0 }
 0x1d1   : > { %v1409_v50 = vadd.f32 %v1408_v51, %v1346_v53  ;;  %1225 = vst [vmem:[%s5739_s7 + $0x1c8] sm:$0xff] %v6047_v61  ;;  %v1095_v19 = vmul.f32 0.01, %v937_v59  ;;  %vm1034_vm10 = vcmp.ge.f32.partialorder %v952_v0, 0.0  ;;  %v1098_v31 = vmul.f32 0.01, %v952_v0 }
 0x1d2   : > { %v1275_v36 = vadd.f32 %v1274_v42, %v5926_v47  ;;  %vm1033_vm11 = vcmp.ge.f32.partialorder %v947_v2, 0.0  ;;  %v1097_v63 = vmul.f32 0.01, %v947_v2  ;;  %vm1036_vm12 = vcmp.ge.f32.partialorder %v962_v45, 0.0 }
 0x1d3   : > { %v1410_v24 = vadd.f32 %v1409_v50, %v1347_v55  ;;  %v1159_v1 = vsel %vm1031_vm9, %v937_v59, %v1095_v19  ;;  %v6061_v47 = vsel %vm1034_vm10, %v952_v0, %v1098_v31  ;;  %v1100_v56 = vmul.f32 0.01, %v962_v45 }
 0x1d4   : > { %v1276_v38 = vadd.f32 %v1275_v36, %v5954_v46  ;;  %v957_v9 = vadd.f32 %v5729_v25, %v5893_v8  ;;  %v1350_v10 = vmul.f32 %v5941_v29, %v5941_v29  ;;  %1224 = vst [vmem:[%s5739_s7 + $0x1c0] sm:$0xff] %v1159_v1  ;;  %1227 = vst [vmem:[%s5739_s7 + $0x1d8] sm:$0xff] %v6061_v47 }
 0x1d5   : > { %v1411_v49 = vadd.f32 %v1410_v24, %v1348_v23  ;;  %v1161_v46 = vsel %vm1033_vm11, %v947_v2, %v1097_v63  ;;  %v6071_v20 = vsel %vm1036_vm12, %v962_v45, %v1100_v56  ;;  %v1351_v25 = vmul.f32 %v5974_v3, %v5974_v3 }
 0x1d6   : > { %v1277_v11 = vadd.f32 %v1276_v38, %v5941_v29  ;;  %vm1035_vm13 = vcmp.ge.f32.partialorder %v957_v9, 0.0  ;;  %v1099_v22 = vmul.f32 0.01, %v957_v9  ;;  %1226 = vst [vmem:[%s5739_s7 + $0x1d0] sm:$0xff] %v1161_v46  ;;  %1229 = vst [vmem:[%s5739_s7 + $0x1e8] sm:$0xff] %v6071_v20  ;;  %v1352_v30 = vmul.f32 %v5961_v58, %v5961_v58 }
 0x1d7   : > { %v1412_v34 = vadd.f32 %v1411_v49, %v1349_v41  ;;  %v4899_v29 = vld [vmem:[%s8151_s2] ss:$0 sm:$0xff]  ;;  %v1354_v39 = vmul.f32 %v5981_v15, %v5981_v15  ;;  %v1355_v40 = vmul.f32 %v6003_v14, %v6003_v14  ;;  %v1357_v51 = vmul.f32 %v6023_v43, %v6023_v43 }
 0x1d8   : > { %v1278_v12 = vadd.f32 %v1277_v11, %v5974_v3  ;;  %v1163_v27 = vsel %vm1035_vm13, %v957_v9, %v1099_v22  ;;  %v972_v18 = vadd.f32 %v4899_v29, %v5900_v28  ;;  %v967_v5 = vadd.f32 %v4899_v29, %v5904_v37 }
 0x1d9   : > { %v1413_v8 = vadd.f32 %v1412_v34, %v1350_v10  ;;  %1228 = vst [vmem:[%s5739_s7 + $0x1e0] sm:$0xff] %v1163_v27  ;;  %v1353_v28 = vmul.f32 %v5992_v13, %v5992_v13  ;;  %v1358_v17 = vmul.f32 %v6016_v4, %v6016_v4  ;;  %v1359_v42 = vmul.f32 %v6038_v54, %v6038_v54 }
 0x1da   : > { %v1279_v3 = vadd.f32 %v1278_v12, %v5961_v58  ;;  %vm1038_vm14 = vcmp.ge.f32.partialorder %v972_v18, 0.0  ;;  %v1102_v52 = vmul.f32 0.01, %v972_v18  ;;  %vm1037_vm15 = vcmp.ge.f32.partialorder %v967_v5, 0.0 }
 0x1db   : > { %v1414_v32 = vadd.f32 %v1413_v8, %v1351_v25  ;;  %v1101_v33 = vmul.f32 0.01, %v967_v5  ;;  %v1361_v0 = vmul.f32 %v1159_v1, %v1159_v1  ;;  %v1362_v45 = vmul.f32 %v6047_v61, %v6047_v61 }
 0x1dc   : > { %v1280_v62 = vadd.f32 %v1279_v3, %v5992_v13  ;;  %v1166_v37 = vsel %vm1038_vm14, %v972_v18, %v1102_v52  ;;  %v1356_v13 = vmul.f32 %v5996_v16, %v5996_v16  ;;  %v1363_v41 = vmul.f32 %v1161_v46, %v1161_v46  ;;  %v1232_v3 = vld [vmem:[#allocation3] sm:$0x1] }
 0x1dd   : > { %v1415_v7 = vadd.f32 %v1414_v32, %v1352_v30  ;;  %v1165_v35 = vsel %vm1037_vm15, %v967_v5, %v1101_v33  ;;  %1231 = vst [vmem:[%s5739_s7 + $0x1f8] sm:$0xff] %v1166_v37  ;;  %v1368_v11 = vmul.f32 %v1166_v37, %v1166_v37 }
 0x1de   : > { %v1281_v48 = vadd.f32 %v1280_v62, %v5981_v15  ;;  %1230 = vst [vmem:[%s5739_s7 + $0x1f0] sm:$0xff] %v1165_v35 }
 0x1df   : > { %v1416_v26 = vadd.f32 %v1415_v7, %v1353_v28 }
 0x1e0   : > { %v1282_v58 = vadd.f32 %v1281_v48, %v6003_v14 }
 0x1e1   : > { %v1417_v57 = vadd.f32 %v1416_v26, %v1354_v39 }
 0x1e2   : > { %v1283_v44 = vadd.f32 %v1282_v58, %v5996_v16  ;;  %v1360_v16 = vmul.f32 %v6032_v21, %v6032_v21 }
 0x1e3   : > { %v1418_v60 = vadd.f32 %v1417_v57, %v1355_v40 }
 0x1e4   : > { %v1284_v53 = vadd.f32 %v1283_v44, %v6023_v43 }
 0x1e5   : > { %v1419_v15 = vadd.f32 %v1418_v60, %v1356_v13 }
 0x1e6   : > { %v1285_v6 = vadd.f32 %v1284_v53, %v6016_v4 }
 0x1e7   : > { %v1420_v23 = vadd.f32 %v1419_v15, %v1357_v51 }
 0x1e8   : > { %v1286_v14 = vadd.f32 %v1285_v6, %v6038_v54  ;;  %v1364_v54 = vmul.f32 %v6061_v47, %v6061_v47 }
 0x1e9   : > { %v1421_v55 = vadd.f32 %v1420_v23, %v1358_v17 }
 0x1ea   : > { %v1287_v59 = vadd.f32 %v1286_v14, %v6032_v21  ;;  %v1365_v21 = vmul.f32 %v1163_v27, %v1163_v27 }
 0x1eb   : > { %v1422_v50 = vadd.f32 %v1421_v55, %v1359_v42 }
 0x1ec   : > { %v1288_v43 = vadd.f32 %v1287_v59, %v1159_v1  ;;  %v1366_v1 = vmul.f32 %v6071_v20, %v6071_v20 }
 0x1ed   : > { %v1423_v2 = vadd.f32 %v1422_v50, %v1360_v16 }
 0x1ee   : > { %v1289_v4 = vadd.f32 %v1288_v43, %v6047_v61  ;;  %v1367_v61 = vmul.f32 %v1165_v35, %v1165_v35 }
 0x1ef   : > { %v1424_v24 = vadd.f32 %v1423_v2, %v1361_v0 }
 0x1f0   : > { %v1290_v36 = vadd.f32 %v1289_v4, %v1161_v46 }
 0x1f1   : > { %v1425_v19 = vadd.f32 %v1424_v24, %v1362_v45 }
 0x1f2   : > { %v1291_v38 = vadd.f32 %v1290_v36, %v6061_v47 }
 0x1f3   : > { %v1426_v31 = vadd.f32 %v1425_v19, %v1363_v41 }
 0x1f4   : > { %v1292_v49 = vadd.f32 %v1291_v38, %v1163_v27 }
 0x1f5   : > { %v1427_v63 = vadd.f32 %v1426_v31, %v1364_v54 }
 0x1f6   : > { %v1293_v9 = vadd.f32 %v1292_v49, %v6071_v20  ;;  %v1304_v20 = vld [vmem:[#allocation4] sm:$0x1] }
 0x1f7   : > { %v1428_v56 = vadd.f32 %v1427_v63, %v1365_v21 }
 0x1f8   : > { %v1294_v10 = vadd.f32 %v1293_v9, %v1165_v35 }
 0x1f9   : > { %v1429_v34 = vadd.f32 %v1428_v56, %v1366_v1 }
 0x1fa   : > { %v1295_v46 = vadd.f32 %v1294_v10, %v1166_v37 }
 0x1fb   : > { %v1430_v22 = vadd.f32 %v1429_v34, %v1367_v61 }
 0x1fc   : > { %v1296_v12 = vrot.slane %v1295_v46, 4 }
 0x1fd   : > { %v1431_v25 = vadd.f32 %v1430_v22, %v1368_v11 }
 0x1fe   : > { %v1297_v8 = vadd.f32 %v1296_v12, %v1295_v46 }
 0x1ff   : > { %v1432_v29 = vrot.slane %v1431_v25, 4 }
 0x200   : > { %v1298_v47 = vrot.slane %v1297_v8, 2 }
 0x201   : > { %v1433_v18 = vadd.f32 %v1432_v29, %v1431_v25 }
 0x202   : > { %v1299_v27 = vadd.f32 %v1298_v47, %v1297_v8 }
 0x203   : > { %v1434_v5 = vrot.slane %v1433_v18, 2 }
 0x204   : > { %v1300_v30 = vrot.slane %v1299_v27, 1 }
 0x205   : > { %v1435_v32 = vadd.f32 %v1434_v5, %v1433_v18 }
 0x206   : > { %v1301_v52 = vadd.f32 %v1300_v30, %v1299_v27 }
 0x207   : > { %v1436_v33 = vrot.slane %v1435_v32, 1 }
 0x208   : > { %v1302_v62 = vadd.f32 %v1301_v52, %v1232_v3 }
 0x209   : > { %v1437_v28 = vadd.f32 %v1436_v33, %v1435_v32 }
 0x20a   : > { %1303 = vst [vmem:[#allocation3] sm:$0x1] %v1302_v62 }
 0x20b   : > { %v1438_v7 = vadd.f32 %v1437_v28, %v1304_v20 }
 0x20d   : > { %1439 = vst [vmem:[#allocation4] sm:$0x1] %v1438_v7 }
 0x20e PF: > { %p4070_p11 = scmp.ne.s32.totalorder %s5333_s28, 1 }
 0x20f   : > { %p4071_p10 = scmp.ne.s32.totalorder (!%p4070_p11), %s5329_s27, 0 }
 0x210   : > { %1443 = sbr.rel (%p4070_p11) target bundleno = 968 (0x3c8), region = 80 }
 0x217   : > { %1447 = sbr.rel (%p4071_p10) target bundleno = 562 (0x232), region = 84  ;;  %v1448_v37 = vld [vmem:[#allocation3] sm:$0x1] (!%p4071_p10)  ;;  %v1450_v35 = vld [vmem:[#allocation4] sm:$0x1] (!%p4071_p10)  ;;  %s8152_s3 = sld [smem:[#allocation30_spill]] (!%p4071_p10) }
 0x218   : > { %v1449_v39 = vmul.f32 (!%p4071_p10), 0.0009765625, %v1448_v37  ;;  %v1451_v26 = vmul.f32 (!%p4071_p10), 0.0009765625, %v1450_v35  ;;  %s8153_s17 = sld [smem:[#allocation31_spill]] (!%p4071_p10) }
 0x21a   : > { %v1452_v48 = vmul.f32 (!%p4071_p10), %v1449_v39, %v1449_v39 }
 0x21c   : > { %v1453_v58 = vsub.f32 (!%p4071_p10), %v1451_v26, %v1452_v48 }
 0x21d   : > { %v1456_v57 = vld [vmem:[%s8152_s3] sm:$0x1] (!%p4071_p10) }
 0x21e   : > { %v1454_v40 = vadd.f32 0.01, %v1453_v58  ;;  %v1459_v44 = vld [vmem:[%s8153_s17] sm:$0x1] }
 0x220   : > { %4900 = vrsqrt.f32 %v1454_v40 }
 0x22a   : > { %v4901_v13 = vpop.eup %4900 }
 0x22b   : > { %v1457_v60 = vmul.f32 %v4901_v13, %v1456_v57 }
 0x22d   : > { %1458 = vst [vmem:[#allocation7] sm:$0x1] %v1457_v60  ;;  %v1460_v53 = vmul.f32 %v1457_v60, %v1449_v39 }
 0x22f   : > { %v1461_v51 = vsub.f32 %v1459_v44, %v1460_v53 }
 0x231   : > { %1462 = vst [vmem:[#allocation8] sm:$0x1] %v1461_v51 }
 0x232 PF: > { %s8154_s24 = sld [smem:[#allocation32_spill]]  ;;  %s8156_s4 = sld [smem:[#allocation33_spill]] }
 0x234   : > { %v6153_v43 = vld [vmem:[#allocation7] ss:$0 sm:$0xff] }
 0x238   : > { %s8155_s7 = smov %s8154_s24  ;;  %v1670_v15 = vld [vmem:[%s8154_s24] sm:$0xff]  ;;  %s6150_s24 = scalar_lea.vmem [#allocation2], %s5604_s6 }
 0x239   : > { %v1671_v17 = vld [vmem:[%s8155_s7 + $0x8] sm:$0xff]  ;;  %v1672_v23 = vld [vmem:[%s8155_s7 + $0x10] sm:$0xff]  ;;  %v1673_v14 = vld [vmem:[%s8155_s7 + $0x18] sm:$0xff] }
 0x23a   : > { %v4606_v6 = vpack.c.bf16 %v1671_v17, %v1670_v15  ;;  %v4610_v42 = vpack.c.bf16 %v1673_v14, %v1672_v23  ;;  %v1674_v55 = vld [vmem:[%s8155_s7 + $0x20] sm:$0xff]  ;;  %v1675_v16 = vld [vmem:[%s8155_s7 + $0x28] sm:$0xff]  ;;  %v1676_v0 = vld [vmem:[%s8155_s7 + $0x30] sm:$0xff] }
 0x23b   : > { %v4614_v50 = vpack.c.bf16 %v1675_v16, %v1674_v55  ;;  %v1464_v59 = vld [vmem:[%s6150_s24] sm:$0xff]  ;;  %v1677_v2 = vld [vmem:[%s8155_s7 + $0x38] sm:$0xff]  ;;  %v1679_v19 = vld [vmem:[%s8155_s7 + $0x48] sm:$0xff] }
 0x23c   : > { %4607 = vmatprep.subr.bf16.mxu0 %v4606_v6  ;;  %4750 = vmatprep.subr.bf16.mxu1 %v4606_v6  ;;  %v1535_v45 = vmul.f32 %v6153_v43, %v1464_v59  ;;  %v6162_v24 = vld [vmem:[#allocation8] ss:$0 sm:$0xff]  ;;  %v4618_v36 = vpack.c.bf16 %v1677_v2, %v1676_v0  ;;  %v1485_v31 = vld [vmem:[%s6150_s24 + $0xa8] sm:$0xff]  ;;  %v1680_v38 = vld [vmem:[%s8155_s7 + $0x50] sm:$0xff] }
 0x23d   : > { %4609 = vmatpush3.bf16.msra.mxu0 %v4606_v6  ;;  %4758 = vmatpush3.bf16.msra.mxu1 %v4606_v6  ;;  %v1678_v41 = vld [vmem:[%s8155_s7 + $0x40] sm:$0xff]  ;;  %v1681_v49 = vld [vmem:[%s8155_s7 + $0x58] sm:$0xff]  ;;  %v1486_v21 = vld [vmem:[%s6150_s24 + $0xb0] sm:$0xff]  ;;  %v1556_v9 = vmul.f32 %v6153_v43, %v1485_v31 }
 0x23e   : > { %4611 = vmatprep.subr.bf16.mxu0 %v4610_v42  ;;  %4751 = vmatprep.subr.bf16.mxu1 %v4610_v42  ;;  %v1606_v4 = vadd.f32 %v6162_v24, %v1535_v45  ;;  %v4622_v54 = vpack.c.bf16 %v1679_v19, %v1678_v41  ;;  %v1682_v63 = vld [vmem:[%s8155_s7 + $0x60] sm:$0xff]  ;;  %v1683_v1 = vld [vmem:[%s8155_s7 + $0x68] sm:$0xff]  ;;  %v1487_v56 = vld [vmem:[%s6150_s24 + $0xb8] sm:$0xff]  ;;  %v4626_v11 = vpack.c.bf16 %v1681_v49, %v1680_v38 }
 0x23f   : > { %v1488_v10 = vld [vmem:[%s6150_s24 + $0xc0] sm:$0xff]  ;;  %v1489_v61 = vld [vmem:[%s6150_s24 + $0xc8] sm:$0xff]  ;;  %v1490_v34 = vld [vmem:[%s6150_s24 + $0xd0] sm:$0xff]  ;;  %v1557_v46 = vmul.f32 %v6153_v43, %v1486_v21  ;;  %v6193_v25 = vpack.c.bf16 %v1683_v1, %v1682_v63  ;;  %v6196_v8 = vadd.f32 %v6162_v24, %v1556_v9  ;;  %v1558_v29 = vmul.f32 %v6153_v43, %v1487_v56 }
 0x240   : > { %4478 = vmatprep.mubr.f32.mxu0 %v1606_v4  ;;  %v1491_v22 = vld [vmem:[%s6150_s24 + $0xd8] sm:$0xff]  ;;  %v1492_v12 = vld [vmem:[%s6150_s24 + $0xe0] sm:$0xff]  ;;  %v1493_v47 = vld [vmem:[%s6150_s24 + $0xe8] sm:$0xff]  ;;  %v1559_v27 = vmul.f32 %v6153_v43, %v1488_v10  ;;  %v1560_v5 = vmul.f32 %v6153_v43, %v1489_v61  ;;  %v1561_v30 = vmul.f32 %v6153_v43, %v1490_v34 }
 0x241   : > { %4613 = vmatpush3.bf16.msra.mxu0 %v4610_v42  ;;  %4759 = vmatpush3.bf16.msra.mxu1 %v4610_v42  ;;  %v6201_v18 = vadd.f32 %v6162_v24, %v1557_v46  ;;  %v1494_v32 = vld [vmem:[%s6150_s24 + $0xf0] sm:$0xff]  ;;  %v1495_v3 = vld [vmem:[%s6150_s24 + $0xf8] sm:$0xff]  ;;  %v6209_v52 = vadd.f32 %v6162_v24, %v1558_v29  ;;  %v1562_v33 = vmul.f32 %v6153_v43, %v1491_v22  ;;  %v1496_v62 = vld [vmem:[%s6150_s24 + $0x100] sm:$0xff] }
 0x242   : > { %4615 = vmatprep.subr.bf16.mxu0 %v4614_v50  ;;  %4752 = vmatprep.subr.bf16.mxu1 %v4614_v50  ;;  %v1563_v20 = vmul.f32 %v6153_v43, %v1492_v12  ;;  %v6215_v28 = vadd.f32 %v6162_v24, %v1559_v27  ;;  %v6218_v7 = vadd.f32 %v6162_v24, %v1560_v5  ;;  %v1684_v39 = vld [vmem:[%s8155_s7 + $0x70] sm:$0xff]  ;;  %v1685_v26 = vld [vmem:[%s8155_s7 + $0x78] sm:$0xff]  ;;  %v1465_v13 = vld [vmem:[%s6150_s24 + $0x8] sm:$0xff] }
 0x243   : > { %v6221_v37 = vadd.f32 %v6162_v24, %v1561_v30  ;;  %v1564_v35 = vmul.f32 %v6153_v43, %v1493_v47  ;;  %v6231_v48 = vadd.f32 %v6162_v24, %v1562_v33  ;;  %v1565_v40 = vmul.f32 %v6153_v43, %v1494_v32  ;;  %v1466_v60 = vld [vmem:[%s6150_s24 + $0x10] sm:$0xff]  ;;  %v1467_v51 = vld [vmem:[%s6150_s24 + $0x18] sm:$0xff]  ;;  %v1468_v15 = vld [vmem:[%s6150_s24 + $0x20] sm:$0xff] }
 0x244   : > { %v6234_v58 = vadd.f32 %v6162_v24, %v1563_v20  ;;  %v1566_v57 = vmul.f32 %v6153_v43, %v1495_v3  ;;  %v1567_v53 = vmul.f32 %v6153_v43, %v1496_v62  ;;  %v1469_v17 = vld [vmem:[%s6150_s24 + $0x28] sm:$0xff]  ;;  %v4634_v14 = vpack.c.bf16 %v1685_v26, %v1684_v39  ;;  %v1470_v42 = vld [vmem:[%s6150_s24 + $0x30] sm:$0xff]  ;;  %v1499_v2 = vld [vmem:[%s6150_s24 + $0x118] sm:$0xff] }
 0x245   : > { %4617 = vmatpush3.bf16.msra.mxu0 %v4614_v50  ;;  %4760 = vmatpush3.bf16.msra.mxu1 %v4614_v50  ;;  %v6241_v44 = vadd.f32 %v6162_v24, %v1564_v35  ;;  %v6248_v23 = vadd.f32 %v6162_v24, %v1565_v40  ;;  %v1497_v16 = vld [vmem:[%s6150_s24 + $0x108] sm:$0xff]  ;;  %v1536_v50 = vmul.f32 %v6153_v43, %v1465_v13  ;;  %v1498_v0 = vld [vmem:[%s6150_s24 + $0x110] sm:$0xff]  ;;  %v1471_v41 = vld [vmem:[%s6150_s24 + $0x38] sm:$0xff] }
 0x246   : > { %4619 = vmatprep.subr.bf16.mxu0 %v4618_v36  ;;  %4753 = vmatprep.subr.bf16.mxu1 %v4618_v36  ;;  %v6251_v6 = vadd.f32 %v6162_v24, %v1566_v57  ;;  %v1638_v55 = vadd.f32 %v6162_v24, %v1567_v53  ;;  %v1537_v59 = vmul.f32 %v6153_v43, %v1466_v60  ;;  %v1500_v31 = vld [vmem:[%s6150_s24 + $0x120] sm:$0xff]  ;;  %v1501_v9 = vld [vmem:[%s6150_s24 + $0x128] sm:$0xff]  ;;  %v1502_v10 = vld [vmem:[%s6150_s24 + $0x130] sm:$0xff] }
 0x247   : > { %v1538_v45 = vmul.f32 %v6153_v43, %v1467_v51  ;;  %v1539_v4 = vmul.f32 %v6153_v43, %v1468_v15  ;;  %v1541_v19 = vmul.f32 %v6153_v43, %v1470_v42  ;;  %v1472_v38 = vld [vmem:[%s6150_s24 + $0x40] sm:$0xff]  ;;  %v1569_v49 = vmul.f32 %v6153_v43, %v1498_v0  ;;  %v1515_v61 = vld [vmem:[%s6150_s24 + $0x198] sm:$0xff]  ;;  %v1517_v29 = vld [vmem:[%s6150_s24 + $0x1a8] sm:$0xff] }
 0x248   : > { %4526 = vmatprep.mubr.f32.mxu1 %v1638_v55  ;;  %v1570_v21 = vmul.f32 %v6153_v43, %v1499_v2  ;;  %v1607_v63 = vadd.f32 %v6162_v24, %v1536_v50  ;;  %v1608_v1 = vadd.f32 %v6162_v24, %v1537_v59  ;;  %v6276_v56 = vmul.f32 %v6153_v43, %v1471_v41  ;;  %v1516_v12 = vld [vmem:[%s6150_s24 + $0x1a0] sm:$0xff]  ;;  %v1518_v47 = vld [vmem:[%s6150_s24 + $0x1b0] sm:$0xff]  ;;  %v1519_v32 = vld [vmem:[%s6150_s24 + $0x1b8] sm:$0xff] }
 0x249   : > { %4621 = vmatpush3.bf16.msra.mxu0 %v4618_v36  ;;  %4761 = vmatpush3.bf16.msra.mxu1 %v4618_v36  ;;  %v1540_v36 = vmul.f32 %v6153_v43, %v1469_v17  ;;  %v1609_v34 = vadd.f32 %v6162_v24, %v1538_v45  ;;  %v1571_v22 = vmul.f32 %v6153_v43, %v1500_v31  ;;  %v1521_v57 = vld [vmem:[%s6150_s24 + $0x1c8] sm:$0xff]  ;;  %v1522_v13 = vld [vmem:[%s6150_s24 + $0x1d0] sm:$0xff]  ;;  %v1523_v60 = vld [vmem:[%s6150_s24 + $0x1d8] sm:$0xff] }
 0x24a   : > { %4623 = vmatprep.subr.bf16.mxu0 %v4622_v54  ;;  %4754 = vmatprep.subr.bf16.mxu1 %v4622_v54  ;;  %v6292_v27 = vadd.f32 %v6162_v24, %v1541_v19  ;;  %v6295_v5 = vmul.f32 %v6153_v43, %v1472_v38  ;;  %v1640_v3 = vadd.f32 %v6162_v24, %v1569_v49  ;;  %v1524_v17 = vld [vmem:[%s6150_s24 + $0x1e0] sm:$0xff]  ;;  %v1525_v42 = vld [vmem:[%s6150_s24 + $0x1e8] sm:$0xff]  ;;  %v1526_v55 = vld [vmem:[%s6150_s24 + $0x1f0] sm:$0xff] }
 0x24b   : > { %v6284_v46 = vadd.f32 %v6162_v24, %v1540_v36  ;;  %v1641_v33 = vadd.f32 %v6162_v24, %v1570_v21  ;;  %v1572_v20 = vmul.f32 %v6153_v43, %v1501_v9  ;;  %v1573_v62 = vmul.f32 %v6153_v43, %v1502_v10  ;;  %v1527_v0 = vld [vmem:[%s6150_s24 + $0x1f8] sm:$0xff]  ;;  %v1504_v9 = vld [vmem:[%s6150_s24 + $0x140] sm:$0xff] }
 0x24c   : > { %v1586_v35 = vmul.f32 %v6153_v43, %v1515_v61  ;;  %v1587_v39 = vmul.f32 %v6153_v43, %v1516_v12  ;;  %v1588_v26 = vmul.f32 %v6153_v43, %v1517_v29  ;;  %v1589_v40 = vmul.f32 %v6153_v43, %v1518_v47  ;;  %v1503_v38 = vld [vmem:[%s6150_s24 + $0x138] sm:$0xff]  ;;  %v1474_v12 = vld [vmem:[%s6150_s24 + $0x50] sm:$0xff] }
 0x24d   : > { %4625 = vmatpush3.bf16.msra.mxu0 %v4622_v54  ;;  %4762 = vmatpush3.bf16.msra.mxu1 %v4622_v54  ;;  %v1568_v54 = vmul.f32 %v6153_v43, %v1497_v16  ;;  %v1642_v53 = vadd.f32 %v6162_v24, %v1571_v22  ;;  %v1590_v51 = vmul.f32 %v6153_v43, %v1519_v32 }
 0x24e   : > { %4627 = vmatprep.subr.bf16.mxu0 %v4626_v11  ;;  %4755 = vmatprep.subr.bf16.mxu1 %v4626_v11  ;;  %v6318_v16 = vadd.f32 %v6162_v24, %v1586_v35  ;;  %v6321_v50 = vadd.f32 %v6162_v24, %v1587_v39  ;;  %v6324_v59 = vadd.f32 %v6162_v24, %v1588_v26  ;;  %v1505_v39 = vld [vmem:[%s6150_s24 + $0x148] sm:$0xff] }
 0x24f   : > { %v1639_v30 = vadd.f32 %v6162_v24, %v1568_v54  ;;  %v6331_v2 = vadd.f32 %v6162_v24, %v1590_v51  ;;  %v1593_v36 = vmul.f32 %v6153_v43, %v1522_v13  ;;  %v1594_v41 = vmul.f32 %v6153_v43, %v1523_v60  ;;  %v1507_v60 = vld [vmem:[%s6150_s24 + $0x158] sm:$0xff] }
 0x250   : > { %v1595_v19 = vmul.f32 %v6153_v43, %v1524_v17  ;;  %v1596_v54 = vmul.f32 %v6153_v43, %v1525_v42  ;;  %v1597_v31 = vmul.f32 %v6153_v43, %v1526_v55  ;;  %v1643_v47 = vadd.f32 %v6162_v24, %v1572_v20  ;;  %v1506_v20 = vld [vmem:[%s6150_s24 + $0x150] sm:$0xff] }
 0x251   : > { %4629 = vmatpush3.bf16.msra.mxu0 %v4626_v11  ;;  %4763 = vmatpush3.bf16.msra.mxu1 %v4626_v11  ;;  %v1610_v11 = vadd.f32 %v6162_v24, %v1539_v4  ;;  %v1592_v4 = vmul.f32 %v6153_v43, %v1521_v57  ;;  %v6347_v21 = vadd.f32 %v6162_v24, %v1593_v36  ;;  %v1478_v17 = vld [vmem:[%s6150_s24 + $0x70] sm:$0xff]  ;;  %v1479_v36 = vld [vmem:[%s6150_s24 + $0x78] sm:$0xff] }
 0x252   : > { %4631 = vmatprep.subr.bf16.mxu0 %v6193_v25  ;;  %4756 = vmatprep.subr.bf16.mxu1 %v6193_v25  ;;  %v6353_v10 = vadd.f32 %v6162_v24, %v1594_v41  ;;  %v6356_v61 = vadd.f32 %v6162_v24, %v1595_v19  ;;  %v6362_v22 = vadd.f32 %v6162_v24, %v1597_v31 }
 0x253   : > { %v6344_v49 = vadd.f32 %v6162_v24, %v1592_v4  ;;  %v1575_v35 = vmul.f32 %v6153_v43, %v1504_v9  ;;  %v1577_v13 = vmul.f32 %v6153_v43, %v1506_v20  ;;  %v1550_v9 = vmul.f32 %v6153_v43, %v1479_v36 }
 0x255   : > { %4633 = vmatpush3.bf16.msra.mxu0 %v6193_v25  ;;  %4764 = vmatpush3.bf16.msra.mxu1 %v6193_v25  ;;  %v1520_v25 = vld [vmem:[%s6150_s24 + $0x1c0] sm:$0xff]  ;;  %v1648_v41 = vadd.f32 %v6162_v24, %v1577_v13  ;;  %v1621_v20 = vadd.f32 %v6162_v24, %v1550_v9 }
 0x256   : > { %4635 = vmatprep.subr.bf16.mxu0 %v4634_v14  ;;  %4757 = vmatprep.subr.bf16.mxu1 %v4634_v14  ;;  %v1591_v15 = vmul.f32 %v6153_v43, %v1520_v25  ;;  %v1475_v25 = vld [vmem:[%s6150_s24 + $0x58] sm:$0xff] }
 0x257   : > { %v1546_v26 = vmul.f32 %v6153_v43, %v1475_v25  ;;  %v1511_v25 = vld [vmem:[%s6150_s24 + $0x178] sm:$0xff] }
 0x258   : > { %v6334_v45 = vadd.f32 %v6162_v24, %v1591_v15  ;;  %v1508_v15 = vld [vmem:[%s6150_s24 + $0x160] sm:$0xff] }
 0x259   : > { %4637 = vmatpush3.bf16.msra.mxu0 %v4634_v14  ;;  %4765 = vmatpush3.bf16.msra.mxu1 %v4634_v14  ;;  %v6327_v14 = vadd.f32 %v6162_v24, %v1589_v40  ;;  %v1576_v40 = vmul.f32 %v6153_v43, %v1505_v39  ;;  %v1617_v4 = vadd.f32 %v6162_v24, %v1546_v26  ;;  %v1481_v39 = vld [vmem:[%s6150_s24 + $0x88] sm:$0xff] }
 0x25a   : > { %v1579_v19 = vmul.f32 %v6153_v43, %v1508_v15  ;;  %v1582_v26 = vmul.f32 %v6153_v43, %v1511_v25 }
 0x25b   : > { %v1647_v55 = vadd.f32 %v6162_v24, %v1576_v40  ;;  %v1483_v40 = vld [vmem:[%s6150_s24 + $0x98] sm:$0xff] }
 0x25c   : > { %4479 = vmatmul.mubr.f32.vlgmr.msra.gmra.mrb[0].mxu0 %v1607_v63  ;;  %4527 = vmatmul.mubr.f32.vlgmr.msra.gmra.mrb[0].mxu1 %v1639_v30  ;;  %v1598_v63 = vmul.f32 %v6153_v43, %v1527_v0  ;;  %v1574_v30 = vmul.f32 %v6153_v43, %v1503_v38  ;;  %v1578_v0 = vmul.f32 %v6153_v43, %v1507_v60 }
 0x25d   : > { %4481 = vmatprep.mubr.f32.mxu0 %v1608_v1  ;;  %4529 = vmatprep.mubr.f32.mxu1 %v1640_v3  ;;  %v1473_v1 = vld [vmem:[%s6150_s24 + $0x48] sm:$0xff]  ;;  %v1644_v3 = vadd.f32 %v6162_v24, %v1573_v62  ;;  %v1549_v38 = vmul.f32 %v6153_v43, %v1478_v17  ;;  %v1554_v15 = vmul.f32 %v6153_v43, %v1483_v40 }
 0x25e   : > { %v6366_v29 = vadd.f32 %v6162_v24, %v1598_v63  ;;  %v1544_v32 = vmul.f32 %v6153_v43, %v1473_v1  ;;  %v1645_v62 = vadd.f32 %v6162_v24, %v1574_v30  ;;  %v1510_v63 = vld [vmem:[%s6150_s24 + $0x170] sm:$0xff]  ;;  %v1480_v1 = vld [vmem:[%s6150_s24 + $0x80] sm:$0xff]  ;;  %v1650_v30 = vadd.f32 %v6162_v24, %v1579_v19 }
 0x25f   : > { %v1653_v17 = vadd.f32 %v6162_v24, %v1582_v26 }
 0x260   : > { %4482 = vmatmul.mubr.f32.gmra.mrb[2].mxu0 %v1609_v34  ;;  %v6359_v34 = vadd.f32 %v6162_v24, %v1596_v54  ;;  %4530 = vmatmul.mubr.f32.gmra.mrb[2].mxu1 %v1641_v33  ;;  %v1545_v33 = vmul.f32 %v6153_v43, %v1474_v12  ;;  %v1615_v57 = vadd.f32 %v6162_v24, %v1544_v32  ;;  %v1509_v54 = vld [vmem:[%s6150_s24 + $0x168] sm:$0xff] }
 0x261   : > { %4484 = vmatprep.mubr.f32.mxu0 %v1610_v11  ;;  %v1613_v11 = vadd.f32 %v6162_v24, %v6276_v56  ;;  %4532 = vmatprep.mubr.f32.mxu1 %v1642_v53  ;;  %v1614_v56 = vadd.f32 %v6162_v24, %v6295_v5  ;;  %v1646_v5 = vadd.f32 %v6162_v24, %v1575_v35 }
 0x262   : > { %v1616_v53 = vadd.f32 %v6162_v24, %v1545_v33  ;;  %v1649_v12 = vadd.f32 %v6162_v24, %v1578_v0  ;;  %v1581_v32 = vmul.f32 %v6153_v43, %v1510_v63  ;;  %v1551_v35 = vmul.f32 %v6153_v43, %v1480_v1  ;;  %v1482_v33 = vld [vmem:[%s6150_s24 + $0x90] sm:$0xff] }
 0x263   : > { %v1553_v60 = vmul.f32 %v6153_v43, %v1482_v33 }
 0x264   : > { %4485 = vmatmul.mubr.f32.gmra.mrb[4].mxu0 %v6284_v46  ;;  %v1476_v46 = vld [vmem:[%s6150_s24 + $0x60] sm:$0xff]  ;;  %4533 = vmatmul.mubr.f32.gmra.mrb[4].mxu1 %v1643_v47  ;;  %v1622_v13 = vadd.f32 %v6162_v24, %v1551_v35 }
 0x265   : > { %4487 = vmatprep.mubr.f32.mxu0 %v6292_v27  ;;  %v1477_v27 = vld [vmem:[%s6150_s24 + $0x68] sm:$0xff]  ;;  %4535 = vmatprep.mubr.f32.mxu1 %v1644_v3  ;;  %v1547_v51 = vmul.f32 %v6153_v43, %v1476_v46  ;;  %v1620_v3 = vadd.f32 %v6162_v24, %v1549_v38  ;;  %v1624_v36 = vadd.f32 %v6162_v24, %v1553_v60 }
 0x266   : > { %v1548_v42 = vmul.f32 %v6153_v43, %v1477_v27 }
 0x267   : > { %v1618_v31 = vadd.f32 %v6162_v24, %v1547_v51  ;;  %v1484_v51 = vld [vmem:[%s6150_s24 + $0xa0] sm:$0xff] }
 0x268   : > { %4488 = vmatmul.mubr.f32.gmra.mrb[6].mxu0 %v1613_v11  ;;  %4536 = vmatmul.mubr.f32.gmra.mrb[6].mxu1 %v1645_v62  ;;  %v1580_v11 = vmul.f32 %v6153_v43, %v1509_v54  ;;  %v1619_v47 = vadd.f32 %v6162_v24, %v1548_v42  ;;  %v1552_v62 = vmul.f32 %v6153_v43, %v1481_v39 }
 0x269   : > { %4490 = vmatprep.mubr.f32.mxu0 %v1614_v56  ;;  %4538 = vmatprep.mubr.f32.mxu1 %v1646_v5  ;;  %v1512_v56 = vld [vmem:[%s6150_s24 + $0x180] sm:$0xff]  ;;  %v1513_v5 = vld [vmem:[%s6150_s24 + $0x188] sm:$0xff]  ;;  %v1625_v54 = vadd.f32 %v6162_v24, %v1554_v15 }
 0x26a   : > { %v1651_v46 = vadd.f32 %v6162_v24, %v1580_v11  ;;  %v1583_v27 = vmul.f32 %v6153_v43, %v1512_v56  ;;  %v1584_v42 = vmul.f32 %v6153_v43, %v1513_v5 }
 0x26c   : > { %4491 = vmatmul.mubr.f32.gmra.mrb[8].mxu0 %v1615_v57  ;;  %4539 = vmatmul.mubr.f32.gmra.mrb[8].mxu1 %v1647_v55  ;;  %v1652_v57 = vadd.f32 %v6162_v24, %v1581_v32  ;;  %v1623_v55 = vadd.f32 %v6162_v24, %v1552_v62  ;;  %v1654_v0 = vadd.f32 %v6162_v24, %v1583_v27 }
 0x26d   : > { %4493 = vmatprep.mubr.f32.mxu0 %v1616_v53  ;;  %4541 = vmatprep.mubr.f32.mxu1 %v1648_v41  ;;  %v1514_v53 = vld [vmem:[%s6150_s24 + $0x190] sm:$0xff]  ;;  %v1555_v41 = vmul.f32 %v6153_v43, %v1484_v51  ;;  %v1655_v19 = vadd.f32 %v6162_v24, %v1584_v42 }
 0x26f   : > { %v1626_v38 = vadd.f32 %v6162_v24, %v1555_v41 }
 0x270   : > { %4494 = vmatmul.mubr.f32.gmra.mrb[10].mxu0 %v1617_v4  ;;  %4542 = vmatmul.mubr.f32.gmra.mrb[10].mxu1 %v1649_v12  ;;  %v1585_v4 = vmul.f32 %v6153_v43, %v1514_v53  ;;  %v6471_v43 = vld [vmem:[%s8156_s4] ss:$0 sm:$0xff] }
 0x271   : > { %4496 = vmatprep.mubr.f32.mxu0 %v1618_v31  ;;  %4544 = vmatprep.mubr.f32.mxu1 %v1650_v30 }
 0x272   : > { %v1656_v31 = vadd.f32 %v6162_v24, %v1585_v4 }
 0x274   : > { %4497 = vmatmul.mubr.f32.gmra.mrb[12].mxu0 %v1619_v47  ;;  %4545 = vmatmul.mubr.f32.gmra.mrb[12].mxu1 %v1651_v46 }
 0x275   : > { %4499 = vmatprep.mubr.f32.mxu0 %v1620_v3  ;;  %4547 = vmatprep.mubr.f32.mxu1 %v1652_v57 }
 0x278   : > { %4500 = vmatmul.mubr.f32.gmra.mrb[14].mxu0 %v1621_v20  ;;  %4548 = vmatmul.mubr.f32.gmra.mrb[14].mxu1 %v1653_v17 }
 0x279   : > { %4502 = vmatprep.mubr.f32.mxu0 %v1622_v13  ;;  %4550 = vmatprep.mubr.f32.mxu1 %v1654_v0 }
 0x27c   : > { %4503 = vmatmul.mubr.f32.gmra.mrb[16].mxu0 %v1623_v55  ;;  %4551 = vmatmul.mubr.f32.gmra.mrb[16].mxu1 %v1655_v19 }
 0x27d   : > { %4505 = vmatprep.mubr.f32.mxu0 %v1624_v36  ;;  %4553 = vmatprep.mubr.f32.mxu1 %v1656_v31 }
 0x280   : > { %4506 = vmatmul.mubr.f32.gmra.mrb[18].mxu0 %v1625_v54  ;;  %4554 = vmatmul.mubr.f32.gmra.mrb[18].mxu1 %v6318_v16 }
 0x281   : > { %4508 = vmatprep.mubr.f32.mxu0 %v1626_v38  ;;  %4556 = vmatprep.mubr.f32.mxu1 %v6321_v50 }
 0x284   : > { %4509 = vmatmul.mubr.f32.gmra.mrb[20].mxu0 %v6196_v8  ;;  %4557 = vmatmul.mubr.f32.gmra.mrb[20].mxu1 %v6324_v59 }
 0x285   : > { %4511 = vmatprep.mubr.f32.mxu0 %v6201_v18  ;;  %4559 = vmatprep.mubr.f32.mxu1 %v6327_v14 }
 0x288   : > { %4512 = vmatmul.mubr.f32.gmra.mrb[22].mxu0 %v6209_v52  ;;  %4560 = vmatmul.mubr.f32.gmra.mrb[22].mxu1 %v6331_v2 }
 0x289   : > { %4514 = vmatprep.mubr.f32.mxu0 %v6215_v28  ;;  %4562 = vmatprep.mubr.f32.mxu1 %v6334_v45 }
 0x28c   : > { %4515 = vmatmul.mubr.f32.gmra.mrb[24].mxu0 %v6218_v7  ;;  %4563 = vmatmul.mubr.f32.gmra.mrb[24].mxu1 %v6344_v49 }
 0x28d   : > { %4517 = vmatprep.mubr.f32.mxu0 %v6221_v37  ;;  %4565 = vmatprep.mubr.f32.mxu1 %v6347_v21 }
 0x290   : > { %4518 = vmatmul.mubr.f32.gmra.mrb[26].mxu0 %v6231_v48  ;;  %4566 = vmatmul.mubr.f32.gmra.mrb[26].mxu1 %v6353_v10 }
 0x291   : > { %4520 = vmatprep.mubr.f32.mxu0 %v6234_v58  ;;  %4568 = vmatprep.mubr.f32.mxu1 %v6356_v61 }
 0x294   : > { %4521 = vmatmul.mubr.f32.gmra.mrb[28].mxu0 %v6241_v44  ;;  %4569 = vmatmul.mubr.f32.gmra.mrb[28].mxu1 %v6359_v34 }
 0x295   : > { %4523 = vmatprep.mubr.f32.mxu0 %v6248_v23  ;;  %4571 = vmatprep.mubr.f32.mxu1 %v6362_v22 }
 0x298   : > { %4524 = vmatmul.mubr.f32.gmra.mrb[30].mxu0 %v6251_v6  ;;  %4572 = vmatmul.mubr.f32.gmra.mrb[30].mxu1 %v6366_v29 }
 0x32f   : > { %v4480_v24 = vpop.f32.mrb[0].mxu0  ;;  %v4528_v7 = vpop.f32.mrb[0].mxu1 }
 0x330   : > { %v1765_v8 = vadd.f32 %v4480_v24, %v6471_v43  ;;  %v1759_v18 = vpop.f32.mrb[1].mxu0  ;;  %v1925_v58 = vadd.f32 %v4528_v7, %v6471_v43  ;;  %v1919_v44 = vpop.f32.mrb[1].mxu1 }
 0x331   : > { %v1760_v52 = vadd.f32 %v6471_v43, %v1759_v18  ;;  %v1920_v50 = vadd.f32 %v6471_v43, %v1919_v44 }
 0x332   : > { %vm2079_vm0 = vcmp.ge.f32.partialorder %v1765_v8, 0.0  ;;  %v2143_v28 = vmul.f32 0.01, %v1765_v8  ;;  %vm2111_vm2 = vcmp.ge.f32.partialorder %v1925_v58, 0.0  ;;  %v2175_v22 = vmul.f32 0.01, %v1925_v58 }
 0x333   : > { %vm2078_vm1 = vcmp.ge.f32.partialorder %v1760_v52, 0.0  ;;  %v2142_v37 = vmul.f32 0.01, %v1760_v52  ;;  %v4483_v48 = vpop.f32.mrb[2].mxu0  ;;  %v4531_v10 = vpop.f32.mrb[2].mxu1  ;;  %vm2110_vm5 = vcmp.ge.f32.partialorder %v1920_v50, 0.0 }
 0x334   : > { %v2207_v23 = vsel %vm2079_vm0, %v1765_v8, %v2143_v28  ;;  %v1775_v6 = vadd.f32 %v4483_v48, %v6471_v43  ;;  %v1769_v16 = vpop.f32.mrb[3].mxu0  ;;  %v6483_v12 = vadd.f32 %v4531_v10, %v6471_v43  ;;  %v6485_v11 = vpop.f32.mrb[3].mxu1  ;;  %v6490_v32 = vsel %vm2111_vm2, %v1925_v58, %v2175_v22 }
 0x335   : > { %2271 = vst [vmem:[%s6150_s24 + $0x8] sm:$0xff] %v2207_v23  ;;  %v2408_v59 = vmul.f32 %v2207_v23, %v2207_v23  ;;  %v2206_v14 = vsel %vm2078_vm1, %v1760_v52, %v2142_v37  ;;  %v1770_v2 = vadd.f32 %v6471_v43, %v1769_v16  ;;  %2303 = vst [vmem:[%s6150_s24 + $0x108] sm:$0xff] %v6490_v32  ;;  %v2174_v46 = vmul.f32 0.01, %v1920_v50 }
 0x336   : > { %2270 = vst [vmem:[%s6150_s24] sm:$0xff] %v2206_v14  ;;  %v2335_v45 = vadd.f32 %v2207_v23, %v2206_v14  ;;  %v2407_v49 = vmul.f32 %v2206_v14, %v2206_v14  ;;  %vm2081_vm3 = vcmp.ge.f32.partialorder %v1775_v6, 0.0  ;;  %v2145_v21 = vmul.f32 0.01, %v1775_v6 }
 0x337   : > { %vm2080_vm4 = vcmp.ge.f32.partialorder %v1770_v2, 0.0  ;;  %v2144_v61 = vmul.f32 0.01, %v1770_v2  ;;  %v4486_v34 = vpop.f32.mrb[4].mxu0  ;;  %v6495_v39 = vpop.f32.mrb[4].mxu1  ;;  %v6503_v53 = vsel %vm2110_vm5, %v1920_v50, %v2174_v46  ;;  %vm2113_vm10 = vcmp.ge.f32.partialorder %v6483_v12, 0.0 }
 0x338   : > { %v2471_v29 = vadd.f32 %v2408_v59, %v2407_v49  ;;  %v2209_v63 = vsel %vm2081_vm3, %v1775_v6, %v2145_v21  ;;  %v1785_v1 = vadd.f32 %v4486_v34, %v6471_v43  ;;  %v1779_v9 = vpop.f32.mrb[5].mxu0  ;;  %v6498_v5 = vpop.f32.mrb[5].mxu1  ;;  %2302 = vst [vmem:[%s6150_s24 + $0x100] sm:$0xff] %v6503_v53  ;;  %v2177_v52 = vmul.f32 0.01, %v6483_v12 }
 0x339   : > { %2273 = vst [vmem:[%s6150_s24 + $0x18] sm:$0xff] %v2209_v63  ;;  %v2208_v47 = vsel %vm2080_vm4, %v1770_v2, %v2144_v61  ;;  %v1780_v30 = vadd.f32 %v6471_v43, %v1779_v9  ;;  %v2410_v56 = vmul.f32 %v2209_v63, %v2209_v63  ;;  %v1930_v14 = vadd.f32 %v6471_v43, %v6485_v11 }
 0x33a   : > { %2272 = vst [vmem:[%s6150_s24 + $0x10] sm:$0xff] %v2208_v47  ;;  %v2336_v25 = vadd.f32 %v2335_v45, %v2208_v47  ;;  %v2409_v3 = vmul.f32 %v2208_v47, %v2208_v47  ;;  %vm2083_vm6 = vcmp.ge.f32.partialorder %v1785_v1, 0.0  ;;  %v2147_v35 = vmul.f32 0.01, %v1785_v1 }
 0x33b   : > { %vm2082_vm7 = vcmp.ge.f32.partialorder %v1780_v30, 0.0  ;;  %v2146_v33 = vmul.f32 0.01, %v1780_v30  ;;  %v4489_v20 = vpop.f32.mrb[6].mxu0  ;;  %v6508_v42 = vpop.f32.mrb[6].mxu1  ;;  %v6523_v59 = vsel %vm2113_vm10, %v6483_v12, %v2177_v52  ;;  %vm2112_vm14 = vcmp.ge.f32.partialorder %v1930_v14, 0.0 }
 0x33c   : > { %v2472_v26 = vadd.f32 %v2471_v29, %v2409_v3  ;;  %v2211_v62 = vsel %vm2083_vm6, %v1785_v1, %v2147_v35  ;;  %v2337_v40 = vadd.f32 %v2336_v25, %v2209_v63  ;;  %v1795_v57 = vadd.f32 %v4489_v20, %v6471_v43  ;;  %v1789_v27 = vpop.f32.mrb[7].mxu0  ;;  %v6512_v38 = vpop.f32.mrb[7].mxu1  ;;  %2305 = vst [vmem:[%s6150_s24 + $0x118] sm:$0xff] %v6523_v59 }
 0x33d   : > { %2275 = vst [vmem:[%s6150_s24 + $0x28] sm:$0xff] %v2211_v62  ;;  %v2210_v13 = vsel %vm2082_vm7, %v1780_v30, %v2146_v33  ;;  %v1790_v60 = vadd.f32 %v6471_v43, %v1789_v27  ;;  %v2412_v55 = vmul.f32 %v2211_v62, %v2211_v62  ;;  %v2176_v35 = vmul.f32 0.01, %v1930_v14 }
 0x33e   : > { %2274 = vst [vmem:[%s6150_s24 + $0x20] sm:$0xff] %v2210_v13  ;;  %v2338_v51 = vadd.f32 %v2337_v40, %v2210_v13  ;;  %v2411_v15 = vmul.f32 %v2210_v13, %v2210_v13  ;;  %v2473_v17 = vadd.f32 %v2472_v26, %v2410_v56  ;;  %vm2085_vm8 = vcmp.ge.f32.partialorder %v1795_v57, 0.0 }
 0x33f   : > { %v2149_v0 = vmul.f32 0.01, %v1795_v57  ;;  %vm2084_vm9 = vcmp.ge.f32.partialorder %v1790_v60, 0.0  ;;  %v2148_v4 = vmul.f32 0.01, %v1790_v60  ;;  %v4492_v36 = vpop.f32.mrb[8].mxu0  ;;  %v6545_v13 = vsel %vm2112_vm14, %v1930_v14, %v2176_v35 }
 0x340   : > { %v2474_v41 = vadd.f32 %v2473_v17, %v2411_v15  ;;  %v2339_v19 = vadd.f32 %v2338_v51, %v2211_v62  ;;  %v1805_v54 = vadd.f32 %v4492_v36, %v6471_v43  ;;  %v1799_v31 = vpop.f32.mrb[9].mxu0  ;;  %v6518_v58 = vpop.f32.mrb[8].mxu1  ;;  %2304 = vst [vmem:[%s6150_s24 + $0x110] sm:$0xff] %v6545_v13 }
 0x341   : > { %v2213_v24 = vsel %vm2085_vm8, %v1795_v57, %v2149_v0  ;;  %v2212_v8 = vsel %vm2084_vm9, %v1790_v60, %v2148_v4  ;;  %v1800_v18 = vadd.f32 %v6471_v43, %v1799_v31  ;;  %v6527_v2 = vpop.f32.mrb[9].mxu1 }
 0x342   : > { %2277 = vst [vmem:[%s6150_s24 + $0x38] sm:$0xff] %v2213_v24  ;;  %v2414_v28 = vmul.f32 %v2213_v24, %v2213_v24  ;;  %2276 = vst [vmem:[%s6150_s24 + $0x30] sm:$0xff] %v2212_v8  ;;  %v2340_v7 = vadd.f32 %v2339_v19, %v2212_v8  ;;  %v2413_v37 = vmul.f32 %v2212_v8, %v2212_v8  ;;  %vm2087_vm11 = vcmp.ge.f32.partialorder %v1805_v54, 0.0 }
 0x343   : > { %v2475_v48 = vadd.f32 %v2474_v41, %v2412_v55  ;;  %v2151_v44 = vmul.f32 0.01, %v1805_v54  ;;  %vm2086_vm12 = vcmp.ge.f32.partialorder %v1800_v18, 0.0  ;;  %v2150_v23 = vmul.f32 0.01, %v1800_v18  ;;  %v4495_v50 = vpop.f32.mrb[10].mxu0 }
 0x344   : > { %v2341_v16 = vadd.f32 %v2340_v7, %v2213_v24  ;;  %v1815_v21 = vadd.f32 %v4495_v50, %v6471_v43  ;;  %v1809_v10 = vpop.f32.mrb[11].mxu0  ;;  %v6534_v63 = vpop.f32.mrb[10].mxu1 }
 0x345   : > { %v2476_v6 = vadd.f32 %v2475_v48, %v2413_v37  ;;  %v2215_v45 = vsel %vm2087_vm11, %v1805_v54, %v2151_v44  ;;  %v2214_v49 = vsel %vm2086_vm12, %v1800_v18, %v2150_v23  ;;  %v1810_v9 = vadd.f32 %v6471_v43, %v1809_v10  ;;  %v6537_v11 = vpop.f32.mrb[11].mxu1 }
 0x346   : > { %2279 = vst [vmem:[%s6150_s24 + $0x48] sm:$0xff] %v2215_v45  ;;  %v2416_v61 = vmul.f32 %v2215_v45, %v2215_v45  ;;  %2278 = vst [vmem:[%s6150_s24 + $0x40] sm:$0xff] %v2214_v49  ;;  %v2342_v34 = vadd.f32 %v2341_v16, %v2214_v49  ;;  %v2415_v22 = vmul.f32 %v2214_v49, %v2214_v49  ;;  %vm2089_vm13 = vcmp.ge.f32.partialorder %v1815_v21, 0.0 }
 0x347   : > { %v2477_v29 = vadd.f32 %v2476_v6, %v2414_v28  ;;  %v2153_v1 = vmul.f32 0.01, %v1815_v21  ;;  %v4498_v12 = vpop.f32.mrb[12].mxu0  ;;  %vm2088_vm15 = vcmp.ge.f32.partialorder %v1810_v9, 0.0  ;;  %v2152_v33 = vmul.f32 0.01, %v1810_v9 }
 0x348   : > { %v2343_v30 = vadd.f32 %v2342_v34, %v2215_v45  ;;  %v1825_v25 = vadd.f32 %v4498_v12, %v6471_v43  ;;  %v1819_v3 = vpop.f32.mrb[13].mxu0  ;;  %v6542_v62 = vpop.f32.mrb[12].mxu1  ;;  %v1945_v44 = vadd.f32 %v6495_v39, %v6471_v43  ;;  %v1940_v10 = vadd.f32 %v6471_v43, %v6498_v5 }
 0x349   : > { %v2478_v47 = vadd.f32 %v2477_v29, %v2415_v22  ;;  %v2217_v56 = vsel %vm2089_vm13, %v1815_v21, %v2153_v1  ;;  %v1820_v20 = vadd.f32 %v6471_v43, %v1819_v3  ;;  %v2216_v40 = vsel %vm2088_vm15, %v1810_v9, %v2152_v33  ;;  %v6547_v60 = vpop.f32.mrb[13].mxu1 }
 0x34a   : > { %2281 = vst [vmem:[%s6150_s24 + $0x58] sm:$0xff] %v2217_v56  ;;  %vm2091_vm0 = vcmp.ge.f32.partialorder %v1825_v25, 0.0  ;;  %v2155_v26 = vmul.f32 0.01, %v1825_v25  ;;  %2280 = vst [vmem:[%s6150_s24 + $0x50] sm:$0xff] %v2216_v40  ;;  %v2344_v51 = vadd.f32 %v2343_v30, %v2216_v40  ;;  %v2417_v15 = vmul.f32 %v2216_v40, %v2216_v40 }
 0x34b   : > { %v2479_v46 = vadd.f32 %v2478_v47, %v2416_v61  ;;  %vm2090_vm1 = vcmp.ge.f32.partialorder %v1820_v20, 0.0  ;;  %v2154_v57 = vmul.f32 0.01, %v1820_v20  ;;  %v4501_v27 = vpop.f32.mrb[14].mxu0  ;;  %v2418_v4 = vmul.f32 %v2217_v56, %v2217_v56  ;;  %v6556_v24 = vpop.f32.mrb[14].mxu1 }
 0x34c   : > { %v2219_v17 = vsel %vm2091_vm0, %v1825_v25, %v2155_v26  ;;  %v1835_v55 = vadd.f32 %v4501_v27, %v6471_v43  ;;  %v1829_v0 = vpop.f32.mrb[15].mxu0  ;;  %v2345_v54 = vadd.f32 %v2344_v51, %v2217_v56  ;;  %v6561_v23 = vpop.f32.mrb[15].mxu1  ;;  %vm2115_vm6 = vcmp.ge.f32.partialorder %v1945_v44, 0.0 }
 0x34d   : > { %2283 = vst [vmem:[%s6150_s24 + $0x68] sm:$0xff] %v2219_v17  ;;  %v2218_v36 = vsel %vm2090_vm1, %v1820_v20, %v2154_v57  ;;  %v1830_v41 = vadd.f32 %v6471_v43, %v1829_v0  ;;  %v2480_v19 = vadd.f32 %v2479_v46, %v2417_v15  ;;  %v2420_v6 = vmul.f32 %v2219_v17, %v2219_v17 }
 0x34e   : > { %2282 = vst [vmem:[%s6150_s24 + $0x60] sm:$0xff] %v2218_v36  ;;  %v2419_v31 = vmul.f32 %v2218_v36, %v2218_v36  ;;  %vm2093_vm2 = vcmp.ge.f32.partialorder %v1835_v55, 0.0  ;;  %v2157_v8 = vmul.f32 0.01, %v1835_v55  ;;  %v2346_v28 = vadd.f32 %v2345_v54, %v2218_v36 }
 0x34f   : > { %vm2092_vm3 = vcmp.ge.f32.partialorder %v1830_v41, 0.0  ;;  %v2156_v18 = vmul.f32 0.01, %v1830_v41  ;;  %v4504_v52 = vpop.f32.mrb[16].mxu0  ;;  %v2481_v7 = vadd.f32 %v2480_v19, %v2418_v4  ;;  %v6568_v61 = vpop.f32.mrb[16].mxu1  ;;  %vm2114_vm7 = vcmp.ge.f32.partialorder %v1940_v10, 0.0 }
 0x350   : > { %v1845_v37 = vadd.f32 %v4504_v52, %v6471_v43  ;;  %v1839_v48 = vpop.f32.mrb[17].mxu0  ;;  %v2221_v16 = vsel %vm2093_vm2, %v1835_v55, %v2157_v8  ;;  %v2347_v49 = vadd.f32 %v2346_v28, %v2219_v17  ;;  %v2179_v9 = vmul.f32 0.01, %v1945_v44  ;;  %v6570_v12 = vpop.f32.mrb[17].mxu1 }
 0x351   : > { %v2220_v50 = vsel %vm2092_vm3, %v1830_v41, %v2156_v18  ;;  %v1840_v14 = vadd.f32 %v6471_v43, %v1839_v48  ;;  %v2482_v45 = vadd.f32 %v2481_v7, %v2419_v31  ;;  %2285 = vst [vmem:[%s6150_s24 + $0x78] sm:$0xff] %v2221_v16  ;;  %v2422_v47 = vmul.f32 %v2221_v16, %v2221_v16 }
 0x352   : > { %2284 = vst [vmem:[%s6150_s24 + $0x70] sm:$0xff] %v2220_v50  ;;  %v2421_v21 = vmul.f32 %v2220_v50, %v2220_v50  ;;  %vm2095_vm4 = vcmp.ge.f32.partialorder %v1845_v37, 0.0  ;;  %v2159_v39 = vmul.f32 0.01, %v1845_v37  ;;  %v2348_v22 = vadd.f32 %v2347_v49, %v2220_v50 }
 0x353   : > { %vm2094_vm5 = vcmp.ge.f32.partialorder %v1840_v14, 0.0  ;;  %v2158_v34 = vmul.f32 0.01, %v1840_v14  ;;  %v2483_v29 = vadd.f32 %v2482_v45, %v2420_v6  ;;  %v4507_v1 = vpop.f32.mrb[18].mxu0  ;;  %v6575_v20 = vpop.f32.mrb[18].mxu1  ;;  %v6579_v57 = vsel %vm2115_vm6, %v1945_v44, %v2179_v9 }
 0x354   : > { %v2223_v30 = vsel %vm2095_vm4, %v1845_v37, %v2159_v39  ;;  %v1855_v5 = vadd.f32 %v4507_v1, %v6471_v43  ;;  %v1849_v3 = vpop.f32.mrb[19].mxu0  ;;  %v2349_v56 = vadd.f32 %v2348_v22, %v2221_v16  ;;  %v6581_v27 = vpop.f32.mrb[19].mxu1  ;;  %2307 = vst [vmem:[%s6150_s24 + $0x128] sm:$0xff] %v6579_v57  ;;  %v2178_v0 = vmul.f32 0.01, %v1940_v10 }
 0x355   : > { %v2222_v25 = vsel %vm2094_vm5, %v1840_v14, %v2158_v34  ;;  %v2484_v35 = vadd.f32 %v2483_v29, %v2421_v21  ;;  %2287 = vst [vmem:[%s6150_s24 + $0x88] sm:$0xff] %v2223_v30  ;;  %v1850_v26 = vadd.f32 %v6471_v43, %v1849_v3  ;;  %v2424_v19 = vmul.f32 %v2223_v30, %v2223_v30 }
 0x356   : > { %2286 = vst [vmem:[%s6150_s24 + $0x80] sm:$0xff] %v2222_v25  ;;  %v2423_v33 = vmul.f32 %v2222_v25, %v2222_v25  ;;  %vm2097_vm8 = vcmp.ge.f32.partialorder %v1855_v5, 0.0  ;;  %v2161_v46 = vmul.f32 0.01, %v1855_v5  ;;  %v2350_v51 = vadd.f32 %v2349_v56, %v2222_v25 }
 0x357   : > { %v4510_v40 = vpop.f32.mrb[20].mxu0  ;;  %v2485_v15 = vadd.f32 %v2484_v35, %v2422_v47  ;;  %vm2096_vm9 = vcmp.ge.f32.partialorder %v1850_v26, 0.0  ;;  %v2160_v36 = vmul.f32 0.01, %v1850_v26  ;;  %v6588_v8 = vpop.f32.mrb[20].mxu1  ;;  %v6596_v21 = vsel %vm2114_vm7, %v1940_v10, %v2178_v0 }
 0x358   : > { %v1865_v17 = vadd.f32 %v4510_v40, %v6471_v43  ;;  %v1859_v55 = vpop.f32.mrb[21].mxu0  ;;  %v2225_v4 = vsel %vm2097_vm8, %v1855_v5, %v2161_v46  ;;  %v2351_v31 = vadd.f32 %v2350_v51, %v2223_v30  ;;  %v6592_v50 = vpop.f32.mrb[21].mxu1  ;;  %2306 = vst [vmem:[%s6150_s24 + $0x120] sm:$0xff] %v6596_v21  ;;  %v1955_v5 = vadd.f32 %v6508_v42, %v6471_v43 }
 0x359   : > { %v1860_v41 = vadd.f32 %v6471_v43, %v1859_v55  ;;  %v2486_v54 = vadd.f32 %v2485_v15, %v2423_v33  ;;  %2289 = vst [vmem:[%s6150_s24 + $0x98] sm:$0xff] %v2225_v4  ;;  %v2224_v18 = vsel %vm2096_vm9, %v1850_v26, %v2160_v36  ;;  %v2426_v39 = vmul.f32 %v2225_v4, %v2225_v4 }
 0x35a   : > { %vm2099_vm10 = vcmp.ge.f32.partialorder %v1865_v17, 0.0  ;;  %v2163_v52 = vmul.f32 0.01, %v1865_v17  ;;  %2288 = vst [vmem:[%s6150_s24 + $0x90] sm:$0xff] %v2224_v18  ;;  %v2352_v37 = vadd.f32 %v2351_v31, %v2224_v18  ;;  %v2425_v48 = vmul.f32 %v2224_v18, %v2224_v18 }
 0x35b   : > { %vm2098_vm11 = vcmp.ge.f32.partialorder %v1860_v41, 0.0  ;;  %v2162_v28 = vmul.f32 0.01, %v1860_v41  ;;  %v4513_v7 = vpop.f32.mrb[22].mxu0  ;;  %v2487_v44 = vadd.f32 %v2486_v54, %v2424_v19  ;;  %v6602_v1 = vpop.f32.mrb[22].mxu1  ;;  %vm2117_vm1 = vcmp.ge.f32.partialorder %v1955_v5, 0.0 }
 0x35c   : > { %v1875_v6 = vadd.f32 %v4513_v7, %v6471_v43  ;;  %v1869_v16 = vpop.f32.mrb[23].mxu0  ;;  %v2227_v14 = vsel %vm2099_vm10, %v1865_v17, %v2163_v52  ;;  %v2353_v22 = vadd.f32 %v2352_v37, %v2225_v4  ;;  %v6606_v3 = vpop.f32.mrb[23].mxu1  ;;  %v6613_v17 = vadd.f32 %v6471_v43, %v6512_v38 }
 0x35d   : > { %v2226_v45 = vsel %vm2098_vm11, %v1860_v41, %v2162_v28  ;;  %v1870_v49 = vadd.f32 %v6471_v43, %v1869_v16  ;;  %v2488_v34 = vadd.f32 %v2487_v44, %v2425_v48  ;;  %2291 = vst [vmem:[%s6150_s24 + $0xa8] sm:$0xff] %v2227_v14  ;;  %v2428_v35 = vmul.f32 %v2227_v14, %v2227_v14 }
 0x35e   : > { %2290 = vst [vmem:[%s6150_s24 + $0xa0] sm:$0xff] %v2226_v45  ;;  %v2427_v29 = vmul.f32 %v2226_v45, %v2226_v45  ;;  %vm2101_vm12 = vcmp.ge.f32.partialorder %v1875_v6, 0.0  ;;  %v2165_v9 = vmul.f32 0.01, %v1875_v6  ;;  %v2354_v30 = vadd.f32 %v2353_v22, %v2226_v45 }
 0x35f   : > { %vm2100_vm13 = vcmp.ge.f32.partialorder %v1870_v49, 0.0  ;;  %v2164_v47 = vmul.f32 0.01, %v1870_v49  ;;  %v2489_v25 = vadd.f32 %v2488_v34, %v2426_v39  ;;  %v4516_v10 = vpop.f32.mrb[24].mxu0  ;;  %v6615_v55 = vpop.f32.mrb[24].mxu1  ;;  %vm2116_vm5 = vcmp.ge.f32.partialorder %v6613_v17, 0.0 }
 0x360   : > { %v2229_v56 = vsel %vm2101_vm12, %v1875_v6, %v2165_v9  ;;  %v1885_v46 = vadd.f32 %v4516_v10, %v6471_v43  ;;  %v1879_v26 = vpop.f32.mrb[25].mxu0  ;;  %v2355_v51 = vadd.f32 %v2354_v30, %v2227_v14  ;;  %v6618_v41 = vpop.f32.mrb[25].mxu1  ;;  %v2181_v52 = vmul.f32 0.01, %v1955_v5 }
 0x361   : > { %v2228_v33 = vsel %vm2100_vm13, %v1870_v49, %v2164_v47  ;;  %v2490_v40 = vadd.f32 %v2489_v25, %v2427_v29  ;;  %2293 = vst [vmem:[%s6150_s24 + $0xb8] sm:$0xff] %v2229_v56  ;;  %v2430_v42 = vmul.f32 %v2229_v56, %v2229_v56  ;;  %v1880_v4 = vadd.f32 %v6471_v43, %v1879_v26 }
 0x362   : > { %2292 = vst [vmem:[%s6150_s24 + $0xb0] sm:$0xff] %v2228_v33  ;;  %v2429_v15 = vmul.f32 %v2228_v33, %v2228_v33  ;;  %vm2103_vm14 = vcmp.ge.f32.partialorder %v1885_v46, 0.0  ;;  %v2167_v0 = vmul.f32 0.01, %v1885_v46  ;;  %v2356_v19 = vadd.f32 %v2355_v51, %v2228_v33 }
 0x363   : > { %v4519_v36 = vpop.f32.mrb[26].mxu0  ;;  %v2491_v54 = vadd.f32 %v2490_v40, %v2428_v35  ;;  %vm2102_vm15 = vcmp.ge.f32.partialorder %v1880_v4, 0.0  ;;  %v2166_v28 = vmul.f32 0.01, %v1880_v4  ;;  %v6623_v44 = vpop.f32.mrb[26].mxu1  ;;  %v6631_v10 = vsel %vm2117_vm1, %v1955_v5, %v2181_v52 }
 0x364   : > { %v1895_v31 = vadd.f32 %v4519_v36, %v6471_v43  ;;  %v1889_v18 = vpop.f32.mrb[27].mxu0  ;;  %v2231_v38 = vsel %vm2103_vm14, %v1885_v46, %v2167_v0  ;;  %v2357_v48 = vadd.f32 %v2356_v19, %v2229_v56  ;;  %v6627_v9 = vpop.f32.mrb[27].mxu1  ;;  %2309 = vst [vmem:[%s6150_s24 + $0x138] sm:$0xff] %v6631_v10 }
 0x365   : > { %v1890_v7 = vadd.f32 %v6471_v43, %v1889_v18  ;;  %v2492_v37 = vadd.f32 %v2491_v54, %v2429_v15  ;;  %2295 = vst [vmem:[%s6150_s24 + $0xc8] sm:$0xff] %v2231_v38  ;;  %v2230_v6 = vsel %vm2102_vm15, %v1880_v4, %v2166_v28  ;;  %v2432_v35 = vmul.f32 %v2231_v38, %v2231_v38 }
 0x366   : > { %vm2105_vm0 = vcmp.ge.f32.partialorder %v1895_v31, 0.0  ;;  %v2169_v16 = vmul.f32 0.01, %v1895_v31  ;;  %2294 = vst [vmem:[%s6150_s24 + $0xc0] sm:$0xff] %v2230_v6  ;;  %v2358_v49 = vadd.f32 %v2357_v48, %v2230_v6  ;;  %v2431_v39 = vmul.f32 %v2230_v6, %v2230_v6 }
 0x367   : > { %vm2104_vm2 = vcmp.ge.f32.partialorder %v1890_v7, 0.0  ;;  %v2168_v14 = vmul.f32 0.01, %v1890_v7  ;;  %v4522_v45 = vpop.f32.mrb[28].mxu0  ;;  %v2493_v34 = vadd.f32 %v2492_v37, %v2430_v42  ;;  %v6637_v26 = vpop.f32.mrb[28].mxu1 }
 0x368   : > { %v1905_v22 = vadd.f32 %v4522_v45, %v6471_v43  ;;  %v1899_v29 = vpop.f32.mrb[29].mxu0  ;;  %v2233_v47 = vsel %vm2105_vm0, %v1895_v31, %v2169_v16  ;;  %v2359_v33 = vadd.f32 %v2358_v49, %v2231_v38  ;;  %v6640_v0 = vpop.f32.mrb[29].mxu1  ;;  %v2180_v31 = vmul.f32 0.01, %v6613_v17 }
 0x369   : > { %v2232_v30 = vsel %vm2104_vm2, %v1890_v7, %v2168_v14  ;;  %v1900_v25 = vadd.f32 %v6471_v43, %v1899_v29  ;;  %v2494_v56 = vadd.f32 %v2493_v34, %v2431_v39  ;;  %2297 = vst [vmem:[%s6150_s24 + $0xd8] sm:$0xff] %v2233_v47  ;;  %v2434_v18 = vmul.f32 %v2233_v47, %v2233_v47 }
 0x36a   : > { %2296 = vst [vmem:[%s6150_s24 + $0xd0] sm:$0xff] %v2232_v30  ;;  %v2433_v46 = vmul.f32 %v2232_v30, %v2232_v30  ;;  %vm2107_vm3 = vcmp.ge.f32.partialorder %v1905_v22, 0.0  ;;  %v2171_v40 = vmul.f32 0.01, %v1905_v22  ;;  %v2360_v15 = vadd.f32 %v2359_v33, %v2232_v30 }
 0x36b   : > { %vm2106_vm4 = vcmp.ge.f32.partialorder %v1900_v25, 0.0  ;;  %v2170_v51 = vmul.f32 0.01, %v1900_v25  ;;  %v2495_v42 = vadd.f32 %v2494_v56, %v2432_v35  ;;  %v4525_v5 = vpop.f32.mrb[30].mxu0  ;;  %v6646_v7 = vpop.f32.mrb[30].mxu1  ;;  %v6652_v6 = vsel %vm2116_vm5, %v6613_v17, %v2180_v31 }
 0x36c   : > { %v2235_v4 = vsel %vm2107_vm3, %v1905_v22, %v2171_v40  ;;  %v1915_v19 = vadd.f32 %v4525_v5, %v6471_v43  ;;  %v1909_v54 = vpop.f32.mrb[31].mxu0  ;;  %v2361_v38 = vadd.f32 %v2360_v15, %v2233_v47  ;;  %v6654_v16 = vpop.f32.mrb[31].mxu1  ;;  %2308 = vst [vmem:[%s6150_s24 + $0x130] sm:$0xff] %v6652_v6  ;;  %v1965_v49 = vadd.f32 %v6518_v58, %v6471_v43 }
 0x36d   : > { %v2234_v36 = vsel %vm2106_vm4, %v1900_v25, %v2170_v51  ;;  %v2496_v52 = vadd.f32 %v2495_v42, %v2433_v46  ;;  %2299 = vst [vmem:[%s6150_s24 + $0xe8] sm:$0xff] %v2235_v4  ;;  %v1910_v48 = vadd.f32 %v6471_v43, %v1909_v54  ;;  %v1960_v22 = vadd.f32 %v6471_v43, %v6527_v2 }
 0x36e   : > { %2298 = vst [vmem:[%s6150_s24 + $0xe0] sm:$0xff] %v2234_v36  ;;  %v2435_v28 = vmul.f32 %v2234_v36, %v2234_v36  ;;  %vm2109_vm6 = vcmp.ge.f32.partialorder %v1915_v19, 0.0  ;;  %v2173_v37 = vmul.f32 0.01, %v1915_v19  ;;  %v2362_v14 = vadd.f32 %v2361_v38, %v2234_v36 }
 0x36f   : > { %v2497_v45 = vadd.f32 %v2496_v52, %v2434_v18  ;;  %vm2108_vm7 = vcmp.ge.f32.partialorder %v1910_v48, 0.0  ;;  %v2172_v34 = vmul.f32 0.01, %v1910_v48  ;;  %v2436_v29 = vmul.f32 %v2235_v4, %v2235_v4 }
 0x370   : > { %v2237_v39 = vsel %vm2109_vm6, %v1915_v19, %v2173_v37  ;;  %v2363_v17 = vadd.f32 %v2362_v14, %v2235_v4  ;;  %vm2119_vm8 = vcmp.ge.f32.partialorder %v1965_v49, 0.0  ;;  %v2183_v25 = vmul.f32 0.01, %v1965_v49 }
 0x371   : > { %v2498_v47 = vadd.f32 %v2497_v45, %v2435_v28  ;;  %2301 = vst [vmem:[%s6150_s24 + $0xf8] sm:$0xff] %v2237_v39  ;;  %v2236_v30 = vsel %vm2108_vm7, %v1910_v48, %v2172_v34  ;;  %vm2118_vm9 = vcmp.ge.f32.partialorder %v1960_v22, 0.0  ;;  %v2182_v35 = vmul.f32 0.01, %v1960_v22 }
 0x372   : > { %2300 = vst [vmem:[%s6150_s24 + $0xf0] sm:$0xff] %v2236_v30  ;;  %v2364_v56 = vadd.f32 %v2363_v17, %v2236_v30  ;;  %v2437_v58 = vmul.f32 %v2236_v30, %v2236_v30  ;;  %v1975_v46 = vadd.f32 %v6534_v63, %v6471_v43  ;;  %v6666_v40 = vsel %vm2119_vm8, %v1965_v49, %v2183_v25 }
 0x373   : > { %v2499_v33 = vadd.f32 %v2498_v47, %v2436_v29  ;;  %v6668_v2 = vsel %vm2118_vm9, %v1960_v22, %v2182_v35  ;;  %v1970_v51 = vadd.f32 %v6471_v43, %v6537_v11  ;;  %v1985_v15 = vadd.f32 %v6542_v62, %v6471_v43  ;;  %2311 = vst [vmem:[%s6150_s24 + $0x148] sm:$0xff] %v6666_v40 }
 0x374   : > { %v2438_v42 = vmul.f32 %v2237_v39, %v2237_v39  ;;  %v2365_v4 = vadd.f32 %v2364_v56, %v2237_v39  ;;  %v2439_v36 = vmul.f32 %v6503_v53, %v6503_v53  ;;  %2310 = vst [vmem:[%s6150_s24 + $0x140] sm:$0xff] %v6668_v2  ;;  %vm2121_vm10 = vcmp.ge.f32.partialorder %v1975_v46, 0.0 }
 0x375   : > { %v2500_v5 = vadd.f32 %v2499_v33, %v2437_v58  ;;  %v2185_v63 = vmul.f32 0.01, %v1975_v46  ;;  %vm2120_vm11 = vcmp.ge.f32.partialorder %v1970_v51, 0.0  ;;  %v2184_v19 = vmul.f32 0.01, %v1970_v51 }
 0x376   : > { %v2366_v11 = vadd.f32 %v2365_v4, %v6503_v53  ;;  %vm2123_vm12 = vcmp.ge.f32.partialorder %v1985_v15, 0.0  ;;  %v2187_v62 = vmul.f32 0.01, %v1985_v15  ;;  %v1980_v52 = vadd.f32 %v6471_v43, %v6547_v60 }
 0x377   : > { %v2501_v54 = vadd.f32 %v2500_v5, %v2438_v42  ;;  %v6681_v31 = vsel %vm2121_vm10, %v1975_v46, %v2185_v63  ;;  %v6683_v18 = vsel %vm2120_vm11, %v1970_v51, %v2184_v19  ;;  %v1995_v38 = vadd.f32 %v6556_v24, %v6471_v43 }
 0x378   : > { %v2440_v28 = vmul.f32 %v6490_v32, %v6490_v32  ;;  %v2367_v53 = vadd.f32 %v2366_v11, %v6490_v32  ;;  %2313 = vst [vmem:[%s6150_s24 + $0x158] sm:$0xff] %v6681_v31  ;;  %2312 = vst [vmem:[%s6150_s24 + $0x150] sm:$0xff] %v6683_v18  ;;  %v6696_v48 = vsel %vm2123_vm12, %v1985_v15, %v2187_v62  ;;  %vm2122_vm13 = vcmp.ge.f32.partialorder %v1980_v52, 0.0 }
 0x379   : > { %v2502_v37 = vadd.f32 %v2501_v54, %v2439_v36  ;;  %v2186_v14 = vmul.f32 0.01, %v1980_v52  ;;  %vm2125_vm14 = vcmp.ge.f32.partialorder %v1995_v38, 0.0  ;;  %v2441_v24 = vmul.f32 %v6545_v13, %v6545_v13  ;;  %2315 = vst [vmem:[%s6150_s24 + $0x168] sm:$0xff] %v6696_v48 }
 0x37a   : > { %v2368_v60 = vadd.f32 %v2367_v53, %v6545_v13  ;;  %v2189_v32 = vmul.f32 0.01, %v1995_v38  ;;  %v1990_v39 = vadd.f32 %v6471_v43, %v6561_v23  ;;  %v2005_v34 = vadd.f32 %v6568_v61, %v6471_v43 }
 0x37b   : > { %v2503_v45 = vadd.f32 %v2502_v37, %v2440_v28  ;;  %v6703_v49 = vsel %vm2122_vm13, %v1980_v52, %v2186_v14  ;;  %v2000_v22 = vadd.f32 %v6471_v43, %v6570_v12  ;;  %v2442_v29 = vmul.f32 %v6523_v59, %v6523_v59 }
 0x37c   : > { %v2369_v13 = vadd.f32 %v2368_v60, %v6523_v59  ;;  %2314 = vst [vmem:[%s6150_s24 + $0x160] sm:$0xff] %v6703_v49  ;;  %v6716_v17 = vsel %vm2125_vm14, %v1995_v38, %v2189_v32  ;;  %v2443_v30 = vmul.f32 %v6596_v21, %v6596_v21  ;;  %vm2124_vm15 = vcmp.ge.f32.partialorder %v1990_v39, 0.0 }
 0x37d   : > { %v2504_v47 = vadd.f32 %v2503_v45, %v2441_v24  ;;  %2317 = vst [vmem:[%s6150_s24 + $0x178] sm:$0xff] %v6716_v17  ;;  %v2188_v23 = vmul.f32 0.01, %v1990_v39  ;;  %vm2127_vm0 = vcmp.ge.f32.partialorder %v2005_v34, 0.0  ;;  %v2191_v25 = vmul.f32 0.01, %v2005_v34 }
 0x37e   : > { %v2370_v61 = vadd.f32 %v2369_v13, %v6596_v21  ;;  %vm2126_vm1 = vcmp.ge.f32.partialorder %v2000_v22, 0.0  ;;  %v2190_v35 = vmul.f32 0.01, %v2000_v22  ;;  %v2015_v56 = vadd.f32 %v6575_v20, %v6471_v43 }
 0x37f   : > { %v2505_v12 = vadd.f32 %v2504_v47, %v2442_v29  ;;  %v6723_v59 = vsel %vm2124_vm15, %v1990_v39, %v2188_v23  ;;  %v2010_v58 = vadd.f32 %v6471_v43, %v6581_v27  ;;  %v2444_v33 = vmul.f32 %v6579_v57, %v6579_v57 }
 0x380   : > { %v2371_v51 = vadd.f32 %v2370_v61, %v6579_v57  ;;  %2316 = vst [vmem:[%s6150_s24 + $0x170] sm:$0xff] %v6723_v59  ;;  %v6734_v21 = vsel %vm2127_vm0, %v2005_v34, %v2191_v25  ;;  %v6738_v15 = vsel %vm2126_vm1, %v2000_v22, %v2190_v35  ;;  %vm2129_vm2 = vcmp.ge.f32.partialorder %v2015_v56, 0.0 }
 0x381   : > { %v2506_v46 = vadd.f32 %v2505_v12, %v2443_v30  ;;  %2319 = vst [vmem:[%s6150_s24 + $0x188] sm:$0xff] %v6734_v21  ;;  %v2193_v20 = vmul.f32 0.01, %v2015_v56  ;;  %v2445_v27 = vmul.f32 %v6652_v6, %v6652_v6  ;;  %2318 = vst [vmem:[%s6150_s24 + $0x180] sm:$0xff] %v6738_v15  ;;  %vm2128_vm3 = vcmp.ge.f32.partialorder %v2010_v58, 0.0 }
 0x382   : > { %v2372_v42 = vadd.f32 %v2371_v51, %v6652_v6  ;;  %v2192_v4 = vmul.f32 0.01, %v2010_v58  ;;  %v2025_v36 = vadd.f32 %v6588_v8, %v6471_v43  ;;  %v2020_v63 = vadd.f32 %v6471_v43, %v6592_v50 }
 0x383   : > { %v2507_v5 = vadd.f32 %v2506_v46, %v2444_v33  ;;  %v6745_v57 = vsel %vm2129_vm2, %v2015_v56, %v2193_v20  ;;  %v2446_v19 = vmul.f32 %v6631_v10, %v6631_v10  ;;  %v2035_v54 = vadd.f32 %v6602_v1, %v6471_v43 }
 0x384   : > { %v2373_v6 = vadd.f32 %v2372_v42, %v6631_v10  ;;  %2321 = vst [vmem:[%s6150_s24 + $0x198] sm:$0xff] %v6745_v57  ;;  %v6758_v62 = vsel %vm2128_vm3, %v2010_v58, %v2192_v4  ;;  %vm2131_vm4 = vcmp.ge.f32.partialorder %v2025_v36, 0.0  ;;  %v2195_v52 = vmul.f32 0.01, %v2025_v36 }
 0x385   : > { %v2508_v11 = vadd.f32 %v2507_v5, %v2445_v27  ;;  %vm2130_vm5 = vcmp.ge.f32.partialorder %v2020_v63, 0.0  ;;  %v2447_v50 = vmul.f32 %v6668_v2, %v6668_v2  ;;  %2320 = vst [vmem:[%s6150_s24 + $0x190] sm:$0xff] %v6758_v62  ;;  %v2194_v10 = vmul.f32 0.01, %v2020_v63 }
 0x386   : > { %v2374_v8 = vadd.f32 %v2373_v6, %v6668_v2  ;;  %v6765_v28 = vsel %vm2131_vm4, %v2025_v36, %v2195_v52  ;;  %vm2133_vm6 = vcmp.ge.f32.partialorder %v2035_v54, 0.0  ;;  %v2197_v1 = vmul.f32 0.01, %v2035_v54 }
 0x387   : > { %v2509_v38 = vadd.f32 %v2508_v11, %v2446_v19  ;;  %v2030_v37 = vadd.f32 %v6471_v43, %v6606_v3  ;;  %v2448_v53 = vmul.f32 %v6666_v40, %v6666_v40  ;;  %2323 = vst [vmem:[%s6150_s24 + $0x1a8] sm:$0xff] %v6765_v28  ;;  %v6774_v2 = vsel %vm2130_vm5, %v2020_v63, %v2194_v10 }
 0x388   : > { %v2375_v60 = vadd.f32 %v2374_v8, %v6666_v40  ;;  %v2450_v24 = vmul.f32 %v6681_v31, %v6681_v31  ;;  %2322 = vst [vmem:[%s6150_s24 + $0x1a0] sm:$0xff] %v6774_v2  ;;  %v6780_v45 = vsel %vm2133_vm6, %v2035_v54, %v2197_v1  ;;  %v2449_v39 = vmul.f32 %v6683_v18, %v6683_v18 }
 0x389   : > { %v2510_v14 = vadd.f32 %v2509_v38, %v2447_v50  ;;  %vm2132_vm7 = vcmp.ge.f32.partialorder %v2030_v37, 0.0  ;;  %v2196_v3 = vmul.f32 0.01, %v2030_v37  ;;  %2325 = vst [vmem:[%s6150_s24 + $0x1b8] sm:$0xff] %v6780_v45  ;;  %v2045_v34 = vadd.f32 %v6615_v55, %v6471_v43 }
 0x38a   : > { %v2376_v32 = vadd.f32 %v2375_v60, %v6683_v18  ;;  %v2040_v29 = vadd.f32 %v6471_v43, %v6618_v41  ;;  %v2055_v47 = vadd.f32 %v6623_v44, %v6471_v43  ;;  %v2050_v13 = vadd.f32 %v6471_v43, %v6627_v9 }
 0x38b   : > { %v2511_v40 = vadd.f32 %v2510_v14, %v2448_v53  ;;  %v6789_v22 = vsel %vm2132_vm7, %v2030_v37, %v2196_v3  ;;  %v2451_v23 = vmul.f32 %v6703_v49, %v6703_v49  ;;  %vm2135_vm8 = vcmp.ge.f32.partialorder %v2045_v34, 0.0 }
 0x38c   : > { %v2377_v18 = vadd.f32 %v2376_v32, %v6681_v31  ;;  %2324 = vst [vmem:[%s6150_s24 + $0x1b0] sm:$0xff] %v6789_v22  ;;  %v2199_v55 = vmul.f32 0.01, %v2045_v34  ;;  %vm2134_vm9 = vcmp.ge.f32.partialorder %v2040_v29, 0.0  ;;  %v2198_v41 = vmul.f32 0.01, %v2040_v29 }
 0x38d   : > { %v2512_v30 = vadd.f32 %v2511_v40, %v2449_v39  ;;  %vm2137_vm10 = vcmp.ge.f32.partialorder %v2055_v47, 0.0  ;;  %v2201_v12 = vmul.f32 0.01, %v2055_v47  ;;  %vm2136_vm11 = vcmp.ge.f32.partialorder %v2050_v13, 0.0 }
 0x38e   : > { %v2378_v44 = vadd.f32 %v2377_v18, %v6703_v49  ;;  %v6803_v9 = vsel %vm2135_vm8, %v2045_v34, %v2199_v55  ;;  %v2262_v31 = vsel %vm2134_vm9, %v2040_v29, %v2198_v41  ;;  %v2200_v25 = vmul.f32 0.01, %v2050_v13 }
 0x38f   : > { %v2513_v61 = vadd.f32 %v2512_v30, %v2450_v24  ;;  %v2065_v35 = vadd.f32 %v6637_v26, %v6471_v43  ;;  %v2452_v56 = vmul.f32 %v6696_v48, %v6696_v48  ;;  %2327 = vst [vmem:[%s6150_s24 + $0x1c8] sm:$0xff] %v6803_v9  ;;  %2326 = vst [vmem:[%s6150_s24 + $0x1c0] sm:$0xff] %v2262_v31 }
 0x390   : > { %v2379_v33 = vadd.f32 %v2378_v44, %v6696_v48  ;;  %v6813_v49 = vsel %vm2137_vm10, %v2055_v47, %v2201_v12  ;;  %v2264_v46 = vsel %vm2136_vm11, %v2050_v13, %v2200_v25  ;;  %v2453_v26 = vmul.f32 %v6723_v59, %v6723_v59 }
 0x391   : > { %v2514_v58 = vadd.f32 %v2513_v61, %v2451_v23  ;;  %vm2139_vm12 = vcmp.ge.f32.partialorder %v2065_v35, 0.0  ;;  %v2203_v51 = vmul.f32 0.01, %v2065_v35  ;;  %2329 = vst [vmem:[%s6150_s24 + $0x1d8] sm:$0xff] %v6813_v49  ;;  %2328 = vst [vmem:[%s6150_s24 + $0x1d0] sm:$0xff] %v2264_v46  ;;  %v2060_v48 = vadd.f32 %v6471_v43, %v6640_v0 }
 0x392   : > { %v2380_v20 = vadd.f32 %v2379_v33, %v6723_v59  ;;  %v2075_v5 = vadd.f32 %v6646_v7, %v6471_v43  ;;  %v2070_v4 = vadd.f32 %v6471_v43, %v6654_v16  ;;  %v2454_v36 = vmul.f32 %v6716_v17, %v6716_v17 }
 0x393   : > { %v2515_v42 = vadd.f32 %v2514_v58, %v2452_v56  ;;  %v2267_v27 = vsel %vm2139_vm12, %v2065_v35, %v2203_v51  ;;  %v2455_v19 = vmul.f32 %v6738_v15, %v6738_v15  ;;  %vm2138_vm13 = vcmp.ge.f32.partialorder %v2060_v48, 0.0 }
 0x394   : > { %v2381_v59 = vadd.f32 %v2380_v20, %v6716_v17  ;;  %2331 = vst [vmem:[%s6150_s24 + $0x1e8] sm:$0xff] %v2267_v27  ;;  %v2202_v0 = vmul.f32 0.01, %v2060_v48  ;;  %vm2141_vm14 = vcmp.ge.f32.partialorder %v2075_v5, 0.0  ;;  %v2205_v11 = vmul.f32 0.01, %v2075_v5 }
 0x395   : > { %v2516_v63 = vadd.f32 %v2515_v42, %v2453_v26  ;;  %vm2140_vm15 = vcmp.ge.f32.partialorder %v2070_v4, 0.0  ;;  %v2204_v16 = vmul.f32 0.01, %v2070_v4  ;;  %v2456_v17 = vmul.f32 %v6734_v21, %v6734_v21 }
 0x396   : > { %v2382_v7 = vadd.f32 %v2381_v59, %v6738_v15  ;;  %v2266_v6 = vsel %vm2138_vm13, %v2060_v48, %v2202_v0  ;;  %v2269_v54 = vsel %vm2141_vm14, %v2075_v5, %v2205_v11  ;;  %v2457_v10 = vmul.f32 %v6758_v62, %v6758_v62  ;;  %v2334_v0 = vld [vmem:[#allocation5] sm:$0x1] }
 0x397   : > { %v2517_v43 = vadd.f32 %v2516_v63, %v2454_v36  ;;  %2330 = vst [vmem:[%s6150_s24 + $0x1e0] sm:$0xff] %v2266_v6  ;;  %2333 = vst [vmem:[%s6150_s24 + $0x1f8] sm:$0xff] %v2269_v54  ;;  %v2268_v50 = vsel %vm2140_vm15, %v2070_v4, %v2204_v16  ;;  %v2458_v1 = vmul.f32 %v6745_v57, %v6745_v57 }
 0x398   : > { %v2383_v8 = vadd.f32 %v2382_v7, %v6734_v21  ;;  %2332 = vst [vmem:[%s6150_s24 + $0x1f0] sm:$0xff] %v2268_v50  ;;  %v2459_v21 = vmul.f32 %v6774_v2, %v6774_v2  ;;  %v2460_v24 = vmul.f32 %v6765_v28, %v6765_v28  ;;  %v2461_v39 = vmul.f32 %v6789_v22, %v6789_v22 }
 0x399   : > { %v2518_v52 = vadd.f32 %v2517_v43, %v2455_v19  ;;  %v2463_v47 = vmul.f32 %v2262_v31, %v2262_v31  ;;  %v2464_v30 = vmul.f32 %v6803_v9, %v6803_v9  ;;  %v2465_v55 = vmul.f32 %v2264_v46, %v2264_v46 }
 0x39a   : > { %v2384_v38 = vadd.f32 %v2383_v8, %v6758_v62  ;;  %v2469_v33 = vmul.f32 %v2268_v50, %v2268_v50  ;;  %v2470_v20 = vmul.f32 %v2269_v54, %v2269_v54 }
 0x39b   : > { %v2519_v15 = vadd.f32 %v2518_v52, %v2456_v17 }
 0x39c   : > { %v2385_v53 = vadd.f32 %v2384_v38, %v6745_v57  ;;  %v2462_v57 = vmul.f32 %v6780_v45, %v6780_v45 }
 0x39d   : > { %v2520_v37 = vadd.f32 %v2519_v15, %v2457_v10 }
 0x39e   : > { %v2386_v14 = vadd.f32 %v2385_v53, %v6774_v2 }
 0x39f   : > { %v2521_v60 = vadd.f32 %v2520_v37, %v2458_v1 }
 0x3a0   : > { %v2387_v62 = vadd.f32 %v2386_v14, %v6765_v28 }
 0x3a1   : > { %v2522_v3 = vadd.f32 %v2521_v60, %v2459_v21 }
 0x3a2   : > { %v2388_v32 = vadd.f32 %v2387_v62, %v6789_v22  ;;  %v2466_v22 = vmul.f32 %v6813_v49, %v6813_v49 }
 0x3a3   : > { %v2523_v40 = vadd.f32 %v2522_v3, %v2460_v24 }
 0x3a4   : > { %v2389_v29 = vadd.f32 %v2388_v32, %v6780_v45  ;;  %v2467_v45 = vmul.f32 %v2266_v6, %v2266_v6 }
 0x3a5   : > { %v2524_v34 = vadd.f32 %v2523_v40, %v2461_v39 }
 0x3a6   : > { %v2390_v2 = vadd.f32 %v2389_v29, %v2262_v31  ;;  %v2468_v31 = vmul.f32 %v2267_v27, %v2267_v27 }
 0x3a7   : > { %v2525_v13 = vadd.f32 %v2524_v34, %v2462_v57 }
 0x3a8   : > { %v2391_v28 = vadd.f32 %v2390_v2, %v6803_v9 }
 0x3a9   : > { %v2526_v18 = vadd.f32 %v2525_v13, %v2463_v47 }
 0x3aa   : > { %v2392_v23 = vadd.f32 %v2391_v28, %v2264_v46 }
 0x3ab   : > { %v2527_v41 = vadd.f32 %v2526_v18, %v2464_v30 }
 0x3ac   : > { %v2393_v61 = vadd.f32 %v2392_v23, %v6813_v49 }
 0x3ad   : > { %v2528_v44 = vadd.f32 %v2527_v41, %v2465_v55 }
 0x3ae   : > { %v2394_v12 = vadd.f32 %v2393_v61, %v2266_v6 }
 0x3af   : > { %v2529_v25 = vadd.f32 %v2528_v44, %v2466_v22 }
 0x3b0   : > { %v2395_v56 = vadd.f32 %v2394_v12, %v2267_v27  ;;  %v2406_v27 = vld [vmem:[#allocation6] sm:$0x1] }
 0x3b1   : > { %v2530_v35 = vadd.f32 %v2529_v25, %v2467_v45 }
 0x3b2   : > { %v2396_v58 = vadd.f32 %v2395_v56, %v2268_v50 }
 0x3b3   : > { %v2531_v51 = vadd.f32 %v2530_v35, %v2468_v31 }
 0x3b4   : > { %v2397_v9 = vadd.f32 %v2396_v58, %v2269_v54 }
 0x3b5   : > { %v2532_v26 = vadd.f32 %v2531_v51, %v2469_v33 }
 0x3b6   : > { %v2398_v46 = vrot.slane %v2397_v9, 4 }
 0x3b7   : > { %v2533_v42 = vadd.f32 %v2532_v26, %v2470_v20 }
 0x3b8   : > { %v2399_v48 = vadd.f32 %v2398_v46, %v2397_v9 }
 0x3b9   : > { %v2534_v5 = vrot.slane %v2533_v42, 4 }
 0x3ba   : > { %v2400_v4 = vrot.slane %v2399_v48, 2 }
 0x3bb   : > { %v2535_v36 = vadd.f32 %v2534_v5, %v2533_v42 }
 0x3bc   : > { %v2401_v63 = vadd.f32 %v2400_v4, %v2399_v48 }
 0x3bd   : > { %v2536_v49 = vrot.slane %v2535_v36, 2 }
 0x3be   : > { %v2402_v59 = vrot.slane %v2401_v63, 1 }
 0x3bf   : > { %v2537_v19 = vadd.f32 %v2536_v49, %v2535_v36 }
 0x3c0   : > { %v2403_v11 = vadd.f32 %v2402_v59, %v2401_v63 }
 0x3c1   : > { %v2538_v7 = vrot.slane %v2537_v19, 1 }
 0x3c2   : > { %v2404_v43 = vadd.f32 %v2403_v11, %v2334_v0 }
 0x3c3   : > { %v2539_v16 = vadd.f32 %v2538_v7, %v2537_v19 }
 0x3c4   : > { %2405 = vst [vmem:[#allocation5] sm:$0x1] %v2404_v43 }
 0x3c5   : > { %v2540_v6 = vadd.f32 %v2539_v16, %v2406_v27 }
 0x3c7   : > { %2541 = vst [vmem:[#allocation6] sm:$0x1] %v2540_v6 }
 0x3c8 PF: > { %p4075_p6 = scmp.ne.s32.totalorder %s5333_s28, 2 }
 0x3ca   : > { %2545 = sbr.rel (%p4075_p6) target bundleno = 1692 (0x69c), region = 88 }
 0x3d1   : > { %p4076_p8 = scmp.ne.s32.totalorder %s5329_s27, 0 }
 0x3d2   : > { %v2550_v54 = vld [vmem:[#allocation5] sm:$0x1] (!%p4076_p8)  ;;  %v2552_v17 = vld [vmem:[#allocation6] sm:$0x1] (!%p4076_p8)  ;;  %s8157_s29 = sld [smem:[#allocation34_spill]] (!%p4076_p8)  ;;  %s8158_s17 = sld [smem:[#allocation35_spill]] (!%p4076_p8) }
 0x3d3   : > { %2549 = sbr.rel (%p4076_p8) target bundleno = 1005 (0x3ed), region = 92  ;;  %v2551_v52 = vmul.f32 (!%p4076_p8), 0.0009765625, %v2550_v54  ;;  %v2553_v8 = vmul.f32 (!%p4076_p8), 0.0009765625, %v2552_v17 }
 0x3d5   : > { %v2554_v50 = vmul.f32 (!%p4076_p8), %v2551_v52, %v2551_v52 }
 0x3d7   : > { %v2555_v38 = vsub.f32 (!%p4076_p8), %v2553_v8, %v2554_v50 }
 0x3d8   : > { %v2558_v15 = vld [vmem:[%s8157_s29] sm:$0x1] (!%p4076_p8) }
 0x3d9   : > { %v2556_v10 = vadd.f32 (!%p4076_p8), 0.01, %v2555_v38  ;;  %v2561_v53 = vld [vmem:[%s8158_s17] sm:$0x1] (!%p4076_p8) }
 0x3db   : > { %4902 = vrsqrt.f32 %v2556_v10 }
 0x3e5   : > { %v4903_v1 = vpop.eup %4902 }
 0x3e6   : > { %v2559_v37 = vmul.f32 %v4903_v1, %v2558_v15 }
 0x3e8   : > { %2560 = vst [vmem:[#allocation7] sm:$0x1] %v2559_v37  ;;  %v2562_v14 = vmul.f32 %v2559_v37, %v2551_v52 }
 0x3ea   : > { %v2563_v21 = vsub.f32 %v2561_v53, %v2562_v14 }
 0x3ec   : > { %2564 = vst [vmem:[#allocation8] sm:$0x1] %v2563_v21 }
 0x3ed PF: > { %s8159_s12 = sld [smem:[#allocation36_spill]]  ;;  %v5352_v57 = vmov 0.0   ;;  %s6959_s19 = scalar_lea.vmem [#allocation2], %s5604_s6 }
 0x3ee   : > { %2880 = vmatprep.mubr.f32.mxu0 %v5352_v57  ;;  %3126 = vmatprep.mubr.f32.mxu1 %v5352_v57  ;;  %v2582_v63 = vld [vmem:[%s6959_s19 + $0x80] sm:$0xff]  ;;  %v2583_v49 = vld [vmem:[%s6959_s19 + $0x88] sm:$0xff]  ;;  %v2584_v59 = vld [vmem:[%s6959_s19 + $0x90] sm:$0xff]  ;;  %s8161_s16 = sld [smem:[#allocation37_spill]] }
 0x3ef   : > { %v2585_v19 = vld [vmem:[%s6959_s19 + $0x98] sm:$0xff]  ;;  %v2586_v0 = vld [vmem:[%s6959_s19 + $0xa0] sm:$0xff]  ;;  %v2587_v7 = vld [vmem:[%s6959_s19 + $0xa8] sm:$0xff] }
 0x3f0   : > { %v6966_v11 = vld [vmem:[#allocation7] ss:$0 sm:$0xff]  ;;  %v2588_v27 = vld [vmem:[%s6959_s19 + $0xb0] sm:$0xff]  ;;  %v2589_v17 = vld [vmem:[%s6959_s19 + $0xb8] sm:$0xff] }
 0x3f1   : > { %v2653_v6 = vmul.f32 %v6966_v11, %v2582_v63  ;;  %v2654_v54 = vmul.f32 %v6966_v11, %v2583_v49  ;;  %v2655_v50 = vmul.f32 %v6966_v11, %v2584_v59  ;;  %v2656_v38 = vmul.f32 %v6966_v11, %v2585_v19  ;;  %v2590_v15 = vld [vmem:[%s6959_s19 + $0xc0] sm:$0xff]  ;;  %v2591_v1 = vld [vmem:[%s6959_s19 + $0xc8] sm:$0xff] }
 0x3f2   : > { %v2657_v10 = vmul.f32 %v6966_v11, %v2586_v0  ;;  %v2598_v63 = vld [vmem:[%s6959_s19 + $0x100] sm:$0xff] }
 0x3f3   : > { %v2773_v60 = vld [vmem:[%s8159_s12 + $0x8] sm:$0xff]  ;;  %v2775_v24 = vld [vmem:[%s8159_s12 + $0x18] sm:$0xff]  ;;  %v2772_v3 = vld [vmem:[%s8159_s12] sm:$0xff]  ;;  %v2669_v0 = vmul.f32 %v6966_v11, %v2598_v63 }
 0x3f4   : > { %v4638_v62 = vpack.c.bf16 %v2775_v24, %v2773_v60  ;;  %v2774_v32 = vld [vmem:[%s8159_s12 + $0x10] sm:$0xff]  ;;  %v2777_v39 = vld [vmem:[%s8159_s12 + $0x28] sm:$0xff]  ;;  %v2779_v40 = vld [vmem:[%s8159_s12 + $0x38] sm:$0xff]  ;;  %v2658_v60 = vmul.f32 %v6966_v11, %v2587_v7  ;;  %v2659_v24 = vmul.f32 %v6966_v11, %v2588_v27 }
 0x3f5   : > { %v4640_v34 = vpack.c.bf16 %v2774_v32, %v2772_v3  ;;  %v4642_v29 = vpack.c.bf16 %v2779_v40, %v2777_v39  ;;  %v2776_v2 = vld [vmem:[%s8159_s12 + $0x20] sm:$0xff]  ;;  %v2778_v47 = vld [vmem:[%s8159_s12 + $0x30] sm:$0xff]  ;;  %v2781_v13 = vld [vmem:[%s8159_s12 + $0x48] sm:$0xff]  ;;  %v2660_v40 = vmul.f32 %v6966_v11, %v2589_v17 }
 0x3f6   : > { %4639 = vmatprep.subr.bf16.mxu0 %v4638_v62  ;;  %v2783_v30 = vld [vmem:[%s8159_s12 + $0x58] sm:$0xff]  ;;  %4766 = vmatprep.subr.bf16.mxu1 %v4638_v62  ;;  %v4644_v18 = vpack.c.bf16 %v2778_v47, %v2776_v2  ;;  %v2780_v23 = vld [vmem:[%s8159_s12 + $0x40] sm:$0xff]  ;;  %v2782_v55 = vld [vmem:[%s8159_s12 + $0x50] sm:$0xff] }
 0x3f7   : > { %4641 = vmatpush1.bf16.msra.mxu0 %v4640_v34  ;;  %4774 = vmatpush1.bf16.msra.mxu1 %v4640_v34  ;;  %v4646_v28 = vpack.c.bf16 %v2783_v30, %v2781_v13  ;;  %v2785_v41 = vld [vmem:[%s8159_s12 + $0x68] sm:$0xff]  ;;  %v2787_v22 = vld [vmem:[%s8159_s12 + $0x78] sm:$0xff]  ;;  %v4648_v44 = vpack.c.bf16 %v2782_v55, %v2780_v23  ;;  %v2784_v12 = vld [vmem:[%s8159_s12 + $0x60] sm:$0xff]  ;;  %v2661_v13 = vmul.f32 %v6966_v11, %v2590_v15 }
 0x3f8   : > { %4643 = vmatprep.subr.bf16.mxu0 %v4642_v29  ;;  %4767 = vmatprep.subr.bf16.mxu1 %v4642_v29  ;;  %v4650_v61 = vpack.c.bf16 %v2787_v22, %v2785_v41  ;;  %v2786_v45 = vld [vmem:[%s8159_s12 + $0x70] sm:$0xff]  ;;  %v2789_v25 = vld [vmem:[%s8159_s12 + $0x88] sm:$0xff]  ;;  %v2791_v31 = vld [vmem:[%s8159_s12 + $0x98] sm:$0xff]  ;;  %v2662_v30 = vmul.f32 %v6966_v11, %v2591_v1 }
 0x3f9   : > { %v4652_v35 = vpack.c.bf16 %v2786_v45, %v2784_v12  ;;  %v4654_v56 = vpack.c.bf16 %v2791_v31, %v2789_v25  ;;  %v2788_v58 = vld [vmem:[%s8159_s12 + $0x80] sm:$0xff]  ;;  %v2790_v33 = vld [vmem:[%s8159_s12 + $0x90] sm:$0xff]  ;;  %v2793_v51 = vld [vmem:[%s8159_s12 + $0xa8] sm:$0xff] }
 0x3fa   : > { %v2795_v20 = vld [vmem:[%s8159_s12 + $0xb8] sm:$0xff]  ;;  %v2792_v9 = vld [vmem:[%s8159_s12 + $0xa0] sm:$0xff]  ;;  %v2794_v26 = vld [vmem:[%s8159_s12 + $0xb0] sm:$0xff]  ;;  %v4656_v46 = vpack.c.bf16 %v2790_v33, %v2788_v58 }
 0x3fb   : > { %4645 = vmatpush1.bf16.msra.mxu0 %v4644_v18  ;;  %4775 = vmatpush1.bf16.msra.mxu1 %v4644_v18  ;;  %v2797_v42 = vld [vmem:[%s8159_s12 + $0xc8] sm:$0xff]  ;;  %v2799_v48 = vld [vmem:[%s8159_s12 + $0xd8] sm:$0xff]  ;;  %v2796_v5 = vld [vmem:[%s8159_s12 + $0xc0] sm:$0xff]  ;;  %v4658_v4 = vpack.c.bf16 %v2795_v20, %v2793_v51  ;;  %v4660_v43 = vpack.c.bf16 %v2794_v26, %v2792_v9 }
 0x3fc   : > { %4647 = vmatprep.subr.bf16.mxu0 %v4646_v28  ;;  %4768 = vmatprep.subr.bf16.mxu1 %v4646_v28  ;;  %v2798_v36 = vld [vmem:[%s8159_s12 + $0xd0] sm:$0xff]  ;;  %v4662_v16 = vpack.c.bf16 %v2799_v48, %v2797_v42  ;;  %v6973_v8 = vld [vmem:[#allocation8] ss:$0 sm:$0xff]  ;;  %v2801_v37 = vld [vmem:[%s8159_s12 + $0xe8] sm:$0xff] }
 0x3fd   : > { %v4664_v52 = vpack.c.bf16 %v2798_v36, %v2796_v5  ;;  %v2803_v53 = vld [vmem:[%s8159_s12 + $0xf8] sm:$0xff]  ;;  %v6987_v14 = vadd.f32 %v6973_v8, %v2653_v6  ;;  %v6990_v21 = vadd.f32 %v6973_v8, %v2654_v54  ;;  %v2592_v3 = vld [vmem:[%s6959_s19 + $0xd0] sm:$0xff]  ;;  %v6996_v62 = vadd.f32 %v6973_v8, %v2655_v50  ;;  %v2566_v29 = vld [vmem:[%s6959_s19] sm:$0xff] }
 0x3fe   : > { %v6999_v32 = vadd.f32 %v6973_v8, %v2656_v38  ;;  %v7002_v39 = vadd.f32 %v6973_v8, %v2657_v10  ;;  %v2593_v34 = vld [vmem:[%s6959_s19 + $0xd8] sm:$0xff]  ;;  %v7008_v2 = vadd.f32 %v6973_v8, %v2658_v60  ;;  %v7011_v47 = vadd.f32 %v6973_v8, %v2659_v24  ;;  %v2594_v18 = vld [vmem:[%s6959_s19 + $0xe0] sm:$0xff]  ;;  %v2802_v55 = vld [vmem:[%s8159_s12 + $0xf0] sm:$0xff] }
 0x3ff   : > { %4649 = vmatpush1.bf16.msra.mxu0 %v4648_v44  ;;  %4776 = vmatpush1.bf16.msra.mxu1 %v4648_v44  ;;  %v4666_v28 = vpack.c.bf16 %v2803_v53, %v2801_v37  ;;  %v2800_v23 = vld [vmem:[%s8159_s12 + $0xe0] sm:$0xff]  ;;  %v7023_v41 = vadd.f32 %v6973_v8, %v2660_v40  ;;  %v2663_v22 = vmul.f32 %v6966_v11, %v2592_v3  ;;  %v2595_v44 = vld [vmem:[%s6959_s19 + $0xe8] sm:$0xff]  ;;  %v2596_v31 = vld [vmem:[%s6959_s19 + $0xf0] sm:$0xff] }
 0x400   : > { %4651 = vmatprep.subr.bf16.mxu0 %v4650_v61  ;;  %4769 = vmatprep.subr.bf16.mxu1 %v4650_v61  ;;  %v7028_v61 = vadd.f32 %v6973_v8, %v2661_v13  ;;  %v7031_v12 = vadd.f32 %v6973_v8, %v2662_v30  ;;  %v2607_v45 = vld [vmem:[%s6959_s19 + $0x148] sm:$0xff]  ;;  %v2664_v25 = vmul.f32 %v6966_v11, %v2593_v34  ;;  %v2597_v33 = vld [vmem:[%s6959_s19 + $0xf8] sm:$0xff]  ;;  %v2608_v5 = vld [vmem:[%s6959_s19 + $0x150] sm:$0xff] }
 0x401   : > { %v2665_v58 = vmul.f32 %v6966_v11, %v2594_v18  ;;  %v4668_v51 = vpack.c.bf16 %v2802_v55, %v2800_v23  ;;  %v2567_v20 = vld [vmem:[%s6959_s19 + $0x8] sm:$0xff]  ;;  %v2666_v26 = vmul.f32 %v6966_v11, %v2595_v44  ;;  %v2667_v48 = vmul.f32 %v6966_v11, %v2596_v31  ;;  %v2568_v7 = vld [vmem:[%s6959_s19 + $0x10] sm:$0xff]  ;;  %v2609_v54 = vld [vmem:[%s6959_s19 + $0x158] sm:$0xff] }
 0x402   : > { %v7044_v9 = vadd.f32 %v6973_v8, %v2664_v25  ;;  %v2668_v36 = vmul.f32 %v6966_v11, %v2597_v33  ;;  %v2638_v59 = vmul.f32 %v6966_v11, %v2567_v20  ;;  %v7071_v6 = vadd.f32 %v6973_v8, %v2669_v0  ;;  %v2599_v17 = vld [vmem:[%s6959_s19 + $0x108] sm:$0xff]  ;;  %v2569_v10 = vld [vmem:[%s6959_s19 + $0x18] sm:$0xff]  ;;  %v2610_v53 = vld [vmem:[%s6959_s19 + $0x160] sm:$0xff] }
 0x403   : > { %4653 = vmatpush1.bf16.msra.mxu0 %v4652_v35  ;;  %4777 = vmatpush1.bf16.msra.mxu1 %v4652_v35  ;;  %v2637_v35 = vmul.f32 %v6966_v11, %v2566_v29  ;;  %v7049_v42 = vadd.f32 %v6973_v8, %v2665_v58  ;;  %v7061_v19 = vadd.f32 %v6973_v8, %v2667_v48  ;;  %v2600_v60 = vld [vmem:[%s6959_s19 + $0x110] sm:$0xff]  ;;  %v2570_v34 = vld [vmem:[%s6959_s19 + $0x20] sm:$0xff]  ;;  %v2611_v18 = vld [vmem:[%s6959_s19 + $0x168] sm:$0xff] }
 0x404   : > { %4655 = vmatprep.subr.bf16.mxu0 %v4654_v56  ;;  %4770 = vmatprep.subr.bf16.mxu1 %v4654_v56  ;;  %v7038_v56 = vadd.f32 %v6973_v8, %v2663_v22  ;;  %v7066_v27 = vadd.f32 %v6973_v8, %v2668_v36  ;;  %v2639_v50 = vmul.f32 %v6966_v11, %v2568_v7  ;;  %v2571_v44 = vld [vmem:[%s6959_s19 + $0x28] sm:$0xff]  ;;  %v2612_v33 = vld [vmem:[%s6959_s19 + $0x170] sm:$0xff]  ;;  %v2613_v7 = vld [vmem:[%s6959_s19 + $0x178] sm:$0xff] }
 0x405   : > { %v2708_v49 = vadd.f32 %v6973_v8, %v2637_v35  ;;  %v2670_v38 = vmul.f32 %v6966_v11, %v2599_v17  ;;  %v2680_v1 = vmul.f32 %v6966_v11, %v2609_v54  ;;  %v2640_v3 = vmul.f32 %v6966_v11, %v2569_v10  ;;  %v2624_v36 = vld [vmem:[%s6959_s19 + $0x1d0] sm:$0xff] }
 0x406   : > { %v2710_v24 = vadd.f32 %v6973_v8, %v2639_v50  ;;  %v2671_v40 = vmul.f32 %v6966_v11, %v2600_v60  ;;  %v2681_v13 = vmul.f32 %v6966_v11, %v2610_v53  ;;  %v2641_v55 = vmul.f32 %v6966_v11, %v2570_v34  ;;  %v2573_v50 = vld [vmem:[%s6959_s19 + $0x38] sm:$0xff]  ;;  %v2614_v60 = vld [vmem:[%s6959_s19 + $0x180] sm:$0xff] }
 0x407   : > { %4657 = vmatpush1.bf16.msra.mxu0 %v4656_v46  ;;  %4778 = vmatpush1.bf16.msra.mxu1 %v4656_v46  ;;  %v2678_v46 = vmul.f32 %v6966_v11, %v2607_v45  ;;  %v7083_v37 = vadd.f32 %v6973_v8, %v2670_v38  ;;  %v2751_v29 = vadd.f32 %v6973_v8, %v2680_v1  ;;  %v2623_v45 = vld [vmem:[%s6959_s19 + $0x1c8] sm:$0xff]  ;;  %v2625_v38 = vld [vmem:[%s6959_s19 + $0x1d8] sm:$0xff] }
 0x408   : > { %4659 = vmatprep.subr.bf16.mxu0 %v4658_v4  ;;  %4771 = vmatprep.subr.bf16.mxu1 %v4658_v4  ;;  %v7054_v4 = vadd.f32 %v6973_v8, %v2666_v26  ;;  %v7096_v30 = vadd.f32 %v6973_v8, %v2671_v40  ;;  %v2711_v23 = vadd.f32 %v6973_v8, %v2640_v3 }
 0x409   : > { %v2752_v25 = vadd.f32 %v6973_v8, %v2681_v13  ;;  %v2682_v31 = vmul.f32 %v6966_v11, %v2611_v18  ;;  %v2694_v58 = vmul.f32 %v6966_v11, %v2623_v45  ;;  %v2712_v20 = vadd.f32 %v6973_v8, %v2641_v55  ;;  %v2574_v13 = vld [vmem:[%s6959_s19 + $0x40] sm:$0xff]  ;;  %v2605_v45 = vld [vmem:[%s6959_s19 + $0x138] sm:$0xff] }
 0x40a   : > { %v2642_v26 = vmul.f32 %v6966_v11, %v2571_v44  ;;  %v2695_v0 = vmul.f32 %v6966_v11, %v2624_v36  ;;  %v2696_v53 = vmul.f32 %v6966_v11, %v2625_v38  ;;  %v2644_v40 = vmul.f32 %v6966_v11, %v2573_v50  ;;  %v2626_v18 = vld [vmem:[%s6959_s19 + $0x1e0] sm:$0xff]  ;;  %v2615_v44 = vld [vmem:[%s6959_s19 + $0x188] sm:$0xff] }
 0x40b   : > { %4661 = vmatpush1.bf16.msra.mxu0 %v4660_v43  ;;  %4779 = vmatpush1.bf16.msra.mxu1 %v4660_v43  ;;  %v2749_v43 = vadd.f32 %v6973_v8, %v2678_v46  ;;  %v7120_v48 = vadd.f32 %v6973_v8, %v2694_v58  ;;  %v2753_v63 = vadd.f32 %v6973_v8, %v2682_v31 }
 0x40c   : > { %4663 = vmatprep.subr.bf16.mxu0 %v4662_v16  ;;  %4772 = vmatprep.subr.bf16.mxu1 %v4662_v16  ;;  %v2679_v16 = vmul.f32 %v6966_v11, %v2608_v5  ;;  %v2572_v5 = vld [vmem:[%s6959_s19 + $0x30] sm:$0xff]  ;;  %v2645_v31 = vmul.f32 %v6966_v11, %v2574_v13  ;;  %v2676_v58 = vmul.f32 %v6966_v11, %v2605_v45 }
 0x40d   : > { %v2643_v54 = vmul.f32 %v6966_v11, %v2572_v5 }
 0x40e   : > { %v2750_v15 = vadd.f32 %v6973_v8, %v2679_v16  ;;  %v2713_v16 = vadd.f32 %v6973_v8, %v2642_v26  ;;  %v7182_v5 = vadd.f32 %v6973_v8, %v2676_v58 }
 0x40f   : > { %4665 = vmatpush1.bf16.msra.mxu0 %v4664_v52  ;;  %4780 = vmatpush1.bf16.msra.mxu1 %v4664_v52  ;;  %v2709_v52 = vadd.f32 %v6973_v8, %v2638_v59  ;;  %v2714_v3 = vadd.f32 %v6973_v8, %v2643_v54  ;;  %v2576_v54 = vld [vmem:[%s6959_s19 + $0x50] sm:$0xff] }
 0x410   : > { %4667 = vmatprep.subr.bf16.mxu0 %v4666_v28  ;;  %4773 = vmatprep.subr.bf16.mxu1 %v4666_v28  ;;  %v2601_v28 = vld [vmem:[%s6959_s19 + $0x118] sm:$0xff] }
 0x411   : > { %v2672_v22 = vmul.f32 %v6966_v11, %v2601_v28 }
 0x413   : > { %4669 = vmatpush1.bf16.msra.mxu0 %v4668_v51  ;;  %4781 = vmatpush1.bf16.msra.mxu1 %v4668_v51  ;;  %v7110_v35 = vadd.f32 %v6973_v8, %v2672_v22  ;;  %v2602_v51 = vld [vmem:[%s6959_s19 + $0x120] sm:$0xff]  ;;  %v2697_v22 = vmul.f32 %v6966_v11, %v2626_v18 }
 0x414   : > { %v2673_v46 = vmul.f32 %v6966_v11, %v2602_v51  ;;  %v2575_v51 = vld [vmem:[%s6959_s19 + $0x48] sm:$0xff] }
 0x416   : > { %2881 = vmatmul.mubr.f32.vlgmr.msra.gmra.mrb[0].mxu0 %v2708_v49  ;;  %3127 = vmatmul.mubr.f32.vlgmr.msra.gmra.mrb[0].mxu1 %v2749_v43  ;;  %v2683_v49 = vmul.f32 %v6966_v11, %v2612_v33  ;;  %v7128_v59 = vadd.f32 %v6973_v8, %v2673_v46  ;;  %v2603_v43 = vld [vmem:[%s6959_s19 + $0x128] sm:$0xff]  ;;  %v7174_v33 = vadd.f32 %v6973_v8, %v2697_v22 }
 0x417   : > { %2886 = vmatprep.mubr.f32.mxu0 %v5352_v57  ;;  %3132 = vmatprep.mubr.f32.mxu1 %v5352_v57  ;;  %v2674_v17 = vmul.f32 %v6966_v11, %v2603_v43  ;;  %v2686_v46 = vmul.f32 %v6966_v11, %v2615_v44 }
 0x418   : > { %v2754_v10 = vadd.f32 %v6973_v8, %v2683_v49  ;;  %v2606_v49 = vld [vmem:[%s6959_s19 + $0x140] sm:$0xff] }
 0x419   : > { %v7146_v1 = vadd.f32 %v6973_v8, %v2674_v17  ;;  %v2677_v43 = vmul.f32 %v6966_v11, %v2606_v49  ;;  %v2628_v17 = vld [vmem:[%s6959_s19 + $0x1f0] sm:$0xff]  ;;  %v2757_v50 = vadd.f32 %v6973_v8, %v2686_v46  ;;  %v2579_v46 = vld [vmem:[%s6959_s19 + $0x68] sm:$0xff] }
 0x41a   : > { %2887 = vmatmul.mubr.f32.gmra.mrb[2].mxu0 %v2709_v52  ;;  %3133 = vmatmul.mubr.f32.gmra.mrb[2].mxu1 %v2750_v15  ;;  %v7138_v52 = vadd.f32 %v6973_v8, %v2695_v0  ;;  %v2684_v15 = vmul.f32 %v6966_v11, %v2613_v7  ;;  %v2716_v0 = vadd.f32 %v6973_v8, %v2645_v31  ;;  %v2620_v49 = vld [vmem:[%s6959_s19 + $0x1b0] sm:$0xff] }
 0x41b   : > { %2892 = vmatprep.mubr.f32.mxu0 %v5352_v57  ;;  %3138 = vmatprep.mubr.f32.mxu1 %v5352_v57  ;;  %v2646_v7 = vmul.f32 %v6966_v11, %v2575_v51  ;;  %v2619_v51 = vld [vmem:[%s6959_s19 + $0x1a8] sm:$0xff] }
 0x41c   : > { %v2755_v28 = vadd.f32 %v6973_v8, %v2684_v15  ;;  %v2699_v15 = vmul.f32 %v6966_v11, %v2628_v17  ;;  %v2691_v17 = vmul.f32 %v6966_v11, %v2620_v49 }
 0x41e   : > { %2893 = vmatmul.mubr.f32.gmra.mrb[4].mxu0 %v2710_v24  ;;  %3139 = vmatmul.mubr.f32.gmra.mrb[4].mxu1 %v2751_v29  ;;  %v2604_v24 = vld [vmem:[%s6959_s19 + $0x130] sm:$0xff]  ;;  %v7156_v29 = vadd.f32 %v6973_v8, %v2696_v53  ;;  %v2617_v53 = vld [vmem:[%s6959_s19 + $0x198] sm:$0xff] }
 0x41f   : > { %2898 = vmatprep.mubr.f32.mxu0 %v5352_v57  ;;  %3144 = vmatprep.mubr.f32.mxu1 %v5352_v57  ;;  %v2675_v34 = vmul.f32 %v6966_v11, %v2604_v24  ;;  %v2647_v24 = vmul.f32 %v6966_v11, %v2576_v54 }
 0x421   : > { %v7164_v55 = vadd.f32 %v6973_v8, %v2675_v34  ;;  %v2577_v34 = vld [vmem:[%s6959_s19 + $0x58] sm:$0xff]  ;;  %v2718_v44 = vadd.f32 %v6973_v8, %v2647_v24 }
 0x422   : > { %2899 = vmatmul.mubr.f32.gmra.mrb[6].mxu0 %v2711_v23  ;;  %3145 = vmatmul.mubr.f32.gmra.mrb[6].mxu1 %v2752_v25  ;;  %v2685_v23 = vmul.f32 %v6966_v11, %v2614_v60  ;;  %v2715_v25 = vadd.f32 %v6973_v8, %v2644_v40  ;;  %v2717_v60 = vadd.f32 %v6973_v8, %v2646_v7  ;;  %v2629_v40 = vld [vmem:[%s6959_s19 + $0x1f8] sm:$0xff] }
 0x423   : > { %2904 = vmatprep.mubr.f32.mxu0 %v5352_v57  ;;  %3150 = vmatprep.mubr.f32.mxu1 %v5352_v57  ;;  %v2700_v13 = vmul.f32 %v6966_v11, %v2629_v40  ;;  %v2648_v45 = vmul.f32 %v6966_v11, %v2577_v34  ;;  %v2650_v7 = vmul.f32 %v6966_v11, %v2579_v46  ;;  %v2622_v40 = vld [vmem:[%s6959_s19 + $0x1c0] sm:$0xff] }
 0x424   : > { %v2756_v26 = vadd.f32 %v6973_v8, %v2685_v23  ;;  %v2618_v23 = vld [vmem:[%s6959_s19 + $0x1a0] sm:$0xff] }
 0x425   : > { %v7219_v22 = vadd.f32 %v6973_v8, %v2700_v13  ;;  %v2689_v58 = vmul.f32 %v6966_v11, %v2618_v23 }
 0x426   : > { %2905 = vmatmul.mubr.f32.gmra.mrb[8].mxu0 %v2712_v20  ;;  %3151 = vmatmul.mubr.f32.gmra.mrb[8].mxu1 %v2753_v63  ;;  %v2627_v20 = vld [vmem:[%s6959_s19 + $0x1e8] sm:$0xff]  ;;  %v2616_v63 = vld [vmem:[%s6959_s19 + $0x190] sm:$0xff] }
 0x427   : > { %2910 = vmatprep.mubr.f32.mxu0 %v5352_v57  ;;  %3156 = vmatprep.mubr.f32.mxu1 %v5352_v57  ;;  %v2698_v36 = vmul.f32 %v6966_v11, %v2627_v20  ;;  %v2687_v38 = vmul.f32 %v6966_v11, %v2616_v63  ;;  %v2719_v20 = vadd.f32 %v6973_v8, %v2648_v45 }
 0x428   : > { %v2690_v63 = vmul.f32 %v6966_v11, %v2619_v51 }
 0x429   : > { %v2758_v18 = vadd.f32 %v6973_v8, %v2687_v38  ;;  %v2721_v38 = vadd.f32 %v6973_v8, %v2650_v7 }
 0x42a   : > { %2911 = vmatmul.mubr.f32.gmra.mrb[10].mxu0 %v2713_v16  ;;  %3157 = vmatmul.mubr.f32.gmra.mrb[10].mxu1 %v2754_v10  ;;  %v7192_v16 = vadd.f32 %v6973_v8, %v2698_v36  ;;  %v7200_v10 = vadd.f32 %v6973_v8, %v2677_v43  ;;  %v2760_v36 = vadd.f32 %v6973_v8, %v2689_v58  ;;  %v2580_v43 = vld [vmem:[%s6959_s19 + $0x70] sm:$0xff] }
 0x42b   : > { %2916 = vmatprep.mubr.f32.mxu0 %v5352_v57  ;;  %3162 = vmatprep.mubr.f32.mxu1 %v5352_v57  ;;  %v2761_v54 = vadd.f32 %v6973_v8, %v2690_v63 }
 0x42e   : > { %2917 = vmatmul.mubr.f32.gmra.mrb[12].mxu0 %v2714_v3  ;;  %3163 = vmatmul.mubr.f32.gmra.mrb[12].mxu1 %v2755_v28  ;;  %v7208_v3 = vadd.f32 %v6973_v8, %v2699_v15  ;;  %v2688_v28 = vmul.f32 %v6966_v11, %v2617_v53  ;;  %v2651_v15 = vmul.f32 %v6966_v11, %v2580_v43  ;;  %v2581_v53 = vld [vmem:[%s6959_s19 + $0x78] sm:$0xff] }
 0x42f   : > { %2922 = vmatprep.mubr.f32.mxu0 %v5352_v57  ;;  %3168 = vmatprep.mubr.f32.mxu1 %v5352_v57  ;;  %v2652_v13 = vmul.f32 %v6966_v11, %v2581_v53  ;;  %v3370_v53 = vld [vmem:[%s5594_s8 + $0x148] sm:$0xff] }
 0x430   : > { %v2759_v31 = vadd.f32 %v6973_v8, %v2688_v28  ;;  %v2722_v34 = vadd.f32 %v6973_v8, %v2651_v15  ;;  %v2693_v28 = vmul.f32 %v6966_v11, %v2622_v40 }
 0x431   : > { %v2723_v23 = vadd.f32 %v6973_v8, %v2652_v13 }
 0x432   : > { %2923 = vmatmul.mubr.f32.gmra.mrb[14].mxu0 %v2715_v25  ;;  %3169 = vmatmul.mubr.f32.gmra.mrb[14].mxu1 %v2756_v26  ;;  %v2578_v25 = vld [vmem:[%s6959_s19 + $0x60] sm:$0xff] }
 0x433   : > { %2928 = vmatprep.mubr.f32.mxu0 %v5352_v57  ;;  %3174 = vmatprep.mubr.f32.mxu1 %v5352_v57  ;;  %v2649_v26 = vmul.f32 %v6966_v11, %v2578_v25 }
 0x436   : > { %2929 = vmatmul.mubr.f32.gmra.mrb[16].mxu0 %v2716_v0  ;;  %3175 = vmatmul.mubr.f32.gmra.mrb[16].mxu1 %v2757_v50  ;;  %v2720_v0 = vadd.f32 %v6973_v8, %v2649_v26  ;;  %v2621_v50 = vld [vmem:[%s6959_s19 + $0x1b8] sm:$0xff] }
 0x437   : > { %2934 = vmatprep.mubr.f32.mxu0 %v5352_v57  ;;  %3180 = vmatprep.mubr.f32.mxu1 %v5352_v57  ;;  %v2692_v24 = vmul.f32 %v6966_v11, %v2621_v50  ;;  %v8115_v11 = vlaneseq }
 0x43a   : > { %2935 = vmatmul.mubr.f32.gmra.mrb[18].mxu0 %v2717_v60  ;;  %3181 = vmatmul.mubr.f32.gmra.mrb[18].mxu1 %v2758_v18  ;;  %v2762_v60 = vadd.f32 %v6973_v8, %v2691_v17  ;;  %v2763_v18 = vadd.f32 %v6973_v8, %v2692_v24  ;;  %v8116_v17 = vmov 1.0  }
 0x43b   : > { %2940 = vmatprep.mubr.f32.mxu0 %v5352_v57  ;;  %3186 = vmatprep.mubr.f32.mxu1 %v5352_v57 }
 0x43e   : > { %2941 = vmatmul.mubr.f32.gmra.mrb[20].mxu0 %v2718_v44  ;;  %3187 = vmatmul.mubr.f32.gmra.mrb[20].mxu1 %v2759_v31  ;;  %v2764_v44 = vadd.f32 %v6973_v8, %v2693_v28  ;;  %v7328_v8 = vshrl.u32 %v8115_v11, 7 }
 0x43f   : > { %2946 = vmatprep.mubr.f32.mxu0 %v5352_v57  ;;  %3192 = vmatprep.mubr.f32.mxu1 %v5352_v57 }
 0x440   : > { %8160 = vst [vmem:[#allocation23_spill] sm:$0xff] %v7328_v8 }
 0x442   : > { %2947 = vmatmul.mubr.f32.gmra.mrb[22].mxu0 %v2719_v20  ;;  %3193 = vmatmul.mubr.f32.gmra.mrb[22].mxu1 %v2760_v36 }
 0x443   : > { %2952 = vmatprep.mubr.f32.mxu0 %v5352_v57  ;;  %3198 = vmatprep.mubr.f32.mxu1 %v5352_v57 }
 0x446   : > { %2953 = vmatmul.mubr.f32.gmra.mrb[24].mxu0 %v2720_v0  ;;  %3199 = vmatmul.mubr.f32.gmra.mrb[24].mxu1 %v2761_v54  ;;  %v3329_v0 = vld [vmem:[%s5594_s8] sm:$0xff] }
 0x447   : > { %2958 = vmatprep.mubr.f32.mxu0 %v5352_v57  ;;  %3204 = vmatprep.mubr.f32.mxu1 %v5352_v57 }
 0x44a   : > { %2959 = vmatmul.mubr.f32.gmra.mrb[26].mxu0 %v2721_v38  ;;  %3205 = vmatmul.mubr.f32.gmra.mrb[26].mxu1 %v2762_v60 }
 0x44b   : > { %2964 = vmatprep.mubr.f32.mxu0 %v5352_v57  ;;  %3210 = vmatprep.mubr.f32.mxu1 %v5352_v57 }
 0x44e   : > { %2965 = vmatmul.mubr.f32.gmra.mrb[28].mxu0 %v2722_v34  ;;  %3211 = vmatmul.mubr.f32.gmra.mrb[28].mxu1 %v2763_v18 }
 0x44f   : > { %2970 = vmatprep.mubr.f32.mxu0 %v5352_v57  ;;  %3216 = vmatprep.mubr.f32.mxu1 %v5352_v57 }
 0x452   : > { %2971 = vmatmul.mubr.f32.gmra.mrb[30].mxu0 %v2723_v23  ;;  %3217 = vmatmul.mubr.f32.gmra.mrb[30].mxu1 %v2764_v44 }
 0x453   : > { %2976 = vmatprep.mubr.f32.mxu0 %v5352_v57  ;;  %3222 = vmatprep.mubr.f32.mxu1 %v5352_v57 }
 0x456   : > { %2977 = vmatmul.mubr.f32.gmra.mrb[32].mxu0 %v6987_v14  ;;  %3223 = vmatmul.mubr.f32.gmra.mrb[32].mxu1 %v7120_v48  ;;  %v2808_v14 = vsub.s32 0, %v7328_v8 }
 0x457   : > { %2982 = vmatprep.mubr.f32.mxu0 %v5352_v57  ;;  %3228 = vmatprep.mubr.f32.mxu1 %v5352_v57 }
 0x45a   : > { %2983 = vmatmul.mubr.f32.gmra.mrb[34].mxu0 %v6990_v21  ;;  %3229 = vmatmul.mubr.f32.gmra.mrb[34].mxu1 %v7138_v52  ;;  %v2804_v21 = vld [vmem:[%s8161_s16] sm:$0x3] }
 0x45b   : > { %2988 = vmatprep.mubr.f32.mxu0 %v5352_v57  ;;  %3234 = vmatprep.mubr.f32.mxu1 %v5352_v57 }
 0x45e   : > { %2989 = vmatmul.mubr.f32.gmra.mrb[36].mxu0 %v6996_v62  ;;  %3235 = vmatmul.mubr.f32.gmra.mrb[36].mxu1 %v7156_v29  ;;  %v7334_v62 = vrot.slane %v2804_v21, %v2808_v14 }
 0x45f   : > { %2994 = vmatprep.mubr.f32.mxu0 %v5352_v57  ;;  %3240 = vmatprep.mubr.f32.mxu1 %v5352_v57 }
 0x462   : > { %2995 = vmatmul.mubr.f32.gmra.mrb[38].mxu0 %v6999_v32  ;;  %3241 = vmatmul.mubr.f32.gmra.mrb[38].mxu1 %v7174_v33 }
 0x463   : > { %3000 = vmatprep.mubr.f32.mxu0 %v5352_v57  ;;  %3246 = vmatprep.mubr.f32.mxu1 %v5352_v57 }
 0x466   : > { %3001 = vmatmul.mubr.f32.gmra.mrb[40].mxu0 %v7002_v39  ;;  %3247 = vmatmul.mubr.f32.gmra.mrb[40].mxu1 %v7192_v16 }
 0x467   : > { %3006 = vmatprep.mubr.f32.mxu0 %v5352_v57  ;;  %3252 = vmatprep.mubr.f32.mxu1 %v5352_v57 }
 0x46a   : > { %3007 = vmatmul.mubr.f32.gmra.mrb[42].mxu0 %v7008_v2  ;;  %3253 = vmatmul.mubr.f32.gmra.mrb[42].mxu1 %v7208_v3 }
 0x46b   : > { %3012 = vmatprep.mubr.f32.mxu0 %v5352_v57  ;;  %3258 = vmatprep.mubr.f32.mxu1 %v5352_v57 }
 0x46e   : > { %3013 = vmatmul.mubr.f32.gmra.mrb[44].mxu0 %v7011_v47  ;;  %3259 = vmatmul.mubr.f32.gmra.mrb[44].mxu1 %v7219_v22 }
 0x46f   : > { %3018 = vmatprep.mubr.f32.mxu0 %v5352_v57  ;;  %4282 = vmatprep.mubr.f32.mxu1 %v8116_v17 }
 0x472   : > { %3019 = vmatmul.mubr.f32.gmra.mrb[46].mxu0 %v7023_v41 }
 0x473   : > { %3024 = vmatprep.mubr.f32.mxu0 %v5352_v57 }
 0x476   : > { %3025 = vmatmul.mubr.f32.gmra.mrb[48].mxu0 %v7028_v61 }
 0x477   : > { %3030 = vmatprep.mubr.f32.mxu0 %v5352_v57 }
 0x47a   : > { %3031 = vmatmul.mubr.f32.gmra.mrb[50].mxu0 %v7031_v12 }
 0x47b   : > { %3036 = vmatprep.mubr.f32.mxu0 %v5352_v57 }
 0x47e   : > { %3037 = vmatmul.mubr.f32.gmra.mrb[52].mxu0 %v7038_v56 }
 0x47f   : > { %3042 = vmatprep.mubr.f32.mxu0 %v5352_v57 }
 0x482   : > { %3043 = vmatmul.mubr.f32.gmra.mrb[54].mxu0 %v7044_v9 }
 0x483   : > { %3048 = vmatprep.mubr.f32.mxu0 %v5352_v57 }
 0x486   : > { %3049 = vmatmul.mubr.f32.gmra.mrb[56].mxu0 %v7049_v42 }
 0x487   : > { %3054 = vmatprep.mubr.f32.mxu0 %v5352_v57 }
 0x48a   : > { %3055 = vmatmul.mubr.f32.gmra.mrb[58].mxu0 %v7054_v4 }
 0x48b   : > { %3060 = vmatprep.mubr.f32.mxu0 %v5352_v57 }
 0x48e   : > { %3061 = vmatmul.mubr.f32.gmra.mrb[60].mxu0 %v7061_v19 }
 0x48f   : > { %3066 = vmatprep.mubr.f32.mxu0 %v5352_v57 }
 0x492   : > { %3067 = vmatmul.mubr.f32.gmra.mrb[62].mxu0 %v7066_v27 }
 0x493   : > { %3072 = vmatprep.mubr.f32.mxu0 %v5352_v57 }
 0x496   : > { %3073 = vmatmul.mubr.f32.gmra.mrb[64].mxu0 %v7071_v6 }
 0x497   : > { %3078 = vmatprep.mubr.f32.mxu0 %v5352_v57 }
 0x49a   : > { %3079 = vmatmul.mubr.f32.gmra.mrb[66].mxu0 %v7083_v37 }
 0x49b   : > { %3084 = vmatprep.mubr.f32.mxu0 %v5352_v57 }
 0x49e   : > { %3085 = vmatmul.mubr.f32.gmra.mrb[68].mxu0 %v7096_v30  ;;  %v2812_v30 = vsub.s32 1, %v7328_v8 }
 0x49f   : > { %3090 = vmatprep.mubr.f32.mxu0 %v5352_v57 }
 0x4a0   : > { %v7359_v16 = vrot.slane %v2804_v21, %v2812_v30 }
 0x4a2   : > { %3091 = vmatmul.mubr.f32.gmra.mrb[70].mxu0 %v7110_v35 }
 0x4a3   : > { %3096 = vmatprep.mubr.f32.mxu0 %v5352_v57 }
 0x4a6   : > { %3097 = vmatmul.mubr.f32.gmra.mrb[72].mxu0 %v7128_v59 }
 0x4a7   : > { %3102 = vmatprep.mubr.f32.mxu0 %v5352_v57 }
 0x4aa   : > { %3103 = vmatmul.mubr.f32.gmra.mrb[74].mxu0 %v7146_v1 }
 0x4ab   : > { %3108 = vmatprep.mubr.f32.mxu0 %v5352_v57 }
 0x4ae   : > { %3109 = vmatmul.mubr.f32.gmra.mrb[76].mxu0 %v7164_v55 }
 0x4af   : > { %3114 = vmatprep.mubr.f32.mxu0 %v5352_v57 }
 0x4b2   : > { %3115 = vmatmul.mubr.f32.gmra.mrb[78].mxu0 %v7182_v5 }
 0x4b3   : > { %3120 = vmatprep.mubr.f32.mxu0 %v5352_v57 }
 0x4b6   : > { %3121 = vmatmul.mubr.f32.gmra.mrb[80].mxu0 %v7200_v10 }
 0x4e9   : > { %v2882_v32 = vpop.f32.mrb[0].mxu0  ;;  %v3128_v47 = vpop.f32.mrb[0].mxu1 }
 0x4ea   : > { %v2883_v39 = vadd.f32 %v2882_v32, %v7334_v62  ;;  %v2884_v2 = vpop.f32.mrb[1].mxu0  ;;  %v3129_v57 = vadd.f32 %v3128_v47, %v7334_v62  ;;  %v3130_v41 = vpop.f32.mrb[1].mxu1  ;;  %v3330_v32 = vld [vmem:[%s5594_s8 + $0x8] sm:$0xff] }
 0x4eb   : > { %v2885_v36 = vadd.f32 %v2884_v2, %v7359_v16  ;;  %v3131_v43 = vadd.f32 %v3130_v41, %v7359_v16 }
 0x4ec   : > { %4904 = vtanh.f32 %v2883_v39 }
 0x4ed   : > { %v2888_v61 = vpop.f32.mrb[2].mxu0  ;;  %4906 = vtanh.f32 %v3129_v57  ;;  %v3134_v9 = vpop.f32.mrb[2].mxu1  ;;  %v3393_v34 = vadd.f32 %v3329_v0, %v2885_v36  ;;  %v3434_v44 = vadd.f32 %v3370_v53, %v3131_v43 }
 0x4ee   : > { %v2889_v12 = vadd.f32 %v2888_v61, %v7334_v62  ;;  %v7339_v56 = vpop.f32.mrb[3].mxu0  ;;  %v3135_v42 = vadd.f32 %v3134_v9, %v7334_v62  ;;  %v7342_v4 = vpop.f32.mrb[3].mxu1  ;;  %v3371_v9 = vld [vmem:[%s5594_s8 + $0x150] sm:$0xff] }
 0x4ef   : > { %v2891_v28 = vadd.f32 %v7339_v56, %v7359_v16  ;;  %v3137_v47 = vadd.f32 %v7342_v4, %v7359_v16 }
 0x4f0   : > { %4908 = vtanh.f32 %v2889_v12 }
 0x4f1   : > { %v2894_v19 = vpop.f32.mrb[4].mxu0  ;;  %4910 = vtanh.f32 %v3135_v42  ;;  %v3140_v37 = vpop.f32.mrb[4].mxu1 }
 0x4f2   : > { %v2895_v27 = vadd.f32 %v2894_v19, %v7334_v62  ;;  %v7345_v6 = vpop.f32.mrb[5].mxu0  ;;  %v3141_v35 = vadd.f32 %v3140_v37, %v7334_v62  ;;  %v7349_v48 = vpop.f32.mrb[5].mxu1 }
 0x4f3   : > { %v2897_v61 = vadd.f32 %v7345_v6, %v7359_v16 }
 0x4f4   : > { %4912 = vtanh.f32 %v2895_v27  ;;  %v3331_v27 = vld [vmem:[%s5594_s8 + $0x10] sm:$0xff] }
 0x4f5   : > { %v2900_v59 = vpop.f32.mrb[6].mxu0  ;;  %4914 = vtanh.f32 %v3141_v35  ;;  %v3146_v33 = vpop.f32.mrb[6].mxu1  ;;  %v3394_v35 = vadd.f32 %v3330_v32, %v2891_v28  ;;  %v3395_v36 = vadd.f32 %v3331_v27, %v2897_v61  ;;  %v3373_v61 = vld [vmem:[%s5594_s8 + $0x160] sm:$0xff] }
 0x4f6   : > { %v7351_v52 = vpop.eup %4904  ;;  %v2901_v1 = vadd.f32 %v2900_v59, %v7334_v62  ;;  %v7354_v29 = vpop.f32.mrb[7].mxu0  ;;  %v3147_v10 = vadd.f32 %v3146_v33, %v7334_v62 }
 0x4f7   : > { %v3457_v55 = vmul.f32 1.442695, %v7351_v52  ;;  %v7357_v5 = vpop.eup %4906  ;;  %v7362_v3 = vpop.f32.mrb[7].mxu1  ;;  %v2903_v43 = vadd.f32 %v7354_v29, %v7359_v16  ;;  %v3332_v29 = vld [vmem:[%s5594_s8 + $0x18] sm:$0xff] }
 0x4f8   : > { %4916 = vtanh.f32 %v2901_v1  ;;  %v3539_v45 = vmul.f32 1.442695, %v7357_v5  ;;  %v3143_v1 = vadd.f32 %v7349_v48, %v7359_v16 }
 0x4f9   : > { %4918 = vpow2.f32 %v3457_v55  ;;  %v2906_v22 = vpop.f32.mrb[8].mxu0  ;;  %v3152_v26 = vpop.f32.mrb[8].mxu1 }
 0x4fa   : > { %v7365_v25 = vpop.eup %4908  ;;  %v2907_v31 = vadd.f32 %v2906_v22, %v7334_v62  ;;  %v7368_v58 = vpop.f32.mrb[9].mxu0  ;;  %4920 = vtanh.f32 %v3147_v10  ;;  %v3153_v63 = vadd.f32 %v3152_v26, %v7334_v62 }
 0x4fb   : > { %v3459_v51 = vmul.f32 1.442695, %v7365_v25  ;;  %4922 = vpow2.f32 %v3539_v45  ;;  %v7373_v46 = vpop.eup %4910  ;;  %v7377_v49 = vpop.f32.mrb[9].mxu1 }
 0x4fc   : > { %4924 = vtanh.f32 %v2907_v31  ;;  %v3541_v54 = vmul.f32 1.442695, %v7373_v46  ;;  %v3435_v31 = vadd.f32 %v3371_v9, %v3137_v47 }
 0x4fd   : > { %4926 = vpow2.f32 %v3459_v51  ;;  %v2912_v7 = vpop.f32.mrb[10].mxu0  ;;  %v3158_v24 = vpop.f32.mrb[10].mxu1  ;;  %v3372_v51 = vld [vmem:[%s5594_s8 + $0x158] sm:$0xff] }
 0x4fe   : > { %v7383_v50 = vpop.eup %4912  ;;  %v2913_v38 = vadd.f32 %v2912_v7, %v7334_v62  ;;  %v7386_v15 = vpop.f32.mrb[11].mxu0  ;;  %4928 = vtanh.f32 %v3153_v63  ;;  %v3159_v13 = vadd.f32 %v3158_v24, %v7334_v62  ;;  %v3436_v24 = vadd.f32 %v3372_v51, %v3143_v1 }
 0x4ff   : > { %v3461_v60 = vmul.f32 1.442695, %v7383_v50  ;;  %4930 = vpow2.f32 %v3541_v54  ;;  %v7390_v40 = vpop.eup %4914  ;;  %v7393_v18 = vpop.f32.mrb[11].mxu1 }
 0x500   : > { %4932 = vtanh.f32 %v2913_v38  ;;  %v3543_v14 = vmul.f32 1.442695, %v7390_v40 }
 0x501   : > { %4934 = vpow2.f32 %v3461_v60  ;;  %v2918_v23 = vpop.f32.mrb[12].mxu0  ;;  %v3164_v42 = vpop.f32.mrb[12].mxu1 }
 0x502   : > { %v7398_v21 = vpop.eup %4916  ;;  %v2919_v39 = vadd.f32 %v2918_v23, %v7334_v62  ;;  %v7402_v2 = vpop.f32.mrb[13].mxu0  ;;  %4936 = vtanh.f32 %v3159_v13  ;;  %v3165_v37 = vadd.f32 %v3164_v42, %v7334_v62 }
 0x503   : > { %v4919_v41 = vpop.eup %4918  ;;  %v3463_v12 = vmul.f32 1.442695, %v7398_v21  ;;  %4938 = vpow2.f32 %v3543_v14  ;;  %v7418_v30 = vpop.f32.mrb[13].mxu1 }
 0x504   : > { %v7414_v19 = vpop.eup %4920  ;;  %v3585_v4 = vmul.f32 %v4919_v41, %v3393_v34  ;;  %4940 = vtanh.f32 %v2919_v39  ;;  %v3149_v34 = vadd.f32 %v7362_v3, %v7359_v16  ;;  %v2909_v3 = vadd.f32 %v7368_v58, %v7359_v16 }
 0x505   : > { %8162 = vst [vmem:[#allocation24_spill] sm:$0xff] %v7414_v19  ;;  %v4923_v6 = vpop.eup %4922  ;;  %4942 = vpow2.f32 %v3463_v12  ;;  %v2924_v59 = vpop.f32.mrb[14].mxu0  ;;  %v3545_v55 = vmul.f32 1.442695, %v7414_v19  ;;  %v3345_v19 = vld [vmem:[%s5594_s8 + $0x80] sm:$0xff] }
 0x506   : > { %v7423_v33 = vpop.eup %4924  ;;  %3649 = vst [vmem:[%s5608_s18] sm:$0xff] %v3585_v4  ;;  %v2925_v10 = vadd.f32 %v2924_v59, %v7334_v62  ;;  %v7427_v22 = vpop.f32.mrb[15].mxu0  ;;  %v3626_v45 = vmul.f32 %v4923_v6, %v3434_v44  ;;  %4944 = vtanh.f32 %v3165_v37  ;;  %v3333_v4 = vld [vmem:[%s5594_s8 + $0x20] sm:$0xff]  ;;  %v3396_v6 = vadd.f32 %v3332_v29, %v2903_v43 }
 0x507   : > { %v4927_v26 = vpop.eup %4926  ;;  %v3465_v63 = vmul.f32 1.442695, %v7423_v33  ;;  %4946 = vpow2.f32 %v3545_v55  ;;  %v3170_v48 = vpop.f32.mrb[14].mxu1  ;;  %v3155_v59 = vadd.f32 %v7377_v49, %v7359_v16  ;;  %v3437_v51 = vadd.f32 %v3373_v61, %v3149_v34 }
 0x508   : > { %v7431_v0 = vpop.eup %4928  ;;  %v3586_v7 = vmul.f32 %v4927_v26, %v3394_v35  ;;  %4948 = vtanh.f32 %v2925_v10  ;;  %3690 = vst [vmem:[%s5608_s18 + $0x148] sm:$0xff] %v3626_v45  ;;  %v3171_v54 = vadd.f32 %v3170_v48, %v7334_v62  ;;  %v7437_v38 = vpop.f32.mrb[15].mxu1  ;;  %v3374_v26 = vld [vmem:[%s5594_s8 + $0x168] sm:$0xff]  ;;  %v3161_v29 = vadd.f32 %v7393_v18, %v7359_v16 }
 0x509   : > { %v4931_v53 = vpop.eup %4930  ;;  %4950 = vpow2.f32 %v3465_v63  ;;  %v2930_v60 = vpop.f32.mrb[16].mxu0  ;;  %v3547_v13 = vmul.f32 1.442695, %v7431_v0  ;;  %v3397_v63 = vadd.f32 %v3333_v4, %v2909_v3  ;;  %v2921_v18 = vadd.f32 %v7402_v2, %v7359_v16 }
 0x50a   : > { %v7442_v28 = vpop.eup %4932  ;;  %3650 = vst [vmem:[%s5608_s18 + $0x8] sm:$0xff] %v3586_v7  ;;  %v2931_v23 = vadd.f32 %v2930_v60, %v7334_v62  ;;  %v7447_v44 = vpop.f32.mrb[17].mxu0  ;;  %v3627_v14 = vmul.f32 %v4931_v53, %v3435_v31  ;;  %4952 = vtanh.f32 %v3171_v54  ;;  %v2915_v54 = vadd.f32 %v7386_v15, %v7359_v16  ;;  %v3334_v15 = vld [vmem:[%s5594_s8 + $0x28] sm:$0xff] }
 0x50b   : > { %v4935_v39 = vpop.eup %4934  ;;  %v3467_v47 = vmul.f32 1.442695, %v7442_v28  ;;  %4954 = vpow2.f32 %v3547_v13  ;;  %v3176_v12 = vpop.f32.mrb[16].mxu1  ;;  %v3438_v13 = vadd.f32 %v3374_v26, %v3155_v59  ;;  %v3335_v59 = vld [vmem:[%s5594_s8 + $0x30] sm:$0xff]  ;;  %v3167_v26 = vadd.f32 %v7418_v30, %v7359_v16 }
 0x50c   : > { %v7457_v9 = vpop.eup %4936  ;;  %v3587_v42 = vmul.f32 %v4935_v39, %v3395_v36  ;;  %4956 = vtanh.f32 %v2931_v23  ;;  %3691 = vst [vmem:[%s5608_s18 + $0x150] sm:$0xff] %v3627_v14  ;;  %v3177_v27 = vadd.f32 %v3176_v12, %v7334_v62  ;;  %v7462_v37 = vpop.f32.mrb[17].mxu1 }
 0x50d   : > { %8163 = vst [vmem:[#allocation25_spill] sm:$0xff] %v7457_v9  ;;  %v4939_v58 = vpop.eup %4938  ;;  %4958 = vpow2.f32 %v3467_v47  ;;  %v2936_v35 = vpop.f32.mrb[18].mxu0  ;;  %v3549_v1 = vmul.f32 1.442695, %v7457_v9 }
 0x50e   : > { %v7467_v55 = vpop.eup %4940  ;;  %3651 = vst [vmem:[%s5608_s18 + $0x10] sm:$0xff] %v3587_v42  ;;  %v2937_v10 = vadd.f32 %v2936_v35, %v7334_v62  ;;  %v7471_v45 = vpop.f32.mrb[19].mxu0  ;;  %v3628_v31 = vmul.f32 %v4939_v58, %v3436_v24  ;;  %4960 = vtanh.f32 %v3177_v27  ;;  %v3375_v27 = vld [vmem:[%s5594_s8 + $0x170] sm:$0xff] }
 0x50f   : > { %v4943_v36 = vpop.eup %4942  ;;  %v3469_v48 = vmul.f32 1.442695, %v7467_v55  ;;  %4962 = vpow2.f32 %v3549_v1  ;;  %v3182_v49 = vpop.f32.mrb[18].mxu1 }
 0x510   : > { %v7475_v7 = vpop.eup %4944  ;;  %v3588_v43 = vmul.f32 %v4943_v36, %v3396_v6  ;;  %4964 = vtanh.f32 %v2937_v10  ;;  %3692 = vst [vmem:[%s5608_s18 + $0x158] sm:$0xff] %v3628_v31  ;;  %v3183_v53 = vadd.f32 %v3182_v49, %v7334_v62  ;;  %v7481_v60 = vpop.f32.mrb[19].mxu1  ;;  %v3398_v31 = vadd.f32 %v3334_v15, %v2915_v54 }
 0x511   : > { %8164 = vst [vmem:[#allocation26_spill] sm:$0xff] %v7475_v7  ;;  %v4947_v24 = vpop.eup %4946  ;;  %4966 = vpow2.f32 %v3469_v48  ;;  %v2942_v34 = vpop.f32.mrb[20].mxu0  ;;  %v3551_v23 = vmul.f32 1.442695, %v7475_v7 }
 0x512   : > { %v7486_v14 = vpop.eup %4948  ;;  %3652 = vst [vmem:[%s5608_s18 + $0x18] sm:$0xff] %v3588_v43  ;;  %v2943_v39 = vadd.f32 %v2942_v34, %v7334_v62  ;;  %v7491_v3 = vpop.f32.mrb[21].mxu0  ;;  %v3629_v47 = vmul.f32 %v4947_v24, %v3437_v51  ;;  %4968 = vtanh.f32 %v3183_v53  ;;  %v3439_v53 = vadd.f32 %v3375_v27, %v3161_v29  ;;  %v3376_v24 = vld [vmem:[%s5594_s8 + $0x178] sm:$0xff] }
 0x513   : > { %v4951_v12 = vpop.eup %4950  ;;  %v3471_v42 = vmul.f32 1.442695, %v7486_v14  ;;  %4970 = vpow2.f32 %v3551_v23  ;;  %v3188_v58 = vpop.f32.mrb[20].mxu1  ;;  %v3399_v34 = vadd.f32 %v3335_v59, %v2921_v18  ;;  %v3173_v27 = vadd.f32 %v7437_v38, %v7359_v16 }
 0x514   : > { %v7501_v6 = vpop.eup %4952  ;;  %v3589_v35 = vmul.f32 %v4951_v12, %v3397_v63  ;;  %4972 = vtanh.f32 %v2943_v39  ;;  %3693 = vst [vmem:[%s5608_s18 + $0x160] sm:$0xff] %v3629_v47  ;;  %v3189_v1 = vadd.f32 %v3188_v58, %v7334_v62  ;;  %v7506_v10 = vpop.f32.mrb[21].mxu1  ;;  %v2927_v47 = vadd.f32 %v7427_v22, %v7359_v16  ;;  %v3336_v22 = vld [vmem:[%s5594_s8 + $0x38] sm:$0xff] }
 0x515   : > { %v4955_v2 = vpop.eup %4954  ;;  %4974 = vpow2.f32 %v3471_v42  ;;  %v2948_v51 = vpop.f32.mrb[22].mxu0  ;;  %v3553_v36 = vmul.f32 1.442695, %v7501_v6  ;;  %v3440_v42 = vadd.f32 %v3376_v24, %v3167_v26  ;;  %v2933_v38 = vadd.f32 %v7447_v44, %v7359_v16 }
 0x516   : > { %v7511_v48 = vpop.eup %4956  ;;  %3653 = vst [vmem:[%s5608_s18 + $0x20] sm:$0xff] %v3589_v35  ;;  %v2949_v63 = vadd.f32 %v2948_v51, %v7334_v62  ;;  %v7515_v49 = vpop.f32.mrb[23].mxu0  ;;  %v3630_v43 = vmul.f32 %v4955_v2, %v3438_v13  ;;  %4976 = vtanh.f32 %v3189_v1 }
 0x517   : > { %v4959_v54 = vpop.eup %4958  ;;  %v3473_v23 = vmul.f32 1.442695, %v7511_v48  ;;  %4978 = vpow2.f32 %v3553_v36  ;;  %v3194_v30 = vpop.f32.mrb[22].mxu1 }
 0x518   : > { %v7519_v15 = vpop.eup %4960  ;;  %v3590_v39 = vmul.f32 %v4959_v54, %v3398_v31  ;;  %4980 = vtanh.f32 %v2949_v63  ;;  %3694 = vst [vmem:[%s5608_s18 + $0x168] sm:$0xff] %v3630_v43  ;;  %v3195_v13 = vadd.f32 %v3194_v30, %v7334_v62  ;;  %v7525_v29 = vpop.f32.mrb[23].mxu1  ;;  %v3377_v63 = vld [vmem:[%s5594_s8 + $0x180] sm:$0xff] }
 0x519   : > { %v4963_v12 = vpop.eup %4962  ;;  %4982 = vpow2.f32 %v3473_v23  ;;  %v2954_v18 = vpop.f32.mrb[24].mxu0  ;;  %v3555_v58 = vmul.f32 1.442695, %v7519_v15  ;;  %v3337_v54 = vld [vmem:[%s5594_s8 + $0x40] sm:$0xff] }
 0x51a   : > { %v7530_v35 = vpop.eup %4964  ;;  %3654 = vst [vmem:[%s5608_s18 + $0x28] sm:$0xff] %v3590_v39  ;;  %v2955_v59 = vadd.f32 %v2954_v18, %v7334_v62  ;;  %v7535_v1 = vpop.f32.mrb[25].mxu0  ;;  %v3631_v2 = vmul.f32 %v4963_v12, %v3439_v53  ;;  %4984 = vtanh.f32 %v3195_v13  ;;  %v3400_v39 = vadd.f32 %v3336_v22, %v2927_v47 }
 0x51b   : > { %v4967_v51 = vpop.eup %4966  ;;  %v3475_v26 = vmul.f32 1.442695, %v7530_v35  ;;  %4986 = vpow2.f32 %v3555_v58  ;;  %v3200_v43 = vpop.f32.mrb[24].mxu1  ;;  %v3179_v12 = vadd.f32 %v7462_v37, %v7359_v16  ;;  %v3401_v22 = vadd.f32 %v3337_v54, %v2933_v38 }
 0x51c   : > { %v7545_v24 = vpop.eup %4968  ;;  %v3591_v53 = vmul.f32 %v4967_v51, %v3399_v34  ;;  %4988 = vtanh.f32 %v2955_v59  ;;  %3695 = vst [vmem:[%s5608_s18 + $0x170] sm:$0xff] %v3631_v2  ;;  %v3201_v23 = vadd.f32 %v3200_v43, %v7334_v62  ;;  %v7550_v30 = vpop.f32.mrb[25].mxu1  ;;  %v3441_v51 = vadd.f32 %v3377_v63, %v3173_v27  ;;  %v3378_v43 = vld [vmem:[%s5594_s8 + $0x188] sm:$0xff] }
 0x51d   : > { %v4971_v44 = vpop.eup %4970  ;;  %4990 = vpow2.f32 %v3475_v26  ;;  %v2960_v13 = vpop.f32.mrb[26].mxu0  ;;  %v3557_v18 = vmul.f32 1.442695, %v7545_v24  ;;  %v3442_v54 = vadd.f32 %v3378_v43, %v3179_v12 }
 0x51e   : > { %v7555_v58 = vpop.eup %4972  ;;  %3655 = vst [vmem:[%s5608_s18 + $0x30] sm:$0xff] %v3591_v53  ;;  %v2961_v34 = vadd.f32 %v2960_v13, %v7334_v62  ;;  %v7559_v59 = vpop.f32.mrb[27].mxu0  ;;  %v3632_v2 = vmul.f32 %v4971_v44, %v3440_v42  ;;  %4992 = vtanh.f32 %v3201_v23  ;;  %v2939_v13 = vadd.f32 %v7471_v45, %v7359_v16  ;;  %v3338_v45 = vld [vmem:[%s5594_s8 + $0x48] sm:$0xff] }
 0x51f   : > { %v4975_v47 = vpop.eup %4974  ;;  %v3477_v26 = vmul.f32 1.442695, %v7555_v58  ;;  %4994 = vpow2.f32 %v3557_v18  ;;  %v3206_v37 = vpop.f32.mrb[26].mxu1  ;;  %v3185_v23 = vadd.f32 %v7481_v60, %v7359_v16  ;;  %v2945_v60 = vadd.f32 %v7491_v3, %v7359_v16 }
 0x520   : > { %v7563_v11 = vpop.eup %4976  ;;  %v3592_v53 = vmul.f32 %v4975_v47, %v3400_v39  ;;  %4996 = vtanh.f32 %v2961_v34  ;;  %3696 = vst [vmem:[%s5608_s18 + $0x178] sm:$0xff] %v3632_v2  ;;  %v3207_v42 = vadd.f32 %v3206_v37, %v7334_v62  ;;  %v7569_v27 = vpop.f32.mrb[27].mxu1  ;;  %v3379_v37 = vld [vmem:[%s5594_s8 + $0x190] sm:$0xff]  ;;  %v3402_v32 = vadd.f32 %v3338_v45, %v2939_v13 }
 0x521   : > { %v4979_v63 = vpop.eup %4978  ;;  %4998 = vpow2.f32 %v3477_v26  ;;  %v2966_v38 = vpop.f32.mrb[28].mxu0  ;;  %v3559_v44 = vmul.f32 1.442695, %v7563_v11 }
 0x522   : > { %v7574_v39 = vpop.eup %4980  ;;  %3656 = vst [vmem:[%s5608_s18 + $0x38] sm:$0xff] %v3592_v53  ;;  %v2967_v18 = vadd.f32 %v2966_v38, %v7334_v62  ;;  %v7579_v34 = vpop.f32.mrb[29].mxu0  ;;  %v3633_v2 = vmul.f32 %v4979_v63, %v3441_v51  ;;  %5000 = vtanh.f32 %v3207_v42  ;;  %v3339_v42 = vld [vmem:[%s5594_s8 + $0x50] sm:$0xff] }
 0x523   : > { %v4983_v43 = vpop.eup %4982  ;;  %v3479_v47 = vmul.f32 1.442695, %v7574_v39  ;;  %5002 = vpow2.f32 %v3559_v44  ;;  %v3212_v53 = vpop.f32.mrb[28].mxu1  ;;  %v3191_v44 = vadd.f32 %v7506_v10, %v7359_v16  ;;  %v3403_v45 = vadd.f32 %v3339_v42, %v2945_v60 }
 0x524   : > { %v7589_v38 = vpop.eup %4984  ;;  %v3593_v51 = vmul.f32 %v4983_v43, %v3401_v22  ;;  %5004 = vtanh.f32 %v2967_v18  ;;  %3697 = vst [vmem:[%s5608_s18 + $0x180] sm:$0xff] %v3633_v2  ;;  %v3213_v63 = vadd.f32 %v3212_v53, %v7334_v62  ;;  %v7594_v61 = vpop.f32.mrb[29].mxu1  ;;  %v3443_v43 = vadd.f32 %v3379_v37, %v3185_v23  ;;  %v3380_v53 = vld [vmem:[%s5594_s8 + $0x198] sm:$0xff] }
 0x525   : > { %v4987_v3 = vpop.eup %4986  ;;  %5006 = vpow2.f32 %v3479_v47  ;;  %v2972_v57 = vpop.f32.mrb[30].mxu0  ;;  %v3561_v12 = vmul.f32 1.442695, %v7589_v38  ;;  %v3197_v42 = vadd.f32 %v7525_v29, %v7359_v16  ;;  %v2957_v29 = vadd.f32 %v7535_v1, %v7359_v16 }
 0x526   : > { %v7599_v17 = vpop.eup %4988  ;;  %3657 = vst [vmem:[%s5608_s18 + $0x40] sm:$0xff] %v3593_v51  ;;  %v2973_v22 = vadd.f32 %v2972_v57, %v7334_v62  ;;  %v7603_v18 = vpop.f32.mrb[31].mxu0  ;;  %v3634_v2 = vmul.f32 %v4987_v3, %v3442_v54  ;;  %5008 = vtanh.f32 %v3213_v63  ;;  %v2951_v57 = vadd.f32 %v7515_v49, %v7359_v16  ;;  %v3340_v49 = vld [vmem:[%s5594_s8 + $0x58] sm:$0xff] }
 0x527   : > { %v4991_v13 = vpop.eup %4990  ;;  %v3481_v47 = vmul.f32 1.442695, %v7599_v17  ;;  %5010 = vpow2.f32 %v3561_v12  ;;  %v3218_v10 = vpop.f32.mrb[30].mxu1  ;;  %v3444_v12 = vadd.f32 %v3380_v53, %v3191_v44 }
 0x528   : > { %v7607_v31 = vpop.eup %4992  ;;  %v3594_v51 = vmul.f32 %v4991_v13, %v3402_v32  ;;  %5012 = vtanh.f32 %v2973_v22  ;;  %3698 = vst [vmem:[%s5608_s18 + $0x188] sm:$0xff] %v3634_v2  ;;  %v3219_v54 = vadd.f32 %v3218_v10, %v7334_v62  ;;  %v7613_v23 = vpop.f32.mrb[31].mxu1  ;;  %v3381_v10 = vld [vmem:[%s5594_s8 + $0x1a0] sm:$0xff]  ;;  %v3404_v26 = vadd.f32 %v3340_v49, %v2951_v57 }
 0x529   : > { %v4995_v37 = vpop.eup %4994  ;;  %5014 = vpow2.f32 %v3481_v47  ;;  %v2978_v60 = vpop.f32.mrb[32].mxu0  ;;  %v3563_v63 = vmul.f32 1.442695, %v7607_v31 }
 0x52a   : > { %v7618_v32 = vpop.eup %4996  ;;  %3658 = vst [vmem:[%s5608_s18 + $0x48] sm:$0xff] %v3594_v51  ;;  %v2979_v3 = vadd.f32 %v2978_v60, %v7334_v62  ;;  %v7623_v22 = vpop.f32.mrb[33].mxu0  ;;  %v3635_v2 = vmul.f32 %v4995_v37, %v3443_v43  ;;  %5016 = vtanh.f32 %v3219_v54  ;;  %v3341_v54 = vld [vmem:[%s5594_s8 + $0x60] sm:$0xff] }
 0x52b   : > { %v4999_v53 = vpop.eup %4998  ;;  %v3483_v13 = vmul.f32 1.442695, %v7618_v32  ;;  %5018 = vpow2.f32 %v3563_v63  ;;  %v3224_v51 = vpop.f32.mrb[32].mxu1  ;;  %v3203_v63 = vadd.f32 %v7550_v30, %v7359_v16  ;;  %v3405_v49 = vadd.f32 %v3341_v54, %v2957_v29 }
 0x52c   : > { %v7633_v60 = vpop.eup %5000  ;;  %v3595_v43 = vmul.f32 %v4999_v53, %v3403_v45  ;;  %5020 = vtanh.f32 %v2979_v3  ;;  %3699 = vst [vmem:[%s5608_s18 + $0x190] sm:$0xff] %v3635_v2  ;;  %v3225_v37 = vadd.f32 %v3224_v51, %v7334_v62  ;;  %v7638_v44 = vpop.f32.mrb[33].mxu1  ;;  %v3445_v53 = vadd.f32 %v3381_v10, %v3197_v42  ;;  %v3382_v51 = vld [vmem:[%s5594_s8 + $0x1a8] sm:$0xff] }
 0x52d   : > { %v5003_v1 = vpop.eup %5002  ;;  %5022 = vpow2.f32 %v3483_v13  ;;  %v2984_v36 = vpop.f32.mrb[34].mxu0  ;;  %v3565_v47 = vmul.f32 1.442695, %v7633_v60  ;;  %v3209_v54 = vadd.f32 %v7569_v27, %v7359_v16  ;;  %v2969_v27 = vadd.f32 %v7579_v34, %v7359_v16 }
 0x52e   : > { %v7643_v4 = vpop.eup %5004  ;;  %3659 = vst [vmem:[%s5608_s18 + $0x50] sm:$0xff] %v3595_v43  ;;  %v2985_v45 = vadd.f32 %v2984_v36, %v7334_v62  ;;  %v7647_v3 = vpop.f32.mrb[35].mxu0  ;;  %v3636_v2 = vmul.f32 %v5003_v1, %v3444_v12  ;;  %5024 = vtanh.f32 %v3225_v37  ;;  %v2963_v36 = vadd.f32 %v7559_v59, %v7359_v16  ;;  %v3342_v59 = vld [vmem:[%s5594_s8 + $0x68] sm:$0xff] }
 0x52f   : > { %v5007_v57 = vpop.eup %5006  ;;  %v3485_v13 = vmul.f32 1.442695, %v7643_v4  ;;  %5026 = vpow2.f32 %v3565_v47  ;;  %v3230_v30 = vpop.f32.mrb[34].mxu1  ;;  %v3446_v47 = vadd.f32 %v3382_v51, %v3203_v63 }
 0x530   : > { %v7651_v41 = vpop.eup %5008  ;;  %v3596_v43 = vmul.f32 %v5007_v57, %v3404_v26  ;;  %5028 = vtanh.f32 %v2985_v45  ;;  %3700 = vst [vmem:[%s5608_s18 + $0x198] sm:$0xff] %v3636_v2  ;;  %v3231_v12 = vadd.f32 %v3230_v30, %v7334_v62  ;;  %v7657_v42 = vpop.f32.mrb[35].mxu1  ;;  %v3383_v30 = vld [vmem:[%s5594_s8 + $0x1b0] sm:$0xff]  ;;  %v3406_v56 = vadd.f32 %v3342_v59, %v2963_v36 }
 0x531   : > { %v5011_v10 = vpop.eup %5010  ;;  %5030 = vpow2.f32 %v3485_v13  ;;  %v2990_v29 = vpop.f32.mrb[36].mxu0  ;;  %v3567_v37 = vmul.f32 1.442695, %v7651_v41 }
 0x532   : > { %v7662_v26 = vpop.eup %5012  ;;  %3660 = vst [vmem:[%s5608_s18 + $0x58] sm:$0xff] %v3596_v43  ;;  %v2991_v1 = vadd.f32 %v2990_v29, %v7334_v62  ;;  %v7667_v45 = vpop.f32.mrb[37].mxu0  ;;  %v3637_v2 = vmul.f32 %v5011_v10, %v3445_v53  ;;  %5032 = vtanh.f32 %v3231_v12  ;;  %v3343_v12 = vld [vmem:[%s5594_s8 + $0x70] sm:$0xff] }
 0x533   : > { %v5015_v51 = vpop.eup %5014  ;;  %v3487_v57 = vmul.f32 1.442695, %v7662_v26  ;;  %5034 = vpow2.f32 %v3567_v37  ;;  %v3236_v43 = vpop.f32.mrb[36].mxu1  ;;  %v3215_v37 = vadd.f32 %v7594_v61, %v7359_v16  ;;  %v3407_v36 = vadd.f32 %v3343_v12, %v2969_v27 }
 0x534   : > { %v7677_v29 = vpop.eup %5016  ;;  %v3597_v53 = vmul.f32 %v5015_v51, %v3405_v49  ;;  %5036 = vtanh.f32 %v2991_v1  ;;  %3701 = vst [vmem:[%s5608_s18 + $0x1a0] sm:$0xff] %v3637_v2  ;;  %v3237_v10 = vadd.f32 %v3236_v43, %v7334_v62  ;;  %v7682_v63 = vpop.f32.mrb[37].mxu1  ;;  %v3447_v51 = vadd.f32 %v3383_v30, %v3209_v54  ;;  %v3384_v43 = vld [vmem:[%s5594_s8 + $0x1b8] sm:$0xff] }
 0x535   : > { %v5019_v34 = vpop.eup %5018  ;;  %5038 = vpow2.f32 %v3487_v57  ;;  %v2996_v20 = vpop.f32.mrb[38].mxu0  ;;  %v3569_v13 = vmul.f32 1.442695, %v7677_v29  ;;  %v3221_v30 = vadd.f32 %v7613_v23, %v7359_v16  ;;  %v2981_v23 = vadd.f32 %v7623_v22, %v7359_v16 }
 0x536   : > { %v5021_v8 = vpop.eup %5020  ;;  %3661 = vst [vmem:[%s5608_s18 + $0x60] sm:$0xff] %v3597_v53  ;;  %v2997_v49 = vadd.f32 %v2996_v20, %v7334_v62  ;;  %v7689_v1 = vpop.f32.mrb[39].mxu0  ;;  %v3638_v2 = vmul.f32 %v5019_v34, %v3446_v47  ;;  %5040 = vtanh.f32 %v3237_v10  ;;  %v2975_v53 = vadd.f32 %v7603_v18, %v7359_v16 }
 0x537   : > { %v5023_v9 = vpop.eup %5022  ;;  %v3489_v59 = vmul.f32 1.442695, %v5021_v8  ;;  %5042 = vpow2.f32 %v3569_v13  ;;  %v3242_v57 = vpop.f32.mrb[38].mxu1  ;;  %v3448_v13 = vadd.f32 %v3384_v43, %v3215_v37 }
 0x538   : > { %v7692_v61 = vpop.eup %5024  ;;  %v3598_v7 = vmul.f32 %v5023_v9, %v3406_v56  ;;  %5044 = vtanh.f32 %v2997_v49  ;;  %3702 = vst [vmem:[%s5608_s18 + $0x1a8] sm:$0xff] %v3638_v2  ;;  %v3243_v20 = vadd.f32 %v3242_v57, %v7334_v62  ;;  %v7698_v47 = vpop.f32.mrb[39].mxu1  ;;  %v3344_v9 = vld [vmem:[%s5594_s8 + $0x78] sm:$0xff] }
 0x539   : > { %v5027_v54 = vpop.eup %5026  ;;  %5046 = vpow2.f32 %v3489_v59  ;;  %v3002_v27 = vpop.f32.mrb[40].mxu0  ;;  %v3571_v12 = vmul.f32 1.442695, %v7692_v61  ;;  %v3385_v59 = vld [vmem:[%s5594_s8 + $0x1c0] sm:$0xff]  ;;  %v3408_v49 = vadd.f32 %v3344_v9, %v2975_v53 }
 0x53a   : > { %v5029_v56 = vpop.eup %5028  ;;  %3662 = vst [vmem:[%s5608_s18 + $0x68] sm:$0xff] %v3598_v7  ;;  %v3003_v18 = vadd.f32 %v3002_v27, %v7334_v62  ;;  %v7706_v10 = vpop.f32.mrb[41].mxu0  ;;  %v3639_v34 = vmul.f32 %v5027_v54, %v3447_v51  ;;  %5048 = vtanh.f32 %v3243_v20  ;;  %v3449_v9 = vadd.f32 %v3385_v59, %v3221_v30 }
 0x53b   : > { %v5031_v37 = vpop.eup %5030  ;;  %v3491_v2 = vmul.f32 1.442695, %v5029_v56  ;;  %v4670_v43 = vpack.c.bf16 %v5029_v56, %v5021_v8  ;;  %5050 = vpow2.f32 %v3571_v12  ;;  %v3248_v7 = vpop.f32.mrb[40].mxu1  ;;  %v3227_v8 = vadd.f32 %v7638_v44, %v7359_v16 }
 0x53c   : > { %v7713_v57 = vpop.eup %5032  ;;  %v3599_v27 = vmul.f32 %v5031_v37, %v3407_v36  ;;  %5052 = vtanh.f32 %v3003_v18  ;;  %3703 = vst [vmem:[%s5608_s18 + $0x1b0] sm:$0xff] %v3639_v34  ;;  %v3249_v51 = vadd.f32 %v3248_v7, %v7334_v62  ;;  %v7718_v20 = vpop.f32.mrb[41].mxu1  ;;  %v8165_v18 = vpack.c.bf16 %v7365_v25, %v7351_v52  ;;  %v3386_v37 = vld [vmem:[%s5594_s8 + $0x1c8] sm:$0xff] }
 0x53d   : > { %v5035_v54 = vpop.eup %5034  ;;  %5054 = vpow2.f32 %v3491_v2  ;;  %v3008_v22 = vpop.f32.mrb[42].mxu0  ;;  %4671 = vmatprep.subr.bf16.mxu1 %v4670_v43  ;;  %v3573_v12 = vmul.f32 1.442695, %v7713_v57  ;;  %v3409_v43 = vadd.f32 %v3345_v19, %v2981_v23  ;;  %v2987_v52 = vadd.f32 %v7647_v3, %v7359_v16 }
 0x53e   : > { %v5037_v56 = vpop.eup %5036  ;;  %3663 = vst [vmem:[%s5608_s18 + $0x70] sm:$0xff] %v3599_v27  ;;  %v3009_v36 = vadd.f32 %v3008_v22, %v7334_v62  ;;  %4673 = vmatpush3.bf16.xpose.msra.mxu1 %v8165_v18  ;;  %v7728_v34 = vpop.f32.mrb[43].mxu0  ;;  %v3640_v53 = vmul.f32 %v5035_v54, %v3448_v13  ;;  %5056 = vtanh.f32 %v3249_v51  ;;  %v3450_v23 = vadd.f32 %v3386_v37, %v3227_v8  ;;  %v3346_v54 = vld [vmem:[%s5594_s8 + $0x88] sm:$0xff]  ;;  %v3387_v18 = vld [vmem:[%s5594_s8 + $0x1d0] sm:$0xff] }
 0x53f   : > { %v5039_v2 = vpop.eup %5038  ;;  %v3493_v44 = vmul.f32 1.442695, %v5037_v56  ;;  %5058 = vpow2.f32 %v3573_v12  ;;  %v3254_v7 = vpop.f32.mrb[42].mxu1  ;;  %v3233_v59 = vadd.f32 %v7657_v42, %v7359_v16  ;;  %v3347_v8 = vld [vmem:[%s5594_s8 + $0x90] sm:$0xff] }
 0x540   : > { %v7731_v27 = vpop.eup %5040  ;;  %v3600_v22 = vmul.f32 %v5039_v2, %v3408_v49  ;;  %5060 = vtanh.f32 %v3009_v36  ;;  %3704 = vst [vmem:[%s5608_s18 + $0x1b8] sm:$0xff] %v3640_v53  ;;  %v3255_v25 = vadd.f32 %v3254_v7, %v7334_v62  ;;  %v7737_v13 = vpop.f32.mrb[43].mxu1 }
 0x541   : > { %v5043_v30 = vpop.eup %5042  ;;  %5062 = vpow2.f32 %v3493_v44  ;;  %v3014_v19 = vpop.f32.mrb[44].mxu0  ;;  %v3575_v51 = vmul.f32 1.442695, %v7731_v27 }
 0x542   : > { %v5045_v49 = vpop.eup %5044  ;;  %3664 = vst [vmem:[%s5608_s18 + $0x78] sm:$0xff] %v3600_v22  ;;  %v3015_v3 = vadd.f32 %v3014_v19, %v7334_v62  ;;  %v7745_v12 = vpop.f32.mrb[45].mxu0  ;;  %v3641_v36 = vmul.f32 %v5043_v30, %v3449_v9  ;;  %5064 = vtanh.f32 %v3255_v25  ;;  %v2993_v22 = vadd.f32 %v7667_v45, %v7359_v16 }
 0x543   : > { %v5047_v53 = vpop.eup %5046  ;;  %v3495_v37 = vmul.f32 1.442695, %v5045_v49  ;;  %v4674_v42 = vpack.c.bf16 %v5045_v49, %v5037_v56  ;;  %5066 = vpow2.f32 %v3575_v51  ;;  %v3260_v2 = vpop.f32.mrb[44].mxu1  ;;  %v3410_v19 = vadd.f32 %v3346_v54, %v2987_v52 }
 0x544   : > { %v7750_v44 = vpop.eup %5048  ;;  %v3601_v7 = vmul.f32 %v5047_v53, %v3409_v43  ;;  %5068 = vtanh.f32 %v3015_v3  ;;  %3705 = vst [vmem:[%s5608_s18 + $0x1c0] sm:$0xff] %v3641_v36  ;;  %v3261_v9 = vadd.f32 %v3260_v2, %v7334_v62  ;;  %v7756_v25 = vpop.f32.mrb[45].mxu1  ;;  %v3451_v51 = vadd.f32 %v3387_v18, %v3233_v59  ;;  %v3388_v18 = vld [vmem:[%s5594_s8 + $0x1d8] sm:$0xff] }
 0x545   : > { %v5051_v30 = vpop.eup %5050  ;;  %5070 = vpow2.f32 %v3495_v37  ;;  %v3020_v56 = vpop.f32.mrb[46].mxu0  ;;  %4675 = vmatprep.subr.bf16.mxu1 %v4674_v42  ;;  %v3577_v49 = vmul.f32 1.442695, %v7750_v44  ;;  %v8166_v3 = vpack.c.bf16 %v7398_v21, %v7383_v50  ;;  %v3239_v54 = vadd.f32 %v7682_v63, %v7359_v16 }
 0x546   : > { %v5053_v43 = vpop.eup %5052  ;;  %3665 = vst [vmem:[%s5608_s18 + $0x80] sm:$0xff] %v3601_v7  ;;  %v3021_v45 = vadd.f32 %v3020_v56, %v7334_v62  ;;  %v7765_v36 = vpop.f32.mrb[47].mxu0  ;;  %v3642_v52 = vmul.f32 %v5051_v30, %v3450_v23  ;;  %5072 = vtanh.f32 %v3261_v9  ;;  %v3411_v2 = vadd.f32 %v3347_v8, %v2993_v22  ;;  %v3348_v30 = vld [vmem:[%s5594_s8 + $0x98] sm:$0xff] }
 0x547   : > { %4677 = vmatpush3.bf16.xpose.msra.mxu1 %v8166_v3  ;;  %v5055_v53 = vpop.eup %5054  ;;  %v3497_v59 = vmul.f32 1.442695, %v5053_v43  ;;  %5074 = vpow2.f32 %v3577_v49  ;;  %v2999_v21 = vadd.f32 %v7689_v1, %v7359_v16  ;;  %v3452_v56 = vadd.f32 %v3388_v18, %v3239_v54  ;;  %v3349_v54 = vld [vmem:[%s5594_s8 + $0xa0] sm:$0xff] }
 0x548   : > { %v7770_v37 = vpop.eup %5056  ;;  %v3602_v42 = vmul.f32 %v5055_v53, %v3410_v19  ;;  %5076 = vtanh.f32 %v3021_v45  ;;  %3706 = vst [vmem:[%s5608_s18 + $0x1c8] sm:$0xff] %v3642_v52  ;;  %v3245_v1 = vadd.f32 %v7698_v47, %v7359_v16  ;;  %v3389_v52 = vld [vmem:[%s5594_s8 + $0x1e0] sm:$0xff] }
 0x549   : > { %v5059_v50 = vpop.eup %5058  ;;  %5078 = vpow2.f32 %v3497_v59  ;;  %v3026_v63 = vpop.f32.mrb[48].mxu0  ;;  %v3579_v23 = vmul.f32 1.442695, %v7770_v37  ;;  %v4726_v7 = vpack.c.bf16 %v7770_v37, %v7750_v44  ;;  %v5354_v44 = vmov 1966171168  }
 0x54a   : > { %v5061_v9 = vpop.eup %5060  ;;  %3666 = vst [vmem:[%s5608_s18 + $0x88] sm:$0xff] %v3602_v42  ;;  %v3027_v8 = vadd.f32 %v3026_v63, %v7334_v62  ;;  %v7781_v22 = vpop.f32.mrb[49].mxu0  ;;  %v3643_v19 = vmul.f32 %v5059_v50, %v3451_v51  ;;  %v3005_v42 = vadd.f32 %v7706_v10, %v7359_v16  ;;  %v3412_v51 = vadd.f32 %v3348_v30, %v2999_v21 }
 0x54b   : > { %v5063_v49 = vpop.eup %5062  ;;  %v3499_v45 = vmul.f32 1.442695, %v5061_v9  ;;  %v4678_v3 = vpack.c.bf16 %v5061_v9, %v5053_v43  ;;  %5080 = vpow2.f32 %v3579_v23  ;;  %v3453_v21 = vadd.f32 %v3389_v52, %v3245_v1 }
 0x54c   : > { %v7786_v53 = vpop.eup %5064  ;;  %v3603_v59 = vmul.f32 %v5063_v49, %v3411_v2  ;;  %5082 = vtanh.f32 %v3027_v8  ;;  %3707 = vst [vmem:[%s5608_s18 + $0x1d0] sm:$0xff] %v3643_v19  ;;  %v8167_v2 = vpack.c.bf16 %v7442_v28, %v7423_v33  ;;  %v3251_v9 = vadd.f32 %v7718_v20, %v7359_v16  ;;  %v3390_v19 = vld [vmem:[%s5594_s8 + $0x1e8] sm:$0xff] }
 0x54d   : > { %v5067_v63 = vpop.eup %5066  ;;  %5084 = vpow2.f32 %v3499_v45  ;;  %v3032_v47 = vpop.f32.mrb[50].mxu0  ;;  %4679 = vmatprep.subr.bf16.mxu1 %v4678_v3  ;;  %v3581_v43 = vmul.f32 1.442695, %v7786_v53  ;;  %v3413_v3 = vadd.f32 %v3349_v54, %v3005_v42  ;;  %v3011_v28 = vadd.f32 %v7728_v34, %v7359_v16 }
 0x54e   : > { %v5069_v18 = vpop.eup %5068  ;;  %3667 = vst [vmem:[%s5608_s18 + $0x90] sm:$0xff] %v3603_v59  ;;  %v3033_v50 = vadd.f32 %v3032_v47, %v7334_v62  ;;  %v7798_v10 = vpop.f32.mrb[51].mxu0  ;;  %v3644_v23 = vmul.f32 %v5067_v63, %v3452_v56  ;;  %v3350_v59 = vld [vmem:[%s5594_s8 + $0xa8] sm:$0xff]  ;;  %v3454_v54 = vadd.f32 %v3390_v19, %v3251_v9  ;;  %v3257_v34 = vadd.f32 %v7737_v13, %v7359_v16  ;;  %v3351_v19 = vld [vmem:[%s5594_s8 + $0xb0] sm:$0xff] }
 0x54f   : > { %4681 = vmatpush3.bf16.xpose.msra.mxu1 %v8167_v2  ;;  %v5071_v30 = vpop.eup %5070  ;;  %v3501_v8 = vmul.f32 1.442695, %v5069_v18  ;;  %5086 = vpow2.f32 %v3581_v43  ;;  %v3391_v2 = vld [vmem:[%s5594_s8 + $0x1f0] sm:$0xff]  ;;  %v3862_v37 = vunpack.c.l.s4 %v5354_v44 }
 0x550   : > { %v7803_v49 = vpop.eup %5072  ;;  %v3604_v45 = vmul.f32 %v5071_v30, %v3412_v51  ;;  %5088 = vtanh.f32 %v3033_v50  ;;  %3708 = vst [vmem:[%s5608_s18 + $0x1d8] sm:$0xff] %v3644_v23 }
 0x551   : > { %v5075_v33 = vpop.eup %5074  ;;  %5090 = vpow2.f32 %v3501_v8  ;;  %v3038_v56 = vpop.f32.mrb[52].mxu0  ;;  %v3583_v20 = vmul.f32 1.442695, %v7803_v49  ;;  %v4730_v1 = vpack.c.bf16 %v7803_v49, %v7786_v53  ;;  %v3414_v8 = vadd.f32 %v3350_v59, %v3011_v28 }
 0x552   : > { %v5077_v52 = vpop.eup %5076  ;;  %3668 = vst [vmem:[%s5608_s18 + $0x98] sm:$0xff] %v3604_v45  ;;  %v3039_v42 = vadd.f32 %v3038_v56, %v7334_v62  ;;  %v7814_v63 = vpop.f32.mrb[53].mxu0  ;;  %v3645_v51 = vmul.f32 %v5075_v33, %v3453_v21  ;;  %v3017_v21 = vadd.f32 %v7745_v12, %v7359_v16  ;;  %v8168_v45 = vpack.c.bf16 %v7486_v14, %v7467_v55 }
 0x553   : > { %v5079_v47 = vpop.eup %5078  ;;  %v3503_v43 = vmul.f32 1.442695, %v5077_v52  ;;  %v4682_v50 = vpack.c.bf16 %v5077_v52, %v5069_v18  ;;  %5092 = vpow2.f32 %v3583_v20  ;;  %v3455_v28 = vadd.f32 %v3391_v2, %v3257_v34  ;;  %v3392_v52 = vld [vmem:[%s5594_s8 + $0x1f8] sm:$0xff] }
 0x554   : > { %v3605_v23 = vmul.f32 %v5079_v47, %v3413_v3  ;;  %5094 = vtanh.f32 %v3039_v42  ;;  %3709 = vst [vmem:[%s5608_s18 + $0x1e0] sm:$0xff] %v3645_v51  ;;  %v3263_v12 = vadd.f32 %v7756_v25, %v7359_v16  ;;  %v3415_v51 = vadd.f32 %v3351_v19, %v3017_v21  ;;  %v3352_v2 = vld [vmem:[%s5594_s8 + $0xb8] sm:$0xff] }
 0x555   : > { %v5081_v30 = vpop.eup %5080  ;;  %5096 = vpow2.f32 %v3503_v43  ;;  %v3044_v9 = vpop.f32.mrb[54].mxu0  ;;  %4683 = vmatprep.subr.bf16.mxu1 %v4682_v50 }
 0x556   : > { %v5083_v13 = vpop.eup %5082  ;;  %3669 = vst [vmem:[%s5608_s18 + $0xa0] sm:$0xff] %v3605_v23  ;;  %v3045_v18 = vadd.f32 %v3044_v9, %v7334_v62  ;;  %v7828_v3 = vpop.f32.mrb[55].mxu0  ;;  %v3646_v33 = vmul.f32 %v5081_v30, %v3454_v54  ;;  %v3023_v54 = vadd.f32 %v7765_v36, %v7359_v16  ;;  %v3456_v43 = vadd.f32 %v3392_v52, %v3263_v12 }
 0x557   : > { %4685 = vmatpush3.bf16.xpose.msra.mxu1 %v8168_v45  ;;  %v5085_v56 = vpop.eup %5084  ;;  %v3505_v20 = vmul.f32 1.442695, %v5083_v13 }
 0x558   : > { %v3606_v59 = vmul.f32 %v5085_v56, %v3414_v8  ;;  %5098 = vtanh.f32 %v3045_v18  ;;  %3710 = vst [vmem:[%s5608_s18 + $0x1e8] sm:$0xff] %v3646_v33  ;;  %v3416_v19 = vadd.f32 %v3352_v2, %v3023_v54  ;;  %v3029_v18 = vadd.f32 %v7781_v22, %v7359_v16  ;;  %v3353_v56 = vld [vmem:[%s5594_s8 + $0xc0] sm:$0xff] }
 0x559   : > { %v5087_v42 = vpop.eup %5086  ;;  %5100 = vpow2.f32 %v3505_v20  ;;  %v3050_v55 = vpop.f32.mrb[56].mxu0 }
 0x55a   : > { %v5089_v14 = vpop.eup %5088  ;;  %3670 = vst [vmem:[%s5608_s18 + $0xa8] sm:$0xff] %v3606_v59  ;;  %v3051_v34 = vadd.f32 %v3050_v55, %v7334_v62  ;;  %v7838_v25 = vpop.f32.mrb[57].mxu0  ;;  %v3647_v47 = vmul.f32 %v5087_v42, %v3455_v28  ;;  %v3417_v22 = vadd.f32 %v3353_v56, %v3029_v18 }
 0x55b   : > { %v5091_v50 = vpop.eup %5090  ;;  %v3507_v23 = vmul.f32 1.442695, %v5089_v14  ;;  %v4686_v30 = vpack.c.bf16 %v5089_v14, %v5083_v13  ;;  %v8169_v13 = vpack.c.bf16 %v7530_v35, %v7511_v48  ;;  %v3035_v48 = vadd.f32 %v7798_v10, %v7359_v16  ;;  %v3354_v14 = vld [vmem:[%s5594_s8 + $0xc8] sm:$0xff] }
 0x55c   : > { %v3607_v8 = vmul.f32 %v5091_v50, %v3415_v51  ;;  %5102 = vtanh.f32 %v3051_v34  ;;  %3711 = vst [vmem:[%s5608_s18 + $0x1f0] sm:$0xff] %v3647_v47  ;;  %v3041_v10 = vadd.f32 %v7814_v63, %v7359_v16 }
 0x55d   : > { %v5093_v21 = vpop.eup %5092  ;;  %5104 = vpow2.f32 %v3507_v23  ;;  %v3056_v9 = vpop.f32.mrb[58].mxu0  ;;  %4687 = vmatprep.subr.bf16.mxu1 %v4686_v30  ;;  %v3418_v2 = vadd.f32 %v3354_v14, %v3035_v48  ;;  %v8170_v30 = vpack.c.bf16 %v7574_v39, %v7555_v58 }
 0x55e   : > { %v5095_v36 = vpop.eup %5094  ;;  %3671 = vst [vmem:[%s5608_s18 + $0xb0] sm:$0xff] %v3607_v8  ;;  %v3057_v45 = vadd.f32 %v3056_v9, %v7334_v62  ;;  %v7849_v33 = vpop.f32.mrb[59].mxu0  ;;  %v3648_v28 = vmul.f32 %v5093_v21, %v3456_v43  ;;  %v3355_v9 = vld [vmem:[%s5594_s8 + $0xd0] sm:$0xff] }
 0x55f   : > { %4689 = vmatpush3.bf16.xpose.msra.mxu1 %v8169_v13  ;;  %v5097_v12 = vpop.eup %5096  ;;  %v3509_v20 = vmul.f32 1.442695, %v5095_v36  ;;  %v3419_v63 = vadd.f32 %v3355_v9, %v3041_v10  ;;  %v3047_v13 = vadd.f32 %v7828_v3, %v7359_v16  ;;  %v3053_v3 = vadd.f32 %v7838_v25, %v7359_v16 }
 0x560   : > { %v3608_v52 = vmul.f32 %v5097_v12, %v3416_v19  ;;  %5106 = vtanh.f32 %v3057_v45  ;;  %3712 = vst [vmem:[%s5608_s18 + $0x1f8] sm:$0xff] %v3648_v28  ;;  %v3356_v12 = vld [vmem:[%s5594_s8 + $0xd8] sm:$0xff] }
 0x561   : > { %5108 = vpow2.f32 %v3509_v20  ;;  %v3062_v59 = vpop.f32.mrb[60].mxu0 }
 0x562   : > { %v5099_v42 = vpop.eup %5098  ;;  %3672 = vst [vmem:[%s5608_s18 + $0xb8] sm:$0xff] %v3608_v52  ;;  %v3063_v35 = vadd.f32 %v3062_v59, %v7334_v62  ;;  %v7857_v51 = vpop.f32.mrb[61].mxu0 }
 0x563   : > { %v5101_v55 = vpop.eup %5100  ;;  %v3511_v54 = vmul.f32 1.442695, %v5099_v42  ;;  %v4690_v34 = vpack.c.bf16 %v5099_v42, %v5095_v36 }
 0x564   : > { %v3609_v47 = vmul.f32 %v5101_v55, %v3417_v22  ;;  %5110 = vtanh.f32 %v3063_v35  ;;  %v3420_v22 = vadd.f32 %v3356_v12, %v3047_v13  ;;  %v8171_v35 = vpack.c.bf16 %v7618_v32, %v7599_v17 }
 0x565   : > { %5112 = vpow2.f32 %v3511_v54  ;;  %v3068_v43 = vpop.f32.mrb[62].mxu0  ;;  %4691 = vmatprep.subr.bf16.mxu1 %v4690_v34  ;;  %v3357_v54 = vld [vmem:[%s5594_s8 + $0xe0] sm:$0xff] }
 0x566   : > { %v5103_v50 = vpop.eup %5102  ;;  %3673 = vst [vmem:[%s5608_s18 + $0xc0] sm:$0xff] %v3609_v47  ;;  %v3069_v23 = vadd.f32 %v3068_v43, %v7334_v62  ;;  %v7867_v8 = vpop.f32.mrb[63].mxu0  ;;  %v3421_v25 = vadd.f32 %v3357_v54, %v3053_v3  ;;  %v3360_v3 = vld [vmem:[%s5594_s8 + $0xf8] sm:$0xff] }
 0x567   : > { %4693 = vmatpush3.bf16.xpose.msra.mxu1 %v8170_v30  ;;  %v5105_v21 = vpop.eup %5104  ;;  %v3513_v36 = vmul.f32 1.442695, %v5103_v50 }
 0x568   : > { %v3610_v19 = vmul.f32 %v5105_v21, %v3418_v2  ;;  %5114 = vtanh.f32 %v3069_v23  ;;  %v3059_v2 = vadd.f32 %v7849_v33, %v7359_v16  ;;  %v3358_v23 = vld [vmem:[%s5594_s8 + $0xe8] sm:$0xff]  ;;  %v3065_v33 = vadd.f32 %v7857_v51, %v7359_v16 }
 0x569   : > { %5116 = vpow2.f32 %v3513_v36  ;;  %v3074_v18 = vpop.f32.mrb[64].mxu0 }
 0x56a   : > { %v5107_v45 = vpop.eup %5106  ;;  %3674 = vst [vmem:[%s5608_s18 + $0xc8] sm:$0xff] %v3610_v19  ;;  %v3075_v58 = vadd.f32 %v3074_v18, %v7334_v62  ;;  %v7874_v39 = vpop.f32.mrb[65].mxu0  ;;  %v3422_v18 = vadd.f32 %v3358_v23, %v3059_v2 }
 0x56b   : > { %v5109_v28 = vpop.eup %5108  ;;  %v3515_v56 = vmul.f32 1.442695, %v5107_v45  ;;  %v4694_v20 = vpack.c.bf16 %v5107_v45, %v5103_v50 }
 0x56c   : > { %v3611_v52 = vmul.f32 %v5109_v28, %v3419_v63  ;;  %5118 = vtanh.f32 %v3075_v58  ;;  %v8172_v63 = vpack.c.bf16 %v7662_v26, %v7643_v4  ;;  %v3359_v28 = vld [vmem:[%s5594_s8 + $0xf0] sm:$0xff]  ;;  %v3071_v4 = vadd.f32 %v7867_v8, %v7359_v16 }
 0x56d   : > { %5120 = vpow2.f32 %v3515_v56  ;;  %4695 = vmatprep.subr.bf16.mxu1 %v4694_v20  ;;  %v3080_v59 = vpop.f32.mrb[66].mxu0  ;;  %v8173_v56 = vpack.c.bf16 %v7519_v15, %v7501_v6  ;;  %v3077_v8 = vadd.f32 %v7874_v39, %v7359_v16 }
 0x56e   : > { %v5111_v42 = vpop.eup %5110  ;;  %3675 = vst [vmem:[%s5608_s18 + $0xd0] sm:$0xff] %v3611_v52  ;;  %v3081_v48 = vadd.f32 %v3080_v59, %v7334_v62  ;;  %v7884_v55 = vpop.f32.mrb[67].mxu0  ;;  %v3423_v59 = vadd.f32 %v3359_v28, %v3065_v33 }
 0x56f   : > { %4697 = vmatpush3.bf16.xpose.msra.mxu1 %v8171_v35  ;;  %v5113_v14 = vpop.eup %5112  ;;  %v3517_v34 = vmul.f32 1.442695, %v5111_v42 }
 0x570   : > { %v3612_v47 = vmul.f32 %v5113_v14, %v3420_v22  ;;  %5122 = vtanh.f32 %v3081_v48  ;;  %v8174_v14 = vmov 1.0  }
 0x571   : > { %5124 = vpow2.f32 %v3517_v34  ;;  %v3086_v43 = vpop.f32.mrb[68].mxu0  ;;  %v3424_v34 = vadd.f32 %v3360_v3, %v3071_v4 }
 0x572   : > { %v5115_v50 = vpop.eup %5114  ;;  %3676 = vst [vmem:[%s5608_s18 + $0xd8] sm:$0xff] %v3612_v47  ;;  %v3087_v17 = vadd.f32 %v3086_v43, %v7334_v62  ;;  %v7891_v32 = vpop.f32.mrb[69].mxu0 }
 0x573   : > { %v5117_v10 = vpop.eup %5116  ;;  %v3519_v30 = vmul.f32 1.442695, %v5115_v50  ;;  %v4698_v21 = vpack.c.bf16 %v5115_v50, %v5111_v42  ;;  %v3089_v28 = vadd.f32 %v7891_v32, %v7359_v16 }
 0x574   : > { %v3613_v9 = vmul.f32 %v5117_v10, %v3421_v25  ;;  %5126 = vtanh.f32 %v3087_v17  ;;  %v3361_v25 = vld [vmem:[%s5594_s8 + $0x100] sm:$0xff]  ;;  %v8175_v17 = vpack.c.bf16 %v7563_v11, %v7545_v24 }
 0x575   : > { %5128 = vpow2.f32 %v3519_v30  ;;  %4699 = vmatprep.subr.bf16.mxu1 %v4698_v21  ;;  %v3092_v36 = vpop.f32.mrb[70].mxu0  ;;  %v3425_v30 = vadd.f32 %v3361_v25, %v3077_v8  ;;  %v3083_v21 = vadd.f32 %v7884_v55, %v7359_v16 }
 0x576   : > { %v5119_v19 = vpop.eup %5118  ;;  %3677 = vst [vmem:[%s5608_s18 + $0xe0] sm:$0xff] %v3613_v9  ;;  %v3093_v45 = vadd.f32 %v3092_v36, %v7334_v62  ;;  %v7901_v13 = vpop.f32.mrb[71].mxu0 }
 0x577   : > { %4701 = vmatpush3.bf16.xpose.msra.mxu1 %v8172_v63  ;;  %v5121_v58 = vpop.eup %5120  ;;  %v3521_v12 = vmul.f32 1.442695, %v5119_v19 }
 0x578   : > { %4703 = vmatprep.subr.bf16.mxu1 %v8173_v56  ;;  %v3614_v20 = vmul.f32 %v5121_v58, %v3422_v18  ;;  %5130 = vtanh.f32 %v3093_v45  ;;  %v3362_v18 = vld [vmem:[%s5594_s8 + $0x108] sm:$0xff] }
 0x579   : > { %5132 = vpow2.f32 %v3521_v12  ;;  %v3098_v51 = vpop.f32.mrb[72].mxu0  ;;  %v3426_v58 = vadd.f32 %v3362_v18, %v3083_v21  ;;  %v3367_v18 = vld [vmem:[%s5594_s8 + $0x130] sm:$0xff] }
 0x57a   : > { %v5123_v52 = vpop.eup %5122  ;;  %3678 = vst [vmem:[%s5608_s18 + $0xe8] sm:$0xff] %v3614_v20  ;;  %v3099_v26 = vadd.f32 %v3098_v51, %v7334_v62  ;;  %v7911_v42 = vpop.f32.mrb[73].mxu0  ;;  %v3363_v20 = vld [vmem:[%s5594_s8 + $0x110] sm:$0xff] }
 0x57b   : > { %v5125_v22 = vpop.eup %5124  ;;  %v3523_v48 = vmul.f32 1.442695, %v5123_v52  ;;  %v4704_v6 = vpack.c.bf16 %v5123_v52, %v5119_v19  ;;  %v8176_v52 = vpack.c.bf16 %v7607_v31, %v7589_v38  ;;  %v3427_v32 = vadd.f32 %v3363_v20, %v3089_v28  ;;  %v3369_v20 = vld [vmem:[%s5594_s8 + $0x140] sm:$0xff] }
 0x57c   : > { %v3615_v15 = vmul.f32 %v5125_v22, %v3423_v59  ;;  %5134 = vtanh.f32 %v3099_v26  ;;  %v3095_v22 = vadd.f32 %v7901_v13, %v7359_v16  ;;  %v3101_v8 = vadd.f32 %v7911_v42, %v7359_v16  ;;  %v3366_v42 = vld [vmem:[%s5594_s8 + $0x128] sm:$0xff] }
 0x57d   : > { %5136 = vpow2.f32 %v3523_v48  ;;  %v3104_v35 = vpop.f32.mrb[74].mxu0 }
 0x57e   : > { %4283 = vmatmul.mubr.f32.vlgmr.msra.gmra.mrb[46].mxu1 %v8174_v14  ;;  %v5127_v54 = vpop.eup %5126  ;;  %3679 = vst [vmem:[%s5608_s18 + $0xf0] sm:$0xff] %v3615_v15  ;;  %v3105_v47 = vadd.f32 %v3104_v35, %v7334_v62  ;;  %v7919_v43 = vpop.f32.mrb[75].mxu0  ;;  %v3364_v15 = vld [vmem:[%s5594_s8 + $0x118] sm:$0xff] }
 0x57f   : > { %4705 = vmatpush3.bf16.xpose.msra.mxu1 %v4704_v6  ;;  %4316 = vmatprep.mubr.f32.mxu1 %v8174_v14  ;;  %v5129_v50 = vpop.eup %5128  ;;  %v3525_v2 = vmul.f32 1.442695, %v5127_v54 }
 0x580   : > { %4707 = vmatprep.subr.bf16.mxu1 %v8175_v17  ;;  %v3616_v10 = vmul.f32 %v5129_v50, %v3424_v34  ;;  %5138 = vtanh.f32 %v3105_v47  ;;  %v3428_v34 = vadd.f32 %v3364_v15, %v3095_v22  ;;  %v3365_v47 = vld [vmem:[%s5594_s8 + $0x120] sm:$0xff]  ;;  %v8177_v50 = vpack.c.bf16 %v7651_v41, %v7633_v60  ;;  %v8186_v22 = vld [vmem:[#allocation23_spill] sm:$0xff] }
 0x581   : > { %5140 = vpow2.f32 %v3525_v2  ;;  %v3110_v23 = vpop.f32.mrb[76].mxu0  ;;  %v3429_v17 = vadd.f32 %v3365_v47, %v3101_v8  ;;  %v8187_v15 = vlaneseq }
 0x582   : > { %v5131_v39 = vpop.eup %5130  ;;  %3680 = vst [vmem:[%s5608_s18 + $0xf8] sm:$0xff] %v3616_v10  ;;  %v3111_v9 = vadd.f32 %v3110_v23, %v7334_v62  ;;  %v3112_v36 = vpop.f32.mrb[77].mxu0  ;;  %v3107_v10 = vadd.f32 %v7919_v43, %v7359_v16  ;;  %v8178_v43 = vpack.c.bf16 %v7692_v61, %v7677_v29 }
 0x583   : > { %v5133_v19 = vpop.eup %5132  ;;  %v3527_v33 = vmul.f32 1.442695, %v5131_v39  ;;  %v4708_v11 = vpack.c.bf16 %v5131_v39, %v5127_v54  ;;  %v3113_v60 = vadd.f32 %v3112_v36, %v7359_v16  ;;  %vm3886_vm0 = vcmp.lt.s32.totalorder %v8187_v15, 512 }
 0x584   : > { %v3617_v24 = vmul.f32 %v5133_v19, %v3425_v30  ;;  %5142 = vtanh.f32 %v3111_v9  ;;  %v3430_v41 = vadd.f32 %v3366_v42, %v3107_v10 }
 0x585   : > { %5144 = vpow2.f32 %v3527_v33  ;;  %v3116_v45 = vpop.f32.mrb[78].mxu0 }
 0x586   : > { %v5135_v63 = vpop.eup %5134  ;;  %3681 = vst [vmem:[%s5608_s18 + $0x100] sm:$0xff] %v3617_v24  ;;  %v3117_v55 = vadd.f32 %v3116_v45, %v7334_v62  ;;  %v3118_v12 = vpop.f32.mrb[79].mxu0  ;;  %v3431_v24 = vadd.f32 %v3367_v18, %v3113_v60 }
 0x587   : > { %4709 = vmatpush3.bf16.xpose.msra.mxu1 %v4708_v11  ;;  %v5137_v56 = vpop.eup %5136  ;;  %v3529_v51 = vmul.f32 1.442695, %v5135_v63  ;;  %v3119_v45 = vadd.f32 %v3118_v12, %v7359_v16 }
 0x588   : > { %4711 = vmatprep.subr.bf16.mxu1 %v8176_v52  ;;  %v3618_v59 = vmul.f32 %v5137_v56, %v3426_v58  ;;  %5146 = vtanh.f32 %v3117_v55  ;;  %v3368_v58 = vld [vmem:[%s5594_s8 + $0x138] sm:$0xff]  ;;  %v8179_v56 = vpack.c.bf16 %v7731_v27, %v7713_v57  ;;  %v8183_v57 = vld [vmem:[#allocation26_spill] sm:$0xff] }
 0x589   : > { %5148 = vpow2.f32 %v3529_v51  ;;  %v3122_v4 = vpop.f32.mrb[80].mxu0  ;;  %v3432_v55 = vadd.f32 %v3368_v58, %v3119_v45  ;;  %v8184_v27 = vld [vmem:[#allocation25_spill] sm:$0xff] }
 0x58a   : > { %v5139_v26 = vpop.eup %5138  ;;  %3682 = vst [vmem:[%s5608_s18 + $0x108] sm:$0xff] %v3618_v59  ;;  %v3123_v3 = vadd.f32 %v3122_v4, %v7334_v62  ;;  %v3124_v48 = vpop.f32.mrb[81].mxu0  ;;  %v8180_v4 = vpack.c.bf16 %v7390_v40, %v7373_v46 }
 0x58b   : > { %v5141_v6 = vpop.eup %5140  ;;  %v3531_v35 = vmul.f32 1.442695, %v5139_v26  ;;  %v4712_v31 = vpack.c.bf16 %v5139_v26, %v5135_v63  ;;  %v3125_v29 = vadd.f32 %v3124_v48, %v7359_v16  ;;  %v8185_v26 = vpack.c.bf16 %v8183_v57, %v8184_v27 }
 0x58c   : > { %v3619_v38 = vmul.f32 %v5141_v6, %v3427_v32  ;;  %5150 = vtanh.f32 %v3123_v3 }
 0x58d   : > { %5152 = vpow2.f32 %v3531_v35  ;;  %v3433_v12 = vadd.f32 %v3369_v20, %v3125_v29 }
 0x58e   : > { %v5143_v54 = vpop.eup %5142  ;;  %3683 = vst [vmem:[%s5608_s18 + $0x110] sm:$0xff] %v3619_v38 }
 0x58f   : > { %4713 = vmatpush3.bf16.xpose.msra.mxu1 %v4712_v31  ;;  %v5145_v13 = vpop.eup %5144  ;;  %v3533_v62 = vmul.f32 1.442695, %v5143_v54 }
 0x590   : > { %4715 = vmatprep.subr.bf16.mxu1 %v8177_v50  ;;  %v3620_v25 = vmul.f32 %v5145_v13, %v3428_v34 }
 0x591   : > { %5154 = vpow2.f32 %v3533_v62 }
 0x592   : > { %v5147_v2 = vpop.eup %5146  ;;  %3684 = vst [vmem:[%s5608_s18 + $0x118] sm:$0xff] %v3620_v25 }
 0x593   : > { %v5149_v23 = vpop.eup %5148  ;;  %v3535_v39 = vmul.f32 1.442695, %v5147_v2  ;;  %v4716_v30 = vpack.c.bf16 %v5147_v2, %v5143_v54 }
 0x594   : > { %v3621_v21 = vmul.f32 %v5149_v23, %v3429_v17 }
 0x595   : > { %5156 = vpow2.f32 %v3535_v39 }
 0x596   : > { %v5151_v9 = vpop.eup %5150  ;;  %3685 = vst [vmem:[%s5608_s18 + $0x120] sm:$0xff] %v3621_v21 }
 0x597   : > { %4717 = vmatpush3.bf16.xpose.msra.mxu1 %v4716_v30  ;;  %v5153_v19 = vpop.eup %5152  ;;  %v3537_v33 = vmul.f32 1.442695, %v5151_v9  ;;  %v4720_v28 = vpack.c.bf16 %v7357_v5, %v5151_v9  ;;  %v8181_v5 = vld [vmem:[#allocation24_spill] sm:$0xff] }
 0x598   : > { %4719 = vmatprep.subr.bf16.mxu1 %v8178_v43  ;;  %v3622_v11 = vmul.f32 %v5153_v19, %v3430_v41  ;;  %v8182_v16 = vpack.c.bf16 %v7431_v0, %v8181_v5 }
 0x599   : > { %5158 = vpow2.f32 %v3537_v33 }
 0x59a   : > { %3686 = vst [vmem:[%s5608_s18 + $0x128] sm:$0xff] %v3622_v11 }
 0x59b   : > { %v5155_v63 = vpop.eup %5154 }
 0x59c   : > { %v3623_v36 = vmul.f32 %v5155_v63, %v3431_v24 }
 0x59e   : > { %3687 = vst [vmem:[%s5608_s18 + $0x130] sm:$0xff] %v3623_v36 }
 0x59f   : > { %4721 = vmatpush3.bf16.xpose.msra.mxu1 %v4720_v28  ;;  %v5157_v61 = vpop.eup %5156 }
 0x5a0   : > { %4723 = vmatprep.subr.bf16.mxu1 %v8179_v56  ;;  %v3624_v51 = vmul.f32 %v5157_v61, %v3432_v55 }
 0x5a2   : > { %3688 = vst [vmem:[%s5608_s18 + $0x138] sm:$0xff] %v3624_v51 }
 0x5a3   : > { %v5159_v52 = vpop.eup %5158 }
 0x5a4   : > { %v3625_v59 = vmul.f32 %v5159_v52, %v3433_v12 }
 0x5a6   : > { %3689 = vst [vmem:[%s5608_s18 + $0x140] sm:$0xff] %v3625_v59 }
 0x5a7   : > { %4725 = vmatpush3.bf16.xpose.msra.mxu1 %v8180_v4 }
 0x5a8   : > { %4727 = vmatprep.subr.bf16.mxu1 %v4726_v7  ;;  %v3863_v7 = vunpack.c.0.s8 %v3862_v37 }
 0x5aa   : > { %v3866_v0 = vsub.s32 %v3863_v7, %v8186_v22 }
 0x5af   : > { %4729 = vmatpush3.bf16.xpose.msra.mxu1 %v8182_v16 }
 0x5b0   : > { %4731 = vmatprep.subr.bf16.mxu1 %v4730_v1 }
 0x5b7   : > { %4733 = vmatpush3.bf16.xpose.msra.mxu1 %v8185_v26 }
 0x5be   : > { %4317 = vmatmul.mubr.f32.vlgmr.msra.gmra.mrb[48].mxu1 %v8174_v14 }
 0x651   : > { %v3779_v46 = vpop.f32.mrb[46].mxu1 }
 0x652   : > { %v3781_v40 = vpop.f32.mrb[47].mxu1 }
 0x653   : > { %v3859_v32 = vcombine.low %v3779_v46, %v3781_v40 }
 0x655   : > { %v3867_v53 = vrot.slane %v3859_v32, %v3866_v0 }
 0x691   : > { %v3850_v3 = vpop.f32.mrb[48].mxu1 }
 0x692   : > { %v3852_v48 = vpop.f32.mrb[49].mxu1 }
 0x693   : > { %v3860_v6 = vcombine.low %v3850_v3, %v3852_v48 }
 0x695   : > { %v3874_v49 = vrot.slane %v3860_v6, %v3866_v0 }
 0x697   : > { %v3875_v1 = vcombine.low %v3867_v53, %v3874_v49 }
 0x699   : > { %v3882_v35 = vrot.slane %v3875_v1, %v3866_v0 }
 0x69b   : > { %3888 = vst.msk [vmem:[%s5610_s5] sm:$0xf] %vm3886_vm0, %v3882_v35 }
 0x69c PF: > { %p3902_p13 = scmp.eq.s32.totalorder %s5333_s28, 2  ;;  %s3912_s8 = sshll.u32 %s5608_s18, 4  ;;  %s7997_s8 = int_to_ptr.vmem [resolvable:$true] %s3912_s8 }
 0x69d   : > { %s8188_s4 = sld [smem:[#allocation38_spill]]  ;;  %s3890_s1 = scalar_lea.sflag [#allocation11], %s5601_s14 }
 0x69e   : > { %s8210_s27 = smov (!%p3902_p13, %s5329_s27), 0  ;;  %s5190_s28 = scalar_lea.vmem %s7997_s8, 8192 }
 0x69f   : > { %s4088_s19 = sshll.u32 %s8210_s27, 14  ;;  %s4089_s29 = sshll.u32 %s8210_s27, 6 }
 0x6a0   : > { %p5191_p1 = scmp.ne.s32.totalorder %s7997_s8, %s5190_s28  ;;  %p8189_p9 = scmp.ne.s32.totalorder %s8144_s9, 0 }
 0x6a1   : > { %s5355_s18 = smov [#allocation12]  }
 0x6a2   : > { %p5192_p3 = pnand %p5191_p1, %p8189_p9  ;;  %s5194_s30 = sshll.u32 %s5355_s18, 4  ;;  %s5195_s30 = int_to_ptr.vmem [resolvable:$false] %s5194_s30 }
 0x6a3   : > { %s4000_s24 = scalar_lea.hbm %s8188_s4, %s4088_s19  ;;  %s5196_s15 = scalar_lea.vmem %s5195_s30, 16384 }
 0x6a4   : > { %s8003_s20 = scalar_lea.hbm %s4000_s24, 128  ;;  %p5193_p4 = pneg %p5192_p3 }
 0x6a5   : > { %p5197_p12 = scmp.lt.s32.totalorder %s7997_s8, %s5195_s30  ;;  %p5198_p0 = scmp.lt.s32.totalorder %s5196_s15, %s5190_s28 }
 0x6a7   : > { %p5199_p2 = por %p5198_p0, %p5197_p12 }
 0x6a9   : > { %p5200_p5 = pnand %p5199_p2, %p5193_p4 }
 0x6ab   : > { %5203 = shalt.err (!%p5200_p5)
}
 0x6ac   : > { %s5218_s17 = scalar_lea.hbm %s4000_s24, 8320  ;;  %s5208_s6 = scalar_lea.hbm %s8188_s4, 32768 }
 0x6ad   : > { %p5205_p7 = scmp.ne.s32.totalorder %s8003_s20, %s5218_s17  ;;  %p5209_p6 = scmp.lt.u32.totalorder %s8003_s20, %s8188_s4 }
 0x6ae   : > { %p5210_p8 = scmp.lt.u32.totalorder %s5208_s6, %s5218_s17  ;;  %p5212_p1 = scmp.lt.u32.totalorder %s5218_s17, %s8003_s20 }
 0x6af   : > { %p5206_p11 = pnand %p5205_p7, %p8189_p9 }
 0x6b0   : > { %p5211_p13 = por %p5210_p8, %p5209_p6 }
 0x6b1   : > { %p5207_p10 = pneg %p5206_p11 }
 0x6b2   : > { %p5213_p3 = por %p5212_p1, %p5211_p13 }
 0x6b4   : > { %p5214_p4 = pnand %p5213_p3, %p5207_p10 }
 0x6b6   : > { %5217 = shalt.err (!%p5214_p4)
}
 0x6b7   : > { %s5356_s24 = smov 128   ;;  %s5357_s28 = smov 256  }
 0x6b8   : > { %s5358_s30 = smov 8   ;;  %s8190_s16 = sld [smem:[#allocation39_spill]] }
 0x6b9   : > { %4784 = dma.vmem_to_hbm [thread:$0]  (%p8189_p9), %s7997_s8, 8192, %s8003_s20, %s3890_s1, %s5356_s24, %s5357_s28, %s5358_s30  }
 0x6ba   : > { %s3931_s6 = sshll.u32 %s5610_s5, 4  ;;  %s3895_s0 = scalar_lea.sflag [#allocation14], %s5601_s14  ;;  %s3932_s6 = int_to_ptr.vmem [resolvable:$true] %s3931_s6 }
 0x6bb   : > { %s5219_s18 = scalar_lea.vmem %s3932_s6, 64  ;;  %s5359_s2 = smov [#allocation13]  }
 0x6bc   : > { %p5220_p12 = scmp.ne.s32.totalorder %s3932_s6, %s5219_s18  ;;  %s5223_s3 = sshll.u32 %s5359_s2, 4  ;;  %s5224_s3 = int_to_ptr.vmem [resolvable:$false] %s5223_s3 }
 0x6bd   : > { %s5225_s4 = scalar_lea.vmem %s5224_s3, 128  ;;  %p5226_p5 = scmp.lt.s32.totalorder %s3932_s6, %s5224_s3 }
 0x6be   : > { %s8034_s19 = scalar_lea.hbm %s8190_s16, %s4089_s29  ;;  %p5221_p0 = pnand %p5220_p12, %p8189_p9 }
 0x6bf   : > { %p5227_p7 = scmp.lt.s32.totalorder %s5225_s4, %s5219_s18 }
 0x6c0   : > { %p5222_p2 = pneg %p5221_p0 }
 0x6c1   : > { %p5228_p11 = por %p5227_p7, %p5226_p5 }
 0x6c3   : > { %p5229_p10 = pnand %p5228_p11, %p5222_p2 }
 0x6c5   : > { %5232 = shalt.err (!%p5229_p10)
}
 0x6c6   : > { %s5233_s27 = scalar_lea.hbm %s8034_s19, 64  ;;  %s5237_s2 = scalar_lea.hbm %s8190_s16, 128 }
 0x6c7   : > { %p5234_p6 = scmp.ne.s32.totalorder %s8034_s19, %s5233_s27  ;;  %p5238_p1 = scmp.lt.u32.totalorder %s8034_s19, %s8190_s16 }
 0x6c8   : > { %p5239_p3 = scmp.lt.u32.totalorder %s5237_s2, %s5233_s27  ;;  %p5241_p12 = scmp.lt.u32.totalorder %s5233_s27, %s8034_s19 }
 0x6c9   : > { %p5235_p8 = pnand %p5234_p6, %p8189_p9 }
 0x6ca   : > { %p5240_p4 = por %p5239_p3, %p5238_p1 }
 0x6cb   : > { %p5236_p13 = pneg %p5235_p8 }
 0x6cc   : > { %p5242_p0 = por %p5241_p12, %p5240_p4 }
 0x6ce   : > { %p5243_p2 = pnand %p5242_p0, %p5236_p13 }
 0x6d0   : > { %5246 = shalt.err (!%p5243_p2)
}
 0x6d1   : > { %4785 = dma.vmem_to_hbm [thread:$0]  (%p8189_p9), %s3932_s6, 64, %s8034_s19, %s3895_s0  }
 0x6d2 PF: > { %p4800_p5 = scmp.ge.s32.totalorder %s5345_s13, 2  ;;  %s3943_s4 = sand.u32 1, %s5305_s21  }
 0x6d3   : > { %p8191_p7 = scmp.ne.s32.totalorder %s8146_s11, 0  ;;  %s3944_s20 = scalar_lea.sflag [#allocation11], %s3943_s4 }
 0x6d5   : > { %p4793_p11 = pnand %p4800_p5, %p8191_p7 }
 0x6d7   : > { %5296 = dma.done.wait (!%p4793_p11), %s3944_s20, 8192  }
 0x6d8   : > { %5298 = vsyncadd (!%p4793_p11), %s3944_s20, 4294959104  ;;  %s3953_s29 = scalar_lea.sflag [#allocation14], %s3943_s4 }
 0x6d9   : > { %5300 = dma.done.wait (!%p4793_p11), %s3953_s29, 64  }
 0x6da   : > { %5302 = vsyncadd (!%p4793_p11), %s3953_s29, 4294967232  ;;  %s32_s13 = sadd.s32 1, %s5345_s13   ;;  %s8192_s9 = sld [smem:[#allocation22_spill]] }
 0x6db   : > { %p29_p10 = scmp.ge.s32.totalorder %s32_s13, 8   ;;  %s8193_s27 = sld [smem:[#allocation18_spill]] }
 0x6dc   : > { %s8194_s28 = sld [smem:[#allocation19_spill]]  ;;  %s8195_s29 = sld [smem:[#allocation20_spill]] }
 0x6dd   : > { %s8196_s30 = sld [smem:[#allocation21_spill]]  ;;  %s8197_s21 = smov %s5309_s22 }
 0x6de   : > { %s8198_s22 = smov %s5313_s23  ;;  %s8199_s23 = smov %s5538_s10 }
 0x6df   : > { %s8200_s24 = smov %s5321_s25  ;;  %s8201_s25 = smov %s5325_s26 }
 0x6e0   : > { %s8202_s26 = smov %s8192_s9  ;;  %31 = sbr.rel (!%p29_p10) target bundleno = 25 (0x19), region = 153 }
 0x6e7   :  { %3958 = vsyncpa [#allocation10], 1 }
 0x6e8   :  { %3960 = vsyncpa [#allocation10 + $0x1], 1 }
 0x6e9   :  { %3961 = vsyncpa [#allocation11], 1 }
 0x6ea   :  { %3963 = vsyncpa [#allocation11 + $0x1], 1 }
 0x6eb   :  { %3964 = vsyncpa [#allocation14], 1 }
 0x6ec   :  { %3966 = vsyncpa [#allocation14 + $0x1], 1 }

</bundles_post_ra>
